<compile_context>
chip_gen: v5e
topology: v5e:2x2
jax: 0.10.0
libtpu: 0.0.40
codegen_flags: <defaults>
</compile_context>

<pallas_src>
import functools
import math

import jax
import jax.numpy as jnp
import numpy as np
from jax.experimental import pallas as pl
from jax.experimental.pallas import tpu as pltpu


# --------------------------------------------------------------------------
# Pallas kernel
# --------------------------------------------------------------------------
def _layernorm(v, g, b, eps):
    mu = jnp.mean(v, axis=-1, keepdims=True)
    var = jnp.mean((v - mu) ** 2, axis=-1, keepdims=True)
    return (v - mu) * jax.lax.rsqrt(var + eps) * g + b


def _bsarec_kernel(x_ref, lp_ref, mask_ref, vec_ref,
                   wq_ref, wk_ref, wv_ref, wo_ref, w1_ref, w2_ref,
                   out_ref, *, n_heads, head_dim, hidden, inner, alpha, ln_eps):
    f32 = jnp.float32
    bf16 = jnp.bfloat16
    H, I, dh = hidden, inner, head_dim

    x_bf = x_ref[...]                      # (R, H) bf16, R = Bt*S fused rows
    x = x_bf.astype(f32)

    def vec(i, n):                         # row i of packed bias/LN table -> (1, n)
        return vec_ref[i:i + 1, :n]

    beta = vec(0, H)                       # sqrt_beta
    ln1g, ln1b = vec(1, H), vec(2, H)
    bq, bk, bv, bo = vec(3, H), vec(4, H), vec(5, H), vec(6, H)
    ln2g, ln2b = vec(7, H), vec(8, H)
    b1, b2 = vec(9, I), vec(10, H)
    ln3g, ln3b = vec(11, H), vec(12, H)

    # ---------------- FrequencyLayer (dsp branch) ----------------
    # low = irfft(zero_high(rfft(x))) == LP @ x per batch, applied as one
    # block-diagonal (R,R)@(R,H) MXU matmul over the folded batches.
    low = jnp.dot(lp_ref[...], x_bf, preferred_element_type=f32)        # (R, H)
    high = x - low
    seq_emb = low + (beta * beta) * high
    # FrequencyLayer's LayerNorm eps is hard-coded to 1e-12 in the module.
    dsp = _layernorm(seq_emb + x, ln1g, ln1b, 1e-12)

    # ---------------- MultiHeadAttention (gsp branch) ----------------
    q = jnp.dot(x_bf, wq_ref[...], preferred_element_type=f32) + bq
    k = jnp.dot(x_bf, wk_ref[...], preferred_element_type=f32) + bk
    v = jnp.dot(x_bf, wv_ref[...], preferred_element_type=f32) + bv
    q_bf, k_bf, v_bf = q.astype(bf16), k.astype(bf16), v.astype(bf16)

    mask = mask_ref[...]                   # (R, R) block-diag causal additive mask
    scale = 1.0 / math.sqrt(dh)

    # Unrolled per-head 2-D dots on static lane slices (no stack/concatenate
    # relayouts); output projection accumulated per head.
    attn = jnp.zeros_like(q)
    for h in range(n_heads):
        lo = h * dh
        qh = q_bf[:, lo:lo + dh]
        kh = k_bf[:, lo:lo + dh]
        vh = v_bf[:, lo:lo + dh]
        s = jax.lax.dot_general(qh, kh, (((1,), (1,)), ((), ())),
                                preferred_element_type=f32) * scale + mask
        s = s - jnp.max(s, axis=-1, keepdims=True)
        p = jnp.exp(s)
        # approx reciprocal (EUP slot): rows sum to 1 only to ~1e-3.
        p = p * pl.reciprocal(jnp.sum(p, axis=-1, keepdims=True), approx=True)
        ctx = jnp.dot(p.astype(bf16), vh, preferred_element_type=f32)   # (R, dh)
        attn = attn + jnp.dot(ctx.astype(bf16), wo_ref[lo:lo + dh, :],
                              preferred_element_type=f32)
    attn = attn + bo
    gsp = _layernorm(attn + x, ln2g, ln2b, ln_eps)

    # ---------------- BSARecLayer mix + FeedForward ----------------
    hid = alpha * dsp + (1.0 - alpha) * gsp
    ff = jnp.dot(hid.astype(bf16), w1_ref[...], preferred_element_type=f32) + b1
    ff = jnp.maximum(ff, 0.0)              # hidden_act = "relu"
    ff = jnp.dot(ff.astype(bf16), w2_ref[...], preferred_element_type=f32) + b2
    out_ref[...] = _layernorm(ff + hid, ln3g, ln3b, ln_eps)


# --------------------------------------------------------------------------
# Wrapper
# --------------------------------------------------------------------------
def bsarec_block(x, lp, p, *, alpha, n_heads, ln_eps):
    B, S, H = x.shape
    I = p["w1"].shape[1]
    head_dim = H // n_heads
    V = max(H, I)

    # --- batch folding: largest Bt dividing B with Bt*S <= 128 rows/step ---
    Bt = 1
    if S <= 128:
        cap_bt = max(1, 128 // S)
        for d in range(min(B, cap_bt), 0, -1):
            if B % d == 0:
                Bt = d
                break
    R = Bt * S
    if B // Bt > 1 and R % 8 != 0:         # block sublane constraint fallback
        Bt, R = B, B * S
    grid = (B // Bt,)

    # --- constant operands: block-diag low-pass + causal/batch additive mask ---
    lp_big = np.kron(np.eye(Bt, dtype=np.float32), np.asarray(lp, np.float32))
    r = np.arange(R)
    same_b = (r[:, None] // S) == (r[None, :] // S)
    causal = r[None, :] <= r[:, None]
    mask_big = np.where(same_b & causal, 0.0, -10000.0).astype(np.float32)

    # --- pack the tiny bias / LN / sqrt_beta vectors into one (13, V) table ---
    def row(v, n):
        return jnp.pad(v.astype(jnp.float32), ((0, 0), (0, V - n)))
    vecs = jnp.concatenate([
        row(p["beta"], H),
        row(p["ln1g"], H), row(p["ln1b"], H),
        row(p["bq"], H), row(p["bk"], H), row(p["bv"], H), row(p["bo"], H),
        row(p["ln2g"], H), row(p["ln2b"], H),
        row(p["b1"], I), row(p["b2"], H),
        row(p["ln3g"], H), row(p["ln3b"], H),
    ], axis=0)

    bf = lambda a: a.astype(jnp.bfloat16)
    wq, wk, wv, wo = bf(p["wq"]), bf(p["wk"]), bf(p["wv"]), bf(p["wo"])
    w1, w2 = bf(p["w1"]), bf(p["w2"])
    x2 = bf(x.reshape(B * S, H))                       # stream x as bf16 rows

    kernel = functools.partial(_bsarec_kernel, n_heads=n_heads,
                               head_dim=head_dim, hidden=H, inner=I,
                               alpha=alpha, ln_eps=ln_eps)

    def rep(shape):    # constant (block-index-0) input: re-DMA is skipped
        return pl.BlockSpec(shape, lambda i: (0,) * len(shape))

    in_specs = [
        pl.BlockSpec((R, H), lambda i: (i, 0)),        # x rows (bf16)
        rep((R, R)),                                   # block-diag low-pass (bf16)
        rep((R, R)),                                   # additive mask (f32)
        rep((13, V)),                                  # packed biases / LN / beta
        rep((H, H)), rep((H, H)), rep((H, H)), rep((H, H)),   # Wq Wk Wv Wo
        rep((H, I)), rep((I, H)),                      # W1 W2
    ]

    # --- VMEM budget from per-step footprint (incl. temporaries), clamped ---
    def nbytes(shape, dt):
        return int(np.prod(shape)) * jnp.dtype(dt).itemsize
    est = (2 * (nbytes((R, H), jnp.bfloat16) + nbytes((R, H), jnp.float32))
           + 2 * (nbytes((R, R), jnp.bfloat16) + nbytes((R, R), jnp.float32))
           + 2 * (4 * nbytes((H, H), jnp.bfloat16)
                  + nbytes((H, I), jnp.bfloat16) + nbytes((I, H), jnp.bfloat16)
                  + nbytes((13, V), jnp.float32))
           + (12 * nbytes((R, H), jnp.float32)          # q/k/v/dsp/gsp/... temps
              + 2 * nbytes((R, R), jnp.float32)         # scores + probs
              + 2 * nbytes((R, I), jnp.float32)))       # FFN intermediate
    try:
        cap = getattr(pltpu.get_tpu_info(), "vmem_capacity_bytes", 64 * 2 ** 20)
    except Exception:
        cap = 64 * 2 ** 20
    vmem_limit = int(min(int(0.9 * cap), max(32 * 2 ** 20, 2 * est)))

    out2 = pl.pallas_call(
        kernel,
        out_shape=jax.ShapeDtypeStruct((B * S, H), jnp.float32),
        grid=grid,
        in_specs=in_specs,
        out_specs=pl.BlockSpec((R, H), lambda i: (i, 0)),
        compiler_params=pltpu.CompilerParams(
            dimension_semantics=("parallel",),
            vmem_limit_bytes=vmem_limit),
    )(x2, jnp.asarray(lp_big, jnp.bfloat16), jnp.asarray(mask_big),
      vecs, wq, wk, wv, wo, w1, w2)
    return out2.reshape(B, S, H)


# --------------------------------------------------------------------------
# Glue: dense low-pass projection & deterministic parameter init
# --------------------------------------------------------------------------
def lowpass_dense(S, c_keep):
    """Exact (S,S) matrix for rfft -> zero-high-freq -> irfft along the seq axis."""
    eye = np.eye(S, dtype=np.float64)
    f = np.fft.rfft(eye, axis=0, norm="ortho")
    f[c_keep:, :] = 0
    return np.fft.irfft(f, n=S, axis=0, norm="ortho").astype(np.float32)


def init_params(key, H, I):
    ks = jax.random.split(key, 14)
    n = lambda k, shape, s=0.05: (jax.random.normal(k, shape) * s).astype(jnp.float32)
    ones = lambda shape: jnp.ones(shape, jnp.float32)
    zeros = lambda shape: jnp.zeros(shape, jnp.float32)
    return dict(
        beta=jax.random.normal(ks[0], (1, H)).astype(jnp.float32),
        ln1g=ones((1, H)), ln1b=zeros((1, H)),
        wq=n(ks[1], (H, H)), bq=n(ks[2], (1, H)),
        wk=n(ks[3], (H, H)), bk=n(ks[4], (1, H)),
        wv=n(ks[5], (H, H)), bv=n(ks[6], (1, H)),
        wo=n(ks[7], (H, H)), bo=n(ks[8], (1, H)),
        ln2g=ones((1, H)), ln2b=zeros((1, H)),
        w1=n(ks[9], (H, I)), b1=n(ks[10], (1, I)),
        w2=n(ks[11], (I, H)), b2=n(ks[12], (1, H)),
        ln3g=ones((1, H)), ln3b=zeros((1, H)),
    )


# Pure-JAX f32 reference mirroring the PyTorch forward (eval mode, relu act).
def reference(x, mask3, p, *, alpha, n_heads, c_keep, ln_eps):
    B, S, H = x.shape
    dh = H // n_heads

    def ln(v, g, b, eps):
        mu = v.mean(-1, keepdims=True)
        var = ((v - mu) ** 2).mean(-1, keepdims=True)
        return (v - mu) / jnp.sqrt(var + eps) * g[0] + b[0]

    f = jnp.fft.rfft(x, axis=1, norm="ortho")
    f = f.at[:, c_keep:, :].set(0)
    low = jnp.fft.irfft(f, n=S, axis=1, norm="ortho")
    high = x - low
    dsp = ln(low + (p["beta"] ** 2) * high + x, p["ln1g"], p["ln1b"], 1e-12)

    q = (x @ p["wq"] + p["bq"][0]).reshape(B, S, n_heads, dh).transpose(0, 2, 1, 3)
    k = (x @ p["wk"] + p["bk"][0]).reshape(B, S, n_heads, dh).transpose(0, 2, 1, 3)
    v = (x @ p["wv"] + p["bv"][0]).reshape(B, S, n_heads, dh).transpose(0, 2, 1, 3)
    scores = q @ k.transpose(0, 1, 3, 2) / math.sqrt(dh) + mask3[:, None]
    probs = jax.nn.softmax(scores, axis=-1)
    ctx = (probs @ v).transpose(0, 2, 1, 3).reshape(B, S, H)
    gsp = ln(ctx @ p["wo"] + p["bo"][0] + x, p["ln2g"], p["ln2b"], ln_eps)

    h = alpha * dsp + (1.0 - alpha) * gsp
    ff = jnp.maximum(h @ p["w1"] + p["b1"][0], 0.0) @ p["w2"] + p["b2"][0]
    return ln(ff + h, p["ln3g"], p["ln3b"], ln_eps)


# --------------------------------------------------------------------------
if __name__ == "__main__":
    B, S, H, I, NH = 16, 16, 32, 64, 2
    C = 5                      # FrequencyLayer c -> keeps c//2+1 = 3 freq bins
    C_KEEP = C // 2 + 1
    ALPHA = 0.7
    LN_EPS = 1e-12

    key = jax.random.PRNGKey(0)
    kx, kp = jax.random.split(key)
    x = jax.random.normal(kx, (B, S, H)).astype(jnp.float32)

    params = init_params(kp, H, I)
    lp = lowpass_dense(S, C_KEEP)

    out = bsarec_block(x, lp, params, alpha=ALPHA, n_heads=NH, ln_eps=LN_EPS)
    jax.block_until_ready(out)

    # f32 reference with the same causal additive mask the kernel applies.
    causal = jnp.tril(jnp.ones((S, S), jnp.float32))
    mask3 = jnp.tile(((1.0 - causal) * -10000.0)[None], (B, 1, 1))
    ref = reference(x, mask3, params, alpha=ALPHA, n_heads=NH,
                    c_keep=C_KEEP, ln_eps=LN_EPS)
    # bf16-streamed x + bf16 matmuls vs f32 reference -> relaxed tolerance.
    np.testing.assert_allclose(np.asarray(out), np.asarray(ref),
                               rtol=5e-2, atol=5e-2)
    print("KERNEL_OK")
</pallas_src>

<mosaic_0001>
module attributes {stable_mosaic.version = 11 : i64} {
  func.func @_bsarec_kernel(%arg0: i32, %arg1: memref<128x32xbf16, #tpu.memory_space<vmem>>, %arg2: memref<128x128xbf16, #tpu.memory_space<vmem>>, %arg3: memref<128x128xf32, #tpu.memory_space<vmem>>, %arg4: memref<13x64xf32, #tpu.memory_space<vmem>>, %arg5: memref<32x32xbf16, #tpu.memory_space<vmem>>, %arg6: memref<32x32xbf16, #tpu.memory_space<vmem>>, %arg7: memref<32x32xbf16, #tpu.memory_space<vmem>>, %arg8: memref<32x32xbf16, #tpu.memory_space<vmem>>, %arg9: memref<32x64xbf16, #tpu.memory_space<vmem>>, %arg10: memref<64x32xbf16, #tpu.memory_space<vmem>>, %arg11: memref<128x32xf32, #tpu.memory_space<vmem>>) attributes {dimension_semantics = [#tpu.dimension_semantics<parallel>], iteration_bounds = array<i64: 2>, scalar_prefetch = 0 : i64, scratch_operands = 0 : i64, tpu.core_type = #tpu.core_type<tc>, window_params = [{transform_indices = @transform_0, window_bounds = array<i64: 128, 32>}, {pipeline_mode = #tpu.pipeline_mode<synchronous>, transform_indices = @transform_1, window_bounds = array<i64: 128, 128>}, {pipeline_mode = #tpu.pipeline_mode<synchronous>, transform_indices = @transform_2, window_bounds = array<i64: 128, 128>}, {pipeline_mode = #tpu.pipeline_mode<synchronous>, transform_indices = @transform_3, window_bounds = array<i64: 13, 64>}, {pipeline_mode = #tpu.pipeline_mode<synchronous>, transform_indices = @transform_4, window_bounds = array<i64: 32, 32>}, {pipeline_mode = #tpu.pipeline_mode<synchronous>, transform_indices = @transform_5, window_bounds = array<i64: 32, 32>}, {pipeline_mode = #tpu.pipeline_mode<synchronous>, transform_indices = @transform_6, window_bounds = array<i64: 32, 32>}, {pipeline_mode = #tpu.pipeline_mode<synchronous>, transform_indices = @transform_7, window_bounds = array<i64: 32, 32>}, {pipeline_mode = #tpu.pipeline_mode<synchronous>, transform_indices = @transform_8, window_bounds = array<i64: 32, 64>}, {pipeline_mode = #tpu.pipeline_mode<synchronous>, transform_indices = @transform_9, window_bounds = array<i64: 64, 32>}, {transform_indices = @transform_10, window_bounds = array<i64: 128, 32>}]} {
    %c0 = arith.constant 0 : index
    %c0_0 = arith.constant 0 : index
    %0 = vector.load %arg1[%c0, %c0_0] : memref<128x32xbf16, #tpu.memory_space<vmem>>, vector<128x32xbf16>
    %1 = arith.extf %0 : vector<128x32xbf16> to vector<128x32xf32>
    %c0_1 = arith.constant 0 : index
    %c0_2 = arith.constant 0 : index
    %2 = vector.load %arg4[%c0_1, %c0_2] : memref<13x64xf32, #tpu.memory_space<vmem>>, vector<1x32xf32>
    %c1 = arith.constant 1 : index
    %c0_3 = arith.constant 0 : index
    %3 = vector.load %arg4[%c1, %c0_3] : memref<13x64xf32, #tpu.memory_space<vmem>>, vector<1x32xf32>
    %c2 = arith.constant 2 : index
    %c0_4 = arith.constant 0 : index
    %4 = vector.load %arg4[%c2, %c0_4] : memref<13x64xf32, #tpu.memory_space<vmem>>, vector<1x32xf32>
    %c3 = arith.constant 3 : index
    %c0_5 = arith.constant 0 : index
    %5 = vector.load %arg4[%c3, %c0_5] : memref<13x64xf32, #tpu.memory_space<vmem>>, vector<1x32xf32>
    %c4 = arith.constant 4 : index
    %c0_6 = arith.constant 0 : index
    %6 = vector.load %arg4[%c4, %c0_6] : memref<13x64xf32, #tpu.memory_space<vmem>>, vector<1x32xf32>
    %c5 = arith.constant 5 : index
    %c0_7 = arith.constant 0 : index
    %7 = vector.load %arg4[%c5, %c0_7] : memref<13x64xf32, #tpu.memory_space<vmem>>, vector<1x32xf32>
    %c6 = arith.constant 6 : index
    %c0_8 = arith.constant 0 : index
    %8 = vector.load %arg4[%c6, %c0_8] : memref<13x64xf32, #tpu.memory_space<vmem>>, vector<1x32xf32>
    %c7 = arith.constant 7 : index
    %c0_9 = arith.constant 0 : index
    %9 = vector.load %arg4[%c7, %c0_9] : memref<13x64xf32, #tpu.memory_space<vmem>>, vector<1x32xf32>
    %c8 = arith.constant 8 : index
    %c0_10 = arith.constant 0 : index
    %10 = vector.load %arg4[%c8, %c0_10] : memref<13x64xf32, #tpu.memory_space<vmem>>, vector<1x32xf32>
    %c9 = arith.constant 9 : index
    %c0_11 = arith.constant 0 : index
    %11 = vector.load %arg4[%c9, %c0_11] : memref<13x64xf32, #tpu.memory_space<vmem>>, vector<1x64xf32>
    %c10 = arith.constant 10 : index
    %c0_12 = arith.constant 0 : index
    %12 = vector.load %arg4[%c10, %c0_12] : memref<13x64xf32, #tpu.memory_space<vmem>>, vector<1x32xf32>
    %c11 = arith.constant 11 : index
    %c0_13 = arith.constant 0 : index
    %13 = vector.load %arg4[%c11, %c0_13] : memref<13x64xf32, #tpu.memory_space<vmem>>, vector<1x32xf32>
    %c12 = arith.constant 12 : index
    %c0_14 = arith.constant 0 : index
    %14 = vector.load %arg4[%c12, %c0_14] : memref<13x64xf32, #tpu.memory_space<vmem>>, vector<1x32xf32>
    %c0_15 = arith.constant 0 : index
    %c0_16 = arith.constant 0 : index
    %15 = vector.load %arg2[%c0_15, %c0_16] : memref<128x128xbf16, #tpu.memory_space<vmem>>, vector<128x128xbf16>
    %cst = arith.constant dense<0.000000e+00> : vector<128x32xf32>
    %16 = tpu.matmul %15, %0, %cst {dimension_numbers = #tpu.dot_dimension_numbers<[1], [0], [0], [1], [0, 0, 1, 1], [], []>} : vector<128x128xbf16>, vector<128x32xbf16>, vector<128x32xf32> -> vector<128x32xf32>
    %17 = arith.subf %1, %16 : vector<128x32xf32>
    %18 = arith.mulf %2, %2 : vector<1x32xf32>
    %19 = vector.broadcast %18 : vector<1x32xf32> to vector<128x32xf32>
    %20 = arith.mulf %19, %17 : vector<128x32xf32>
    %21 = arith.addf %16, %20 : vector<128x32xf32>
    %22 = arith.addf %21, %1 : vector<128x32xf32>
    %cst_17 = arith.constant dense<0.000000e+00> : vector<128xf32>
    %23 = vector.multi_reduction <add>, %22, %cst_17 [1] : vector<128x32xf32> to vector<128xf32>
    %24 = vector.shape_cast %23 : vector<128xf32> to vector<128x1xf32>
    %cst_18 = arith.constant 3.200000e+01 : f32
    %25 = vector.broadcast %cst_18 : f32 to vector<128x1xf32>
    %26 = arith.divf %24, %25 : vector<128x1xf32>
    %27 = vector.broadcast %26 : vector<128x1xf32> to vector<128x32xf32>
    %28 = arith.subf %22, %27 : vector<128x32xf32>
    %29 = arith.mulf %28, %28 : vector<128x32xf32>
    %cst_19 = arith.constant dense<0.000000e+00> : vector<128xf32>
    %30 = vector.multi_reduction <add>, %29, %cst_19 [1] : vector<128x32xf32> to vector<128xf32>
    %31 = vector.shape_cast %30 : vector<128xf32> to vector<128x1xf32>
    %cst_20 = arith.constant 3.200000e+01 : f32
    %32 = vector.broadcast %cst_20 : f32 to vector<128x1xf32>
    %33 = arith.divf %31, %32 : vector<128x1xf32>
    %34 = vector.broadcast %26 : vector<128x1xf32> to vector<128x32xf32>
    %35 = arith.subf %22, %34 : vector<128x32xf32>
    %cst_21 = arith.constant 9.99999996E-13 : f32
    %36 = vector.broadcast %cst_21 : f32 to vector<128x1xf32>
    %37 = arith.addf %33, %36 : vector<128x1xf32>
    %38 = math.rsqrt %37 : vector<128x1xf32>
    %39 = vector.broadcast %38 : vector<128x1xf32> to vector<128x32xf32>
    %40 = arith.mulf %35, %39 : vector<128x32xf32>
    %41 = vector.broadcast %3 : vector<1x32xf32> to vector<128x32xf32>
    %42 = arith.mulf %40, %41 : vector<128x32xf32>
    %43 = vector.broadcast %4 : vector<1x32xf32> to vector<128x32xf32>
    %44 = arith.addf %42, %43 : vector<128x32xf32>
    %c0_22 = arith.constant 0 : index
    %c0_23 = arith.constant 0 : index
    %45 = vector.load %arg5[%c0_22, %c0_23] : memref<32x32xbf16, #tpu.memory_space<vmem>>, vector<32x32xbf16>
    %cst_24 = arith.constant dense<0.000000e+00> : vector<128x32xf32>
    %46 = tpu.matmul %0, %45, %cst_24 {dimension_numbers = #tpu.dot_dimension_numbers<[1], [0], [0], [1], [0, 0, 1, 1], [], []>} : vector<128x32xbf16>, vector<32x32xbf16>, vector<128x32xf32> -> vector<128x32xf32>
    %47 = vector.broadcast %5 : vector<1x32xf32> to vector<128x32xf32>
    %48 = arith.addf %46, %47 : vector<128x32xf32>
    %c0_25 = arith.constant 0 : index
    %c0_26 = arith.constant 0 : index
    %49 = vector.load %arg6[%c0_25, %c0_26] : memref<32x32xbf16, #tpu.memory_space<vmem>>, vector<32x32xbf16>
    %cst_27 = arith.constant dense<0.000000e+00> : vector<128x32xf32>
    %50 = tpu.matmul %0, %49, %cst_27 {dimension_numbers = #tpu.dot_dimension_numbers<[1], [0], [0], [1], [0, 0, 1, 1], [], []>} : vector<128x32xbf16>, vector<32x32xbf16>, vector<128x32xf32> -> vector<128x32xf32>
    %51 = vector.broadcast %6 : vector<1x32xf32> to vector<128x32xf32>
    %52 = arith.addf %50, %51 : vector<128x32xf32>
    %c0_28 = arith.constant 0 : index
    %c0_29 = arith.constant 0 : index
    %53 = vector.load %arg7[%c0_28, %c0_29] : memref<32x32xbf16, #tpu.memory_space<vmem>>, vector<32x32xbf16>
    %cst_30 = arith.constant dense<0.000000e+00> : vector<128x32xf32>
    %54 = tpu.matmul %0, %53, %cst_30 {dimension_numbers = #tpu.dot_dimension_numbers<[1], [0], [0], [1], [0, 0, 1, 1], [], []>} : vector<128x32xbf16>, vector<32x32xbf16>, vector<128x32xf32> -> vector<128x32xf32>
    %55 = vector.broadcast %7 : vector<1x32xf32> to vector<128x32xf32>
    %56 = arith.addf %54, %55 : vector<128x32xf32>
    %57 = arith.truncf %48 : vector<128x32xf32> to vector<128x32xbf16>
    %58 = arith.truncf %52 : vector<128x32xf32> to vector<128x32xbf16>
    %59 = arith.truncf %56 : vector<128x32xf32> to vector<128x32xbf16>
    %c0_31 = arith.constant 0 : index
    %c0_32 = arith.constant 0 : index
    %60 = vector.load %arg3[%c0_31, %c0_32] : memref<128x128xf32, #tpu.memory_space<vmem>>, vector<128x128xf32>
    %cst_33 = arith.constant 0.000000e+00 : f32
    %61 = vector.broadcast %cst_33 : f32 to vector<128x32xf32>
    %62 = vector.extract_strided_slice %57 {offsets = [0, 0], sizes = [128, 16], strides = [1, 1]} : vector<128x32xbf16> to vector<128x16xbf16>
    %63 = vector.extract_strided_slice %58 {offsets = [0, 0], sizes = [128, 16], strides = [1, 1]} : vector<128x32xbf16> to vector<128x16xbf16>
    %64 = vector.extract_strided_slice %59 {offsets = [0, 0], sizes = [128, 16], strides = [1, 1]} : vector<128x32xbf16> to vector<128x16xbf16>
    %cst_34 = arith.constant dense<0.000000e+00> : vector<128x128xf32>
    %65 = tpu.matmul %62, %63, %cst_34 {dimension_numbers = #tpu.dot_dimension_numbers<[1], [1], [0], [0], [0, 0, 1, 0], [], []>} : vector<128x16xbf16>, vector<128x16xbf16>, vector<128x128xf32> -> vector<128x128xf32>
    %cst_35 = arith.constant 2.500000e-01 : f32
    %66 = vector.broadcast %cst_35 : f32 to vector<128x128xf32>
    %67 = arith.mulf %65, %66 : vector<128x128xf32>
    %68 = arith.addf %67, %60 : vector<128x128xf32>
    %cst_36 = arith.constant dense<0xFF800000> : vector<128xf32>
    %69 = vector.multi_reduction <maximumf>, %68, %cst_36 [1] : vector<128x128xf32> to vector<128xf32>
    %70 = vector.shape_cast %69 : vector<128xf32> to vector<128x1xf32>
    %71 = vector.broadcast %70 : vector<128x1xf32> to vector<128x128xf32>
    %72 = arith.subf %68, %71 : vector<128x128xf32>
    %73 = math.exp %72 : vector<128x128xf32>
    %cst_37 = arith.constant dense<0.000000e+00> : vector<128xf32>
    %74 = vector.multi_reduction <add>, %73, %cst_37 [1] : vector<128x128xf32> to vector<128xf32>
    %75 = vector.shape_cast %74 : vector<128xf32> to vector<128x1xf32>
    %76 = tpu.reciprocal %75 {approx = true} : vector<128x1xf32> -> vector<128x1xf32>
    %77 = vector.broadcast %76 : vector<128x1xf32> to vector<128x128xf32>
    %78 = arith.mulf %73, %77 : vector<128x128xf32>
    %79 = arith.truncf %78 : vector<128x128xf32> to vector<128x128xbf16>
    %cst_38 = arith.constant dense<0.000000e+00> : vector<128x16xf32>
    %80 = tpu.matmul %79, %64, %cst_38 {dimension_numbers = #tpu.dot_dimension_numbers<[1], [0], [0], [1], [0, 0, 1, 1], [], []>} : vector<128x128xbf16>, vector<128x16xbf16>, vector<128x16xf32> -> vector<128x16xf32>
    %81 = arith.truncf %80 : vector<128x16xf32> to vector<128x16xbf16>
    %c0_39 = arith.constant 0 : index
    %c0_40 = arith.constant 0 : index
    %82 = vector.load %arg8[%c0_39, %c0_40] : memref<32x32xbf16, #tpu.memory_space<vmem>>, vector<16x32xbf16>
    %cst_41 = arith.constant dense<0.000000e+00> : vector<128x32xf32>
    %83 = tpu.matmul %81, %82, %cst_41 {dimension_numbers = #tpu.dot_dimension_numbers<[1], [0], [0], [1], [0, 0, 1, 1], [], []>} : vector<128x16xbf16>, vector<16x32xbf16>, vector<128x32xf32> -> vector<128x32xf32>
    %84 = arith.addf %61, %83 : vector<128x32xf32>
    %85 = vector.extract_strided_slice %57 {offsets = [0, 16], sizes = [128, 16], strides = [1, 1]} : vector<128x32xbf16> to vector<128x16xbf16>
    %86 = vector.extract_strided_slice %58 {offsets = [0, 16], sizes = [128, 16], strides = [1, 1]} : vector<128x32xbf16> to vector<128x16xbf16>
    %87 = vector.extract_strided_slice %59 {offsets = [0, 16], sizes = [128, 16], strides = [1, 1]} : vector<128x32xbf16> to vector<128x16xbf16>
    %cst_42 = arith.constant dense<0.000000e+00> : vector<128x128xf32>
    %88 = tpu.matmul %85, %86, %cst_42 {dimension_numbers = #tpu.dot_dimension_numbers<[1], [1], [0], [0], [0, 0, 1, 0], [], []>} : vector<128x16xbf16>, vector<128x16xbf16>, vector<128x128xf32> -> vector<128x128xf32>
    %cst_43 = arith.constant 2.500000e-01 : f32
    %89 = vector.broadcast %cst_43 : f32 to vector<128x128xf32>
    %90 = arith.mulf %88, %89 : vector<128x128xf32>
    %91 = arith.addf %90, %60 : vector<128x128xf32>
    %cst_44 = arith.constant dense<0xFF800000> : vector<128xf32>
    %92 = vector.multi_reduction <maximumf>, %91, %cst_44 [1] : vector<128x128xf32> to vector<128xf32>
    %93 = vector.shape_cast %92 : vector<128xf32> to vector<128x1xf32>
    %94 = vector.broadcast %93 : vector<128x1xf32> to vector<128x128xf32>
    %95 = arith.subf %91, %94 : vector<128x128xf32>
    %96 = math.exp %95 : vector<128x128xf32>
    %cst_45 = arith.constant dense<0.000000e+00> : vector<128xf32>
    %97 = vector.multi_reduction <add>, %96, %cst_45 [1] : vector<128x128xf32> to vector<128xf32>
    %98 = vector.shape_cast %97 : vector<128xf32> to vector<128x1xf32>
    %99 = tpu.reciprocal %98 {approx = true} : vector<128x1xf32> -> vector<128x1xf32>
    %100 = vector.broadcast %99 : vector<128x1xf32> to vector<128x128xf32>
    %101 = arith.mulf %96, %100 : vector<128x128xf32>
    %102 = arith.truncf %101 : vector<128x128xf32> to vector<128x128xbf16>
    %cst_46 = arith.constant dense<0.000000e+00> : vector<128x16xf32>
    %103 = tpu.matmul %102, %87, %cst_46 {dimension_numbers = #tpu.dot_dimension_numbers<[1], [0], [0], [1], [0, 0, 1, 1], [], []>} : vector<128x128xbf16>, vector<128x16xbf16>, vector<128x16xf32> -> vector<128x16xf32>
    %104 = arith.truncf %103 : vector<128x16xf32> to vector<128x16xbf16>
    %c16 = arith.constant 16 : index
    %c0_47 = arith.constant 0 : index
    %105 = vector.load %arg8[%c16, %c0_47] : memref<32x32xbf16, #tpu.memory_space<vmem>>, vector<16x32xbf16>
    %cst_48 = arith.constant dense<0.000000e+00> : vector<128x32xf32>
    %106 = tpu.matmul %104, %105, %cst_48 {dimension_numbers = #tpu.dot_dimension_numbers<[1], [0], [0], [1], [0, 0, 1, 1], [], []>} : vector<128x16xbf16>, vector<16x32xbf16>, vector<128x32xf32> -> vector<128x32xf32>
    %107 = arith.addf %84, %106 : vector<128x32xf32>
    %108 = vector.broadcast %8 : vector<1x32xf32> to vector<128x32xf32>
    %109 = arith.addf %107, %108 : vector<128x32xf32>
    %110 = arith.addf %109, %1 : vector<128x32xf32>
    %cst_49 = arith.constant dense<0.000000e+00> : vector<128xf32>
    %111 = vector.multi_reduction <add>, %110, %cst_49 [1] : vector<128x32xf32> to vector<128xf32>
    %112 = vector.shape_cast %111 : vector<128xf32> to vector<128x1xf32>
    %cst_50 = arith.constant 3.200000e+01 : f32
    %113 = vector.broadcast %cst_50 : f32 to vector<128x1xf32>
    %114 = arith.divf %112, %113 : vector<128x1xf32>
    %115 = vector.broadcast %114 : vector<128x1xf32> to vector<128x32xf32>
    %116 = arith.subf %110, %115 : vector<128x32xf32>
    %117 = arith.mulf %116, %116 : vector<128x32xf32>
    %cst_51 = arith.constant dense<0.000000e+00> : vector<128xf32>
    %118 = vector.multi_reduction <add>, %117, %cst_51 [1] : vector<128x32xf32> to vector<128xf32>
    %119 = vector.shape_cast %118 : vector<128xf32> to vector<128x1xf32>
    %cst_52 = arith.constant 3.200000e+01 : f32
    %120 = vector.broadcast %cst_52 : f32 to vector<128x1xf32>
    %121 = arith.divf %119, %120 : vector<128x1xf32>
    %122 = vector.broadcast %114 : vector<128x1xf32> to vector<128x32xf32>
    %123 = arith.subf %110, %122 : vector<128x32xf32>
    %cst_53 = arith.constant 9.99999996E-13 : f32
    %124 = vector.broadcast %cst_53 : f32 to vector<128x1xf32>
    %125 = arith.addf %121, %124 : vector<128x1xf32>
    %126 = math.rsqrt %125 : vector<128x1xf32>
    %127 = vector.broadcast %126 : vector<128x1xf32> to vector<128x32xf32>
    %128 = arith.mulf %123, %127 : vector<128x32xf32>
    %129 = vector.broadcast %9 : vector<1x32xf32> to vector<128x32xf32>
    %130 = arith.mulf %128, %129 : vector<128x32xf32>
    %131 = vector.broadcast %10 : vector<1x32xf32> to vector<128x32xf32>
    %132 = arith.addf %130, %131 : vector<128x32xf32>
    %cst_54 = arith.constant 0.699999988 : f32
    %133 = vector.broadcast %cst_54 : f32 to vector<128x32xf32>
    %134 = arith.mulf %133, %44 : vector<128x32xf32>
    %cst_55 = arith.constant 3.000000e-01 : f32
    %135 = vector.broadcast %cst_55 : f32 to vector<128x32xf32>
    %136 = arith.mulf %135, %132 : vector<128x32xf32>
    %137 = arith.addf %134, %136 : vector<128x32xf32>
    %138 = arith.truncf %137 : vector<128x32xf32> to vector<128x32xbf16>
    %c0_56 = arith.constant 0 : index
    %c0_57 = arith.constant 0 : index
    %139 = vector.load %arg9[%c0_56, %c0_57] : memref<32x64xbf16, #tpu.memory_space<vmem>>, vector<32x64xbf16>
    %cst_58 = arith.constant dense<0.000000e+00> : vector<128x64xf32>
    %140 = tpu.matmul %138, %139, %cst_58 {dimension_numbers = #tpu.dot_dimension_numbers<[1], [0], [0], [1], [0, 0, 1, 1], [], []>} : vector<128x32xbf16>, vector<32x64xbf16>, vector<128x64xf32> -> vector<128x64xf32>
    %141 = vector.broadcast %11 : vector<1x64xf32> to vector<128x64xf32>
    %142 = arith.addf %140, %141 : vector<128x64xf32>
    %cst_59 = arith.constant 0.000000e+00 : f32
    %143 = vector.broadcast %cst_59 : f32 to vector<128x64xf32>
    %144 = arith.maximumf %142, %143 : vector<128x64xf32>
    %145 = arith.truncf %144 : vector<128x64xf32> to vector<128x64xbf16>
    %c0_60 = arith.constant 0 : index
    %c0_61 = arith.constant 0 : index
    %146 = vector.load %arg10[%c0_60, %c0_61] : memref<64x32xbf16, #tpu.memory_space<vmem>>, vector<64x32xbf16>
    %cst_62 = arith.constant dense<0.000000e+00> : vector<128x32xf32>
    %147 = tpu.matmul %145, %146, %cst_62 {dimension_numbers = #tpu.dot_dimension_numbers<[1], [0], [0], [1], [0, 0, 1, 1], [], []>} : vector<128x64xbf16>, vector<64x32xbf16>, vector<128x32xf32> -> vector<128x32xf32>
    %148 = vector.broadcast %12 : vector<1x32xf32> to vector<128x32xf32>
    %149 = arith.addf %147, %148 : vector<128x32xf32>
    %150 = arith.addf %149, %137 : vector<128x32xf32>
    %cst_63 = arith.constant dense<0.000000e+00> : vector<128xf32>
    %151 = vector.multi_reduction <add>, %150, %cst_63 [1] : vector<128x32xf32> to vector<128xf32>
    %152 = vector.shape_cast %151 : vector<128xf32> to vector<128x1xf32>
    %cst_64 = arith.constant 3.200000e+01 : f32
    %153 = vector.broadcast %cst_64 : f32 to vector<128x1xf32>
    %154 = arith.divf %152, %153 : vector<128x1xf32>
    %155 = vector.broadcast %154 : vector<128x1xf32> to vector<128x32xf32>
    %156 = arith.subf %150, %155 : vector<128x32xf32>
    %157 = arith.mulf %156, %156 : vector<128x32xf32>
    %cst_65 = arith.constant dense<0.000000e+00> : vector<128xf32>
    %158 = vector.multi_reduction <add>, %157, %cst_65 [1] : vector<128x32xf32> to vector<128xf32>
    %159 = vector.shape_cast %158 : vector<128xf32> to vector<128x1xf32>
    %cst_66 = arith.constant 3.200000e+01 : f32
    %160 = vector.broadcast %cst_66 : f32 to vector<128x1xf32>
    %161 = arith.divf %159, %160 : vector<128x1xf32>
    %162 = vector.broadcast %154 : vector<128x1xf32> to vector<128x32xf32>
    %163 = arith.subf %150, %162 : vector<128x32xf32>
    %cst_67 = arith.constant 9.99999996E-13 : f32
    %164 = vector.broadcast %cst_67 : f32 to vector<128x1xf32>
    %165 = arith.addf %161, %164 : vector<128x1xf32>
    %166 = math.rsqrt %165 : vector<128x1xf32>
    %167 = vector.broadcast %166 : vector<128x1xf32> to vector<128x32xf32>
    %168 = arith.mulf %163, %167 : vector<128x32xf32>
    %169 = vector.broadcast %13 : vector<1x32xf32> to vector<128x32xf32>
    %170 = arith.mulf %168, %169 : vector<128x32xf32>
    %171 = vector.broadcast %14 : vector<1x32xf32> to vector<128x32xf32>
    %172 = arith.addf %170, %171 : vector<128x32xf32>
    %c0_68 = arith.constant 0 : index
    %c0_69 = arith.constant 0 : index
    %173 = vector.load %arg11[%c0_68, %c0_69] : memref<128x32xf32, #tpu.memory_space<vmem>>, vector<128x32xf32>
    tpu.vector_store %arg11[%c0_68, %c0_69], %172 {strides = array<i32>} : memref<128x32xf32, #tpu.memory_space<vmem>>, vector<128x32xf32>,
    return
  }
  func.func @transform_0(%arg0: i32) -> (i32, i32) {
    %c0_i32 = arith.constant 0 : i32
    %c0_i32_0 = arith.constant 0 : i32
    return %arg0, %c0_i32 : i32, i32
  }
  func.func @transform_1(%arg0: i32) -> (i32, i32) {
    %c0_i32 = arith.constant 0 : i32
    %c0_i32_0 = arith.constant 0 : i32
    %c0_i32_1 = arith.constant 0 : i32
    return %c0_i32, %c0_i32_0 : i32, i32
  }
  func.func @transform_2(%arg0: i32) -> (i32, i32) {
    %c0_i32 = arith.constant 0 : i32
    %c0_i32_0 = arith.constant 0 : i32
    %c0_i32_1 = arith.constant 0 : i32
    return %c0_i32, %c0_i32_0 : i32, i32
  }
  func.func @transform_3(%arg0: i32) -> (i32, i32) {
    %c0_i32 = arith.constant 0 : i32
    %c0_i32_0 = arith.constant 0 : i32
    %c0_i32_1 = arith.constant 0 : i32
    return %c0_i32, %c0_i32_0 : i32, i32
  }
  func.func @transform_4(%arg0: i32) -> (i32, i32) {
    %c0_i32 = arith.constant 0 : i32
    %c0_i32_0 = arith.constant 0 : i32
    %c0_i32_1 = arith.constant 0 : i32
    return %c0_i32, %c0_i32_0 : i32, i32
  }
  func.func @transform_5(%arg0: i32) -> (i32, i32) {
    %c0_i32 = arith.constant 0 : i32
    %c0_i32_0 = arith.constant 0 : i32
    %c0_i32_1 = arith.constant 0 : i32
    return %c0_i32, %c0_i32_0 : i32, i32
  }
  func.func @transform_6(%arg0: i32) -> (i32, i32) {
    %c0_i32 = arith.constant 0 : i32
    %c0_i32_0 = arith.constant 0 : i32
    %c0_i32_1 = arith.constant 0 : i32
    return %c0_i32, %c0_i32_0 : i32, i32
  }
  func.func @transform_7(%arg0: i32) -> (i32, i32) {
    %c0_i32 = arith.constant 0 : i32
    %c0_i32_0 = arith.constant 0 : i32
    %c0_i32_1 = arith.constant 0 : i32
    return %c0_i32, %c0_i32_0 : i32, i32
  }
  func.func @transform_8(%arg0: i32) -> (i32, i32) {
    %c0_i32 = arith.constant 0 : i32
    %c0_i32_0 = arith.constant 0 : i32
    %c0_i32_1 = arith.constant 0 : i32
    return %c0_i32, %c0_i32_0 : i32, i32
  }
  func.func @transform_9(%arg0: i32) -> (i32, i32) {
    %c0_i32 = arith.constant 0 : i32
    %c0_i32_0 = arith.constant 0 : i32
    %c0_i32_1 = arith.constant 0 : i32
    return %c0_i32, %c0_i32_0 : i32, i32
  }
  func.func @transform_10(%arg0: i32) -> (i32, i32) {
    %c0_i32 = arith.constant 0 : i32
    %c0_i32_0 = arith.constant 0 : i32
    return %arg0, %c0_i32 : i32, i32
  }
}

</mosaic_0001>

<bundles_post_ra>
// kernel: tpu_custom_call.1
= control target key start
LH: loop header
LB: loop body
LE: loop exit
PB: predicated region body
PF: predicated region fallthrough
CT: control target
= control target key end

     0   :  { %15 = vsyncpa [#allocation3], 0  ;;  %s6545_s0 = inlined_call_operand.vmem [shape: bf16[256,32], index: 0, kind: input, shape index: {}]   ;;  %s6546_s1 = inlined_call_operand.hbm [shape: bf16[128,128], index: 1, kind: input, shape index: {}]   ;;  %s6547_s2 = inlined_call_operand.vmem [shape: f32[128,128], index: 2, kind: input, shape index: {}]   ;;  %s6548_s3 = inlined_call_operand.vmem [shape: f32[13,64], index: 3, kind: input, shape index: {}]   ;;  %s6549_s4 = inlined_call_operand.vmem [shape: bf16[32,32], index: 4, kind: input, shape index: {}]   ;;  %s6550_s5 = inlined_call_operand.vmem [shape: bf16[32,32], index: 5, kind: input, shape index: {}]   ;;  %s6551_s6 = inlined_call_operand.hbm [shape: bf16[32,32], index: 6, kind: input, shape index: {}]   ;;  %s6552_s7 = inlined_call_operand.hbm [shape: bf16[32,32], index: 7, kind: input, shape index: {}]   ;;  %s6553_s8 = inlined_call_operand.hbm [shape: bf16[32,64], index: 8, kind: input, shape index: {}]   ;;  %s6554_s9 = inlined_call_operand.vmem [shape: bf16[64,32], index: 9, kind: input, shape index: {}]   ;;  %s6555_s10 = inlined_call_operand.vmem [shape: f32[256,32], index: 10, kind: output, shape index: {}]  }
   0x1   :  { %16 = vsyncpa [#allocation5], 0 }
   0x2   :  { %17 = vsyncpa [#allocation8], 0  ;;  %s4364_s13 = smov 0  }
   0x3 LB: > { %s3617_s14 = sadd.s32 4294967295, %s4299_s13   ;;  %p3619_p0 = scmp.ge.s32.totalorder %s4299_s13, 1  ;;  %s4299_s13 = sphi %s4364_s13, %s23_s13  }
   0x4   : > { %p269_p1 = scmp.lt.s32.totalorder %s4299_s13, 3  ;;  %p4374_p2 = scmp.eq.s32.totalorder %s3617_s14, 0 }
   0x5   : > { %s306_s18 = sshll.u32 %s6551_s6, 4  ;;  %s280_s22 = sshll.u32 %s6546_s1, 4  ;;  %s307_s18 = int_to_ptr.hbm [resolvable:$true] %s306_s18  ;;  %s281_s22 = int_to_ptr.hbm [resolvable:$true] %s280_s22 }
   0x6   : > { %p4381_p3 = pnand %p3619_p0, %p269_p1  ;;  %s4301_s23 = smov [#allocation4]  }
   0x7   : > { %s308_s24 = sshll.u32 %s4301_s23, 4  ;;  %s4302_s26 = smov [#allocation2]   ;;  %s309_s24 = int_to_ptr.vmem [resolvable:$true] %s308_s24 }
   0x8   : > { %p3882_p4 = pneg %p4381_p3  ;;  %s282_s27 = sshll.u32 %s4302_s26, 4  ;;  %s283_s27 = int_to_ptr.vmem [resolvable:$true] %s282_s27 }
   0x9   : > { %s320_s30 = sshll.u32 %s6552_s7, 4  ;;  %s4303_s11 = smov 64   ;;  %s321_s30 = int_to_ptr.hbm [resolvable:$true] %s320_s30 }
   0xa   : > { %p4392_p5 = pnand %p4374_p2, %p3882_p4  ;;  %s4304_s12 = smov 4  }
   0xb   : > { %s4305_s16 = smov [#allocation6]   ;;  %s334_s23 = sshll.u32 %s6553_s8, 4  ;;  %s335_s23 = int_to_ptr.hbm [resolvable:$true] %s334_s23 }
   0xc   : > { %3888 = dma.hbm_to_vmem [thread:$0]  (!%p4392_p5), %s307_s18, 256, %s309_s24, [#allocation5], %s4303_s11, %s4303_s11, %s4304_s12  }
   0xd   : > { %3885 = dma.hbm_to_vmem [thread:$0]  (!%p4392_p5), %s281_s22, 1024, %s283_s27, [#allocation3], %s4303_s11, %s4303_s11, %s4304_s12  }
   0xe   : > { %s322_s17 = sshll.u32 %s4305_s16, 4  ;;  %s4306_s26 = smov [#allocation7]   ;;  %s323_s17 = int_to_ptr.vmem [resolvable:$true] %s322_s17 }
   0xf   : > { %3891 = dma.hbm_to_vmem [thread:$0]  (!%p4392_p5), %s321_s30, 256, %s323_s17, [#allocation5], %s4303_s11, %s4303_s11, %s4304_s12  }
  0x10   : > { %s336_s28 = sshll.u32 %s4306_s26, 4  ;;  %364 = sbr.rel (%p4381_p3) target bundleno = 2356 (0x934), region = 60  ;;  %s337_s28 = int_to_ptr.vmem [resolvable:$true] %s336_s28 }
  0x11   : > { %3894 = dma.hbm_to_vmem [thread:$0]  (!%p4392_p5), %s335_s23, 256, %s337_s28, [#allocation8], %s4303_s11, %s4303_s11, %s4304_s12  }
  0x15   : > { %4286 = dma.done.wait (%p4374_p2), [#allocation3], 1024  }
  0x16   : > { %4288 = vsyncadd (%p4374_p2), [#allocation3], 4294966272 }
  0x17   : > { %4290 = dma.done.wait (%p4374_p2), [#allocation5], 512  }
  0x18   : > { %4292 = vsyncadd (%p4374_p2), [#allocation5], 4294966784 }
  0x19   : > { %4294 = dma.done.wait (%p4374_p2), [#allocation8], 256  }
  0x1a   : > { %4296 = vsyncadd (%p4374_p2), [#allocation8], 4294967040  ;;  %s3630_s18 = sshll.u32 %s3617_s14, 4  ;;  %v3847_v0 = vld [vmem:[%s6550_s5 + $0x8] sm:$0xff]  ;;  %v3846_v1 = vld [vmem:[%s6550_s5] sm:$0xff]  ;;  %vm703_vm0 = vcmask 261120  }
  0x1b   : > { %p419_p6 = scmp.lt.s32.totalorder %s3630_s18, 31  ;;  %v3849_v2 = vld [vmem:[#allocation4 + $0x8] sm:$0xff]  ;;  %1210 = vmatpush.bf16.msra.mxu2 %v3847_v0  ;;  %v3848_v3 = vld [vmem:[#allocation4] sm:$0xff]  ;;  %s4307_s26 = smov 112   ;;  %vm1463_vm1 = vcmask 130048  }
  0x1c   : > { %1276 = vmatpush.bf16.msra.mxu3 %v3849_v2  ;;  %v3845_v5 = vld [vmem:[%s6549_s4 + $0x8] sm:$0xff]  ;;  %v3844_v6 = vld [vmem:[%s6549_s4] sm:$0xff] }
  0x1d   : > { %s6581_s18 = smov (!%p419_p6, %s3630_s18), 31  ;;  %1144 = vmatpush.bf16.msra.mxu1 %v3845_v5  ;;  %v4511_v34 = vld [vmem:[%s6548_s3 + $0x4] ss:$0 sm:$0xff]  ;;  %v4526_v48 = vld [vmem:[%s6548_s3 + $0x3] ss:$0 sm:$0xff] }
  0x1e   : > { %s3631_s19 = sshll.u32 %s6581_s18, 2  ;;  %s3633_s23 = sshll.u32 %s6581_s18, 3 }
  0x1f   : > { %s4435_s29 = scalar_lea.vmem %s6545_s0, %s3631_s19  ;;  %1211 = vmatpush.bf16.msra.mxu2 %v3846_v1  ;;  %s6408_s25 = scalar_lea.vmem %s6555_s10, %s3633_s23 }
  0x20   : > { %v3828_v4 = vld [vmem:[%s4435_s29] sm:$0xff]  ;;  %1277 = vmatpush.bf16.msra.mxu3 %v3848_v3  ;;  %v3829_v7 = vld [vmem:[%s4435_s29 + $0x8] sm:$0xff]  ;;  %v3830_v8 = vld [vmem:[%s4435_s29 + $0x10] sm:$0xff] }
  0x21   : > { %1145 = vmatpush.bf16.msra.mxu1 %v3844_v6  ;;  %v3831_v9 = vld [vmem:[%s4435_s29 + $0x18] sm:$0xff]  ;;  %v3832_v10 = vld [vmem:[%s4435_s29 + $0x20] sm:$0xff]  ;;  %v3834_v12 = vld [vmem:[%s4435_s29 + $0x30] sm:$0xff] }
  0x22   : > { %3722 = vmatmul.msk.bf16.vlgmr.msra.gmra.mxu2 %vm703_vm0, %v3828_v4  ;;  %v3835_v11 = vld [vmem:[%s4435_s29 + $0x38] sm:$0xff]  ;;  %v3833_v13 = vld [vmem:[%s4435_s29 + $0x28] sm:$0xff] }
  0x23   : > { %3738 = vmatmul.msk.bf16.vlgmr.msra.gmra.mxu3 %vm703_vm0, %v3828_v4  ;;  %588 = vmatpush.bf16.msra.mxu0 %v3835_v11 }
  0x24   : > { %3706 = vmatmul.msk.bf16.vlgmr.msra.gmra.mxu1 %vm703_vm0, %v3828_v4 }
  0x27   : > { %589 = vmatpush.bf16.msra.mxu0 %v3834_v12 }
  0x2b   : > { %590 = vmatpush.bf16.msra.mxu0 %v3833_v13 }
  0x2f   : > { %591 = vmatpush.bf16.msra.mxu0 %v3832_v10 }
  0x32   : > { %3723 = vmatmul.msk.bf16.gmra.mxu2 %vm703_vm0, %v3829_v7 }
  0x33   : > { %3739 = vmatmul.msk.bf16.gmra.mxu3 %vm703_vm0, %v3829_v7  ;;  %592 = vmatpush.bf16.msra.mxu0 %v3831_v9 }
  0x34   : > { %3707 = vmatmul.msk.bf16.gmra.mxu1 %vm703_vm0, %v3829_v7 }
  0x37   : > { %593 = vmatpush.bf16.msra.mxu0 %v3830_v8 }
  0x3b   : > { %594 = vmatpush.bf16.msra.mxu0 %v3829_v7 }
  0x3f   : > { %595 = vmatpush.bf16.msra.mxu0 %v3828_v4 }
  0x42   : > { %3724 = vmatmul.msk.bf16.gmra.mxu2 %vm703_vm0, %v3830_v8 }
  0x43   : > { %3740 = vmatmul.msk.bf16.gmra.mxu3 %vm703_vm0, %v3830_v8 }
  0x44   : > { %3708 = vmatmul.msk.bf16.gmra.mxu1 %vm703_vm0, %v3830_v8 }
  0x52   : > { %3725 = vmatmul.msk.bf16.gmra.mxu2 %vm703_vm0, %v3831_v9 }
  0x53   : > { %3741 = vmatmul.msk.bf16.gmra.mxu3 %vm703_vm0, %v3831_v9 }
  0x54   : > { %3709 = vmatmul.msk.bf16.gmra.mxu1 %vm703_vm0, %v3831_v9 }
  0x62   : > { %3726 = vmatmul.msk.bf16.gmra.mxu2 %vm703_vm0, %v3832_v10 }
  0x63   : > { %3742 = vmatmul.msk.bf16.gmra.mxu3 %vm703_vm0, %v3832_v10 }
  0x64   : > { %3710 = vmatmul.msk.bf16.gmra.mxu1 %vm703_vm0, %v3832_v10 }
  0x72   : > { %3727 = vmatmul.msk.bf16.gmra.mxu2 %vm703_vm0, %v3833_v13 }
  0x73   : > { %3743 = vmatmul.msk.bf16.gmra.mxu3 %vm703_vm0, %v3833_v13 }
  0x74   : > { %3711 = vmatmul.msk.bf16.gmra.mxu1 %vm703_vm0, %v3833_v13 }
  0x82   : > { %3728 = vmatmul.msk.bf16.gmra.mxu2 %vm703_vm0, %v3834_v12 }
  0x83   : > { %3744 = vmatmul.msk.bf16.gmra.mxu3 %vm703_vm0, %v3834_v12 }
  0x84   : > { %3712 = vmatmul.msk.bf16.gmra.mxu1 %vm703_vm0, %v3834_v12 }
  0x92   : > { %3729 = vmatmul.msk.bf16.gmra.mxu2 %vm703_vm0, %v3835_v11 }
  0x93   : > { %3745 = vmatmul.msk.bf16.gmra.mxu3 %vm703_vm0, %v3835_v11 }
  0x94   : > { %3713 = vmatmul.msk.bf16.gmra.mxu1 %vm703_vm0, %v3835_v11 }
  0xa1   : > { %v1147_v17 = vpop.f32.mrf.mxu1 }
  0xa2   : > { %v1148_v51 = vadd.f32 %v4526_v48, %v1147_v17 }
  0xa4   : > { %v1319_v56 = vpack.c.bf16 %v1148_v51, %v1148_v51 }
  0xa5   : > { %v4478_v14 = vpop.f32.mrf.mxu2 }
  0xa6   : > { %v4480_v15 = vpop.f32.mrf.mxu3  ;;  %v1399_v61 = vunpack.c.l.b16 %v1319_v56 }
  0xa9   : > { %v1149_v20 = vpop.f32.mrf.mxu1 }
  0xaa   : > { %v1150_v52 = vadd.f32 %v4526_v48, %v1149_v20 }
  0xac   : > { %v1320_v57 = vpack.c.bf16 %v1150_v52, %v1150_v52 }
  0xad   : > { %v4482_v16 = vpop.f32.mrf.mxu2 }
  0xae   : > { %v4484_v18 = vpop.f32.mrf.mxu3  ;;  %v1400_v62 = vunpack.c.l.b16 %v1320_v57 }
  0xb0   : > { %v4542_v0 = vpack.c.b16 %v1400_v62, %v1399_v61 }
  0xb1   : > { %v4492_v23 = vpop.f32.mrf.mxu1 }
  0xb5   : > { %v4486_v19 = vpop.f32.mrf.mxu2 }
  0xb6   : > { %v4488_v21 = vpop.f32.mrf.mxu3  ;;  %v1219_v62 = vadd.f32 %v4511_v34, %v4486_v19 }
  0xb9   : > { %v4496_v26 = vpop.f32.mrf.mxu1 }
  0xbd   : > { %v4490_v22 = vpop.f32.mrf.mxu2 }
  0xbe   : > { %v4494_v24 = vpop.f32.mrf.mxu3 }
  0xc1   : > { %v4500_v29 = vpop.f32.mrf.mxu1 }
  0xc5   : > { %v1223_v25 = vpop.f32.mrf.mxu2 }
  0xc6   : > { %v4498_v27 = vpop.f32.mrf.mxu3  ;;  %v1224_v43 = vadd.f32 %v4511_v34, %v1223_v25 }
  0xc8   : > { %v1339_v50 = vpack.c.bf16 %v1224_v43, %v1224_v43 }
  0xc9   : > { %v4506_v33 = vpop.f32.mrf.mxu1 }
  0xca   : > { %v1443_v55 = vunpack.c.l.b16 %v1339_v50 }
  0xcd   : > { %v1225_v28 = vpop.f32.mrf.mxu2 }
  0xce   : > { %v4502_v30 = vpop.f32.mrf.mxu3  ;;  %v1226_v40 = vadd.f32 %v4511_v34, %v1225_v28 }
  0xd0   : > { %v1340_v46 = vpack.c.bf16 %v1226_v40, %v1226_v40  ;;  %v1214_v40 = vadd.f32 %v4511_v34, %v4478_v14  ;;  %v4575_v14 = vld [vmem:[%s6548_s3 + $0x5] ss:$0 sm:$0xff] }
  0xd1   : > { %v4518_v42 = vpop.f32.mrf.mxu1 }
  0xd2   : > { %v1444_v54 = vunpack.c.l.b16 %v1340_v46  ;;  %v1335_v46 = vpack.c.bf16 %v1214_v40, %v1214_v40 }
  0xd4   : > { %v4536_v59 = vpack.c.b16 %v1444_v54, %v1443_v55  ;;  %v1439_v51 = vunpack.c.l.b16 %v1335_v46 }
  0xd5   : > { %v1228_v31 = vpop.f32.mrf.mxu2 }
  0xd6   : > { %v4504_v32 = vpop.f32.mrf.mxu3  ;;  %v1229_v35 = vadd.f32 %v4511_v34, %v1228_v31 }
  0xd8   : > { %v1341_v37 = vpack.c.bf16 %v1229_v35, %v1229_v35 }
  0xd9   : > { %v4534_v58 = vpop.f32.mrf.mxu1 }
  0xda   : > { %v1445_v44 = vunpack.c.l.b16 %v1341_v37 }
  0xdd   : > { %v1230_v36 = vpop.f32.mrf.mxu2 }
  0xde   : > { %v1231_v38 = vadd.f32 %v4511_v34, %v1230_v36  ;;  %v4515_v39 = vpop.f32.mrf.mxu3  ;;  %v1216_v36 = vadd.f32 %v4511_v34, %v4482_v16 }
  0xe0   : > { %v1342_v41 = vpack.c.bf16 %v1231_v38, %v1231_v38  ;;  %v1336_v43 = vpack.c.bf16 %v1216_v36, %v1216_v36 }
  0xe1   : > { %v4544_v2 = vpop.f32.mrf.mxu1 }
  0xe2   : > { %v1446_v45 = vunpack.c.l.b16 %v1342_v41  ;;  %v1440_v50 = vunpack.c.l.b16 %v1336_v43 }
  0xe4   : > { %v4521_v47 = vpack.c.b16 %v1446_v45, %v1445_v44  ;;  %v4570_v16 = vpack.c.b16 %v1440_v50, %v1439_v51 }
  0xe5   : > { %v1233_v49 = vpop.f32.mrf.mxu2 }
  0xe6   : > { %1874 = vrot.lane.b32.xlu2 %v4521_v47, %s4307_s26  ;;  %v4532_v53 = vpop.f32.mrf.mxu3  ;;  %v1234_v12 = vadd.f32 %v4511_v34, %v1233_v49 }
  0xe8   : > { %v1343_v31 = vpack.c.bf16 %v1234_v12, %v1234_v12 }
  0xe9   : > { %v4550_v9 = vpop.f32.mrf.mxu1 }
  0xea   : > { %v1447_v41 = vunpack.c.l.b16 %v1343_v31 }
  0xed   : > { %v1235_v60 = vpop.f32.mrf.mxu2 }
  0xee   : > { %1872 = vrot.lane.b32.xlu2 %v4536_v59, %s4307_s26  ;;  %v4540_v63 = vpop.f32.mrf.mxu3  ;;  %v1236_v10 = vadd.f32 %v4511_v34, %v1235_v60 }
  0xf0   : > { %v1344_v20 = vpack.c.bf16 %v1236_v10, %v1236_v10 }
  0xf1   : > { %v4560_v38 = vpop.f32.mrf.mxu1 }
  0xf2   : > { %v1448_v37 = vunpack.c.l.b16 %v1344_v20 }
  0xf4   : > { %v4564_v44 = vpack.c.b16 %v1448_v37, %v1447_v41  ;;  %v1300_v41 = vadd.f32 %v4575_v14, %v4532_v53 }
  0xf5   : > { %v1238_v1 = vpop.f32.mrf.mxu2 }
  0xf6   : > { %v1304_v3 = vpop.f32.mrf.mxu3  ;;  %1852 = vrot.lane.b32.xlu2 %v4542_v0, %s4307_s26  ;;  %v1239_v4 = vadd.f32 %v4511_v34, %v1238_v1  ;;  %v1221_v1 = vadd.f32 %v4511_v34, %v4490_v22  ;;  %v1337_v22 = vpack.c.bf16 %v1219_v62, %v1219_v62 }
  0xf7   : > { %v1305_v20 = vadd.f32 %v4575_v14, %v1304_v3  ;;  %v1302_v3 = vadd.f32 %v4575_v14, %v4540_v63  ;;  %v1165_v63 = vadd.f32 %v4526_v48, %v4534_v58 }
  0xf8   : > { %v1345_v6 = vpack.c.bf16 %v1239_v4, %v1239_v4 }
  0xf9   : > { %v4568_v52 = vpop.f32.mrf.mxu1 }
  0xfa   : > { %v1449_v13 = vunpack.c.l.b16 %v1345_v6 }
  0xfd   : > { %v1240_v5 = vpop.f32.mrf.mxu2 }
  0xfe   : > { %v1241_v7 = vadd.f32 %v4511_v34, %v1240_v5  ;;  %v1306_v8 = vpop.f32.mrf.mxu3 }
  0xff   : > { %v1307_v19 = vadd.f32 %v4575_v14, %v1306_v8  ;;  %v1361_v8 = vpack.c.bf16 %v1305_v20, %v1305_v20 }
 0x100   : > { %v1346_v11 = vpack.c.bf16 %v1241_v7, %v1241_v7 }
 0x101   : > { %v4588_v6 = vpop.f32.mrf.mxu1 }
 0x102   : > { %v1450_v17 = vunpack.c.l.b16 %v1346_v11 }
 0x104   : > { %v4554_v25 = vpack.c.b16 %v1450_v17, %v1449_v13 }
 0x105   : > { %v1243_v28 = vpop.f32.mrf.mxu2 }
 0x106   : > { %1878 = vrot.lane.b32.xlu1 %v4554_v25, %s4307_s26  ;;  %v1309_v35 = vpop.f32.mrf.mxu3  ;;  %v1244_v36 = vadd.f32 %v4511_v34, %v1243_v28  ;;  %v1160_v28 = vadd.f32 %v4526_v48, %v4506_v33  ;;  %v1297_v33 = vadd.f32 %v4575_v14, %v4515_v39  ;;  %v1292_v39 = vadd.f32 %v4575_v14, %v4502_v30 }
 0x107   : > { %v1310_v60 = vadd.f32 %v4575_v14, %v1309_v35  ;;  %v1338_v35 = vpack.c.bf16 %v1221_v1, %v1221_v1  ;;  %v1359_v1 = vpack.c.bf16 %v1300_v41, %v1300_v41  ;;  %v1153_v30 = vadd.f32 %v4526_v48, %v4492_v23 }
 0x109   : > { %v1363_v12 = vpack.c.bf16 %v1310_v60, %v1310_v60  ;;  %v1295_v60 = vadd.f32 %v4575_v14, %v4504_v32 }
 0x10b   : > { %v1773_v50 = vunpack.c.l.b16 %v1363_v12  ;;  %v1441_v12 = vunpack.c.l.b16 %v1337_v22 }
 0x10d   : > { %v1245_v45 = vpop.f32.mrf.mxu2 }
 0x10e   : > { %1876 = vrot.lane.b32.xlu1 %v4564_v44, %s4307_s26  ;;  %v1311_v49 = vpop.f32.mrf.mxu3  ;;  %v1246_v4 = vadd.f32 %v4511_v34, %v1245_v45 }
 0x10f   : > { %v1312_v61 = vadd.f32 %v4575_v14, %v1311_v49 }
 0x110   : > { %v1348_v40 = vpack.c.bf16 %v1246_v4, %v1246_v4  ;;  %v1360_v4 = vpack.c.bf16 %v1302_v3, %v1302_v3  ;;  %v1356_v3 = vpack.c.bf16 %v1292_v39, %v1292_v39 }
 0x111   : > { %v1364_v13 = vpack.c.bf16 %v1312_v61, %v1312_v61 }
 0x112   : > { %v1452_v62 = vunpack.c.l.b16 %v1348_v40  ;;  %v1769_v40 = vunpack.c.l.b16 %v1359_v1  ;;  %v1770_v41 = vunpack.c.l.b16 %v1360_v4 }
 0x113   : > { %v1774_v51 = vunpack.c.l.b16 %v1364_v13  ;;  %v1442_v13 = vunpack.c.l.b16 %v1338_v35  ;;  %v1173_v35 = vadd.f32 %v4526_v48, %v4560_v38 }
 0x115   : > { %v1248_v54 = vpop.f32.mrf.mxu2  ;;  %v4618_v32 = vpack.c.b16 %v1774_v51, %v1773_v50  ;;  %v1287_v50 = vadd.f32 %v4575_v14, %v4494_v24  ;;  %v1329_v23 = vpack.c.bf16 %v1173_v35, %v1173_v35  ;;  %v1178_v24 = vadd.f32 %v4526_v48, %v4588_v6 }
 0x116   : > { %1868 = vrot.lane.b32.xlu1 %v4570_v16, %s4307_s26  ;;  %v1314_v55 = vpop.f32.mrf.mxu3  ;;  %v1249_v57 = vadd.f32 %v4511_v34, %v1248_v54  ;;  %v1362_v54 = vpack.c.bf16 %v1307_v19, %v1307_v19  ;;  %v1357_v19 = vpack.c.bf16 %v1295_v60, %v1295_v60  ;;  %v1282_v60 = vadd.f32 %v4575_v14, %v4484_v18 }
 0x117   : > { %v1315_v56 = vadd.f32 %v4575_v14, %v1314_v55  ;;  %v1766_v6 = vunpack.c.l.b16 %v1356_v3 }
 0x118   : > { %v1349_v10 = vpack.c.bf16 %v1249_v57, %v1249_v57  ;;  %v1163_v57 = vadd.f32 %v4526_v48, %v4518_v42  ;;  %v1771_v42 = vunpack.c.l.b16 %v1361_v8 }
 0x119   : > { %v1365_v7 = vpack.c.bf16 %v1315_v56, %v1315_v56  ;;  %v1347_v56 = vpack.c.bf16 %v1244_v36, %v1244_v36 }
 0x11a   : > { %v1453_v46 = vunpack.c.l.b16 %v1349_v10  ;;  %v1325_v20 = vpack.c.bf16 %v1163_v57, %v1163_v57 }
 0x11b   : > { %v1775_v43 = vunpack.c.l.b16 %v1365_v7  ;;  %v4615_v7 = vpop.f32.mrf.mxu1  ;;  %v1451_v58 = vunpack.c.l.b16 %v1347_v56 }
 0x11c   : > { %v1405_v8 = vunpack.c.l.b16 %v1325_v20 }
 0x11d   : > { %v1250_v5 = vpop.f32.mrf.mxu2  ;;  %v1461_v36 = vpack.c.b16 %v1452_v62, %v1451_v58  ;;  %v4652_v62 = vpack.c.b16 %v1442_v13, %v1441_v12  ;;  %v1170_v12 = vadd.f32 %v4526_v48, %v4550_v9  ;;  %v1180_v13 = vadd.f32 %v4526_v48, %v4615_v7 }
 0x11e   : > { %v1251_v11 = vadd.f32 %v4511_v34, %v1250_v5  ;;  %v1316_v17 = vpop.f32.mrf.mxu3  ;;  %v1158_v34 = vadd.f32 %v4526_v48, %v4500_v29  ;;  %v1772_v5 = vunpack.c.l.b16 %v1362_v54 }
 0x11f   : > { %v1317_v31 = vadd.f32 %v4575_v14, %v1316_v17  ;;  %v1290_v17 = vadd.f32 %v4575_v14, %v4498_v27  ;;  %v1175_v27 = vadd.f32 %v4526_v48, %v4568_v52  ;;  %v1507_v38 = vsel %vm1463_vm1, %v1461_v36, 0 }
 0x120   : > { %v1350_v37 = vpack.c.bf16 %v1251_v11, %v1251_v11  ;;  %v1323_v10 = vpack.c.bf16 %v1158_v34, %v1158_v34  ;;  %v1324_v11 = vpack.c.bf16 %v1160_v28, %v1160_v28  ;;  %v1767_v52 = vunpack.c.l.b16 %v1357_v19 }
 0x121   : > { %v1366_v45 = vpack.c.bf16 %v1317_v31, %v1317_v31  ;;  %v1326_v31 = vpack.c.bf16 %v1165_v63, %v1165_v63  ;;  %v1355_v51 = vpack.c.bf16 %v1290_v17, %v1290_v17  ;;  %v1280_v34 = vadd.f32 %v4575_v14, %v4480_v15 }
 0x122   : > { %v1454_v49 = vunpack.c.l.b16 %v1350_v37  ;;  %v1358_v37 = vpack.c.bf16 %v1297_v33, %v1297_v33  ;;  %v1404_v22 = vunpack.c.l.b16 %v1324_v11  ;;  %v1321_v28 = vpack.c.bf16 %v1153_v30, %v1153_v30 }
 0x123   : > { %v1776_v55 = vunpack.c.l.b16 %v1366_v45  ;;  %v1403_v45 = vunpack.c.l.b16 %v1323_v10  ;;  %v1406_v54 = vunpack.c.l.b16 %v1326_v31  ;;  %v1182_v57 = vpop.f32.mrf.mxu1  ;;  %v1765_v33 = vunpack.c.l.b16 %v1355_v51 }
 0x124   : > { %v1462_v53 = vpack.c.b16 %v1454_v49, %v1453_v46  ;;  %v1285_v46 = vadd.f32 %v4575_v14, %v4488_v21  ;;  %v1155_v49 = vadd.f32 %v4526_v48, %v4496_v26  ;;  %v4642_v21 = vpack.c.b16 %v1770_v41, %v1769_v40 }
 0x125   : > { %v4609_v61 = vpack.c.b16 %v1776_v55, %v1775_v43  ;;  %v4625_v43 = vpack.c.b16 %v1772_v5, %v1771_v42  ;;  %v1768_v55 = vunpack.c.l.b16 %v1358_v37  ;;  %v1330_v26 = vpack.c.bf16 %v1175_v27, %v1175_v27 }
 0x126   : > { %1882 = vrot.lane.b32.xlu0 %v1462_v53, %s4307_s26  ;;  %v1510_v29 = vsel %vm1463_vm1, %v1462_v53, 0  ;;  %v4646_v56 = vpack.c.b16 %v1404_v22, %v1403_v45  ;;  %v1322_v53 = vpack.c.bf16 %v1155_v49, %v1155_v49  ;;  %v1353_v63 = vpack.c.bf16 %v1285_v46, %v1285_v46 }
 0x127   : > { %1512 = vmatpush.bf16.xpose.msrb.mxu1 %v1510_v29  ;;  %1793 = vmatpush.bf16.msrb.mxu2 %v4609_v61  ;;  %v1354_v29 = vpack.c.bf16 %v1287_v50, %v1287_v50  ;;  %v4656_v1 = vpack.c.b16 %v1768_v55, %v1767_v52  ;;  %v1409_v15 = vunpack.c.l.b16 %v1329_v23  ;;  %v1410_v4 = vunpack.c.l.b16 %v1330_v26 }
 0x128   : > { %1856 = vrot.lane.b32.xlu1 %v4646_v56, %s4307_s26  ;;  %v1331_v42 = vpack.c.bf16 %v1178_v24, %v1178_v24  ;;  %v4659_v5 = vpack.c.b16 %v1406_v54, %v1405_v8  ;;  %v1351_v58 = vpack.c.bf16 %v1280_v34, %v1280_v34  ;;  %v1401_v18 = vunpack.c.l.b16 %v1321_v28 }
 0x129   : > { %v1402_v14 = vunpack.c.l.b16 %v1322_v53  ;;  %v1168_v10 = vadd.f32 %v4526_v48, %v4544_v2  ;;  %v1504_v11 = vsel %vm1463_vm1, %v4554_v25, 0  ;;  %v1352_v17 = vpack.c.bf16 %v1282_v60, %v1282_v60 }
 0x12a   : > { %1858 = vrot.lane.b32.xlu2 %v4659_v5, %s4307_s26  ;;  %v1763_v39 = vunpack.c.l.b16 %v1353_v63  ;;  %v1764_v20 = vunpack.c.l.b16 %v1354_v29  ;;  %v1779_v2 = vpack.c.b16 %v1766_v6, %v1765_v33  ;;  %v1411_v19 = vunpack.c.l.b16 %v1331_v42 }
 0x12b   : > { %1794 = vmatpush.bf16.msrb.mxu2 %v4618_v32  ;;  %v1332_v31 = vpack.c.bf16 %v1180_v13, %v1180_v13  ;;  %v1327_v25 = vpack.c.bf16 %v1168_v10, %v1168_v10  ;;  %v1328_v37 = vpack.c.bf16 %v1170_v12, %v1170_v12  ;;  %v1416_v40 = vpack.c.b16 %v1402_v14, %v1401_v18  ;;  %v1184_v45 = vpop.f32.mrf.mxu1  ;;  %v4747_v12 = vld [vmem:[%s6547_s2] sm:$0xff] }
 0x12c   : > { %v1761_v7 = vunpack.c.l.b16 %v1351_v58  ;;  %v1762_v41 = vunpack.c.l.b16 %v1352_v17  ;;  %v4678_v22 = vpack.c.b16 %v1764_v20, %v1763_v39  ;;  %v1501_v27 = vsel %vm1463_vm1, %v4564_v44, 0 }
 0x12d   : > { %v1412_v9 = vunpack.c.l.b16 %v1332_v31  ;;  %v1407_v30 = vunpack.c.l.b16 %v1327_v25  ;;  %v1408_v46 = vunpack.c.l.b16 %v1328_v37  ;;  %v1183_v49 = vadd.f32 %v4526_v48, %v1182_v57  ;;  %v4760_v25 = vld [vmem:[%s6547_s2 + $0x10] sm:$0xff] }
 0x12e   : > { %1880 = vrot.lane.b32.xlu0 %v1461_v36, %s4307_s26  ;;  %v4674_v36 = vpack.c.b16 %v1410_v4, %v1409_v15  ;;  %v1185_v50 = vadd.f32 %v4526_v48, %v1184_v45  ;;  %v4690_v51 = vpack.c.b16 %v1762_v41, %v1761_v7  ;;  %v1498_v44 = vsel %vm1463_vm1, %v4521_v47, 0  ;;  %v4770_v7 = vld [vmem:[%s6547_s2 + $0x18] sm:$0xff] }
 0x12f   : > { %1513 = vmatpush.bf16.xpose.msrb.mxu1 %v1507_v38  ;;  %1795 = vmatpush.bf16.msrb.mxu2 %v4625_v43  ;;  %v4680_v35 = vpack.c.b16 %v1412_v9, %v1411_v19  ;;  %v1333_v3 = vpack.c.bf16 %v1183_v49, %v1183_v49  ;;  %v1419_v38 = vpack.c.b16 %v1408_v46, %v1407_v30  ;;  %v1492_v47 = vsel %vm1463_vm1, %v4652_v62, 0 }
 0x130   : > { %1862 = vrot.lane.b32.xlu1 %v4674_v36, %s4307_s26  ;;  %v1334_v8 = vpack.c.bf16 %v1185_v50, %v1185_v50  ;;  %v4789_v50 = vld [vmem:[%s6547_s2 + $0x28] sm:$0xff] }
 0x131   : > { %v1413_v48 = vunpack.c.l.b16 %v1333_v3 }
 0x132   : > { %1864 = vrot.lane.b32.xlu2 %v4680_v35, %s4307_s26  ;;  %v1414_v52 = vunpack.c.l.b16 %v1334_v8 }
 0x133   : > { %1796 = vmatpush.bf16.msrb.mxu2 %v4642_v21 }
 0x134   : > { %v1422_v54 = vpack.c.b16 %v1414_v52, %v1413_v48 }
 0x136   : > { %1870 = vrot.lane.b32.xlu0 %v4652_v62, %s4307_s26 }
 0x137   : > { %1514 = vmatpush.bf16.xpose.msrb.mxu1 %v1504_v11  ;;  %1797 = vmatpush.bf16.msrb.mxu2 %v4656_v1 }
 0x138   : > { %2177 = vrot.lane.b32.xlu1 %v4618_v32, %s4307_s26  ;;  %v1495_v32 = vsel %vm1463_vm1, %v4536_v59, 0 }
 0x13a   : > { %2175 = vrot.lane.b32.xlu2 %v4625_v43, %s4307_s26  ;;  %v1489_v43 = vsel %vm1463_vm1, %v4570_v16, 0 }
 0x13b   : > { %1798 = vmatpush.bf16.msrb.mxu2 %v1779_v2 }
 0x13e   : > { %1854 = vrot.lane.b32.xlu0 %v1416_v40, %s4307_s26 }
 0x13f   : > { %1515 = vmatpush.bf16.xpose.msrb.mxu1 %v1501_v27  ;;  %1799 = vmatpush.bf16.msrb.mxu2 %v4678_v22  ;;  %v4779_v27 = vld [vmem:[%s6547_s2 + $0x20] sm:$0xff] }
 0x140   : > { %2173 = vrot.lane.b32.xlu1 %v4642_v21, %s4307_s26 }
 0x142   : > { %2169 = vrot.lane.b32.xlu2 %v1779_v2, %s4307_s26  ;;  %v4754_v2 = vld [vmem:[%s6547_s2 + $0x8] sm:$0xff] }
 0x143   : > { %1800 = vmatpush.bf16.msrb.mxu2 %v4690_v51 }
 0x146   : > { %1860 = vrot.lane.b32.xlu0 %v1419_v38, %s4307_s26 }
 0x147   : > { %1516 = vmatpush.bf16.xpose.msrb.mxu1 %v1498_v44  ;;  %v4798_v44 = vld [vmem:[%s6547_s2 + $0x30] sm:$0xff] }
 0x14e   : > { %1866 = vrot.lane.b32.xlu0 %v1422_v54, %s4307_s26 }
 0x14f   : > { %1517 = vmatpush.bf16.xpose.msrb.mxu1 %v1495_v32  ;;  %v4809_v32 = vld [vmem:[%s6547_s2 + $0x38] sm:$0xff] }
 0x156   : > { %2171 = vrot.lane.b32.xlu0 %v4656_v1, %s4307_s26 }
 0x157   : > { %1518 = vmatpush.bf16.xpose.msrb.mxu1 %v1492_v47 }
 0x15e   : > { %2179 = vrot.lane.b32.xlu0 %v4609_v61, %s4307_s26 }
 0x15f   : > { %1519 = vmatpush.bf16.xpose.msrb.mxu1 %v1489_v43 }
 0x166   : > { %3746 = vmatmul.msk.bf16.vlgmr.msrb.gmra.mxu1 %vm1463_vm1, %v4542_v0  ;;  %v1875_v0 = vpop.permute.xlu2 %1874 }
 0x167   : > { %v1918_v60 = vsel %vm1463_vm1, %v1875_v0, 0  ;;  %v4829_v0 = vld [vmem:[%s6547_s2 + $0x48] sm:$0xff] }
 0x16e   : > { %v1873_v28 = vpop.permute.xlu2 %1872 }
 0x16f   : > { %v1915_v33 = vsel %vm1463_vm1, %v1873_v28, 0 }
 0x176   : > { %3747 = vmatmul.msk.bf16.gmra.mxu1 %vm1463_vm1, %v1416_v40  ;;  %v1853_v63 = vpop.permute.xlu2 %1852 }
 0x178   : > { %v1879_v16 = vpop.permute.xlu1 %1878 }
 0x179   : > { %v1924_v26 = vsel %vm1463_vm1, %v1879_v16, 0 }
 0x180   : > { %v1877_v24 = vpop.permute.xlu1 %1876 }
 0x181   : > { %v1921_v34 = vsel %vm1463_vm1, %v1877_v24, 0 }
 0x184   : > { %v1859_v6 = vpop.permute.xlu2 %1858 }
 0x186   : > { %3748 = vmatmul.msk.bf16.gmra.mxu1 %vm1463_vm1, %v4646_v56 }
 0x188   : > { %v1869_v53 = vpop.permute.xlu1 %1868 }
 0x189   : > { %v1909_v18 = vsel %vm1463_vm1, %v1869_v53, 0 }
 0x18c   : > { %v4739_v42 = vpop.permute.xlu2 %1864 }
 0x194   : > { %v2176_v14 = vpop.permute.xlu2 %2175 }
 0x196   : > { %3749 = vmatmul.msk.bf16.gmra.mxu1 %vm1463_vm1, %v4659_v5 }
 0x198   : > { %v1883_v59 = vpop.permute.xlu0 %1882 }
 0x199   : > { %v1930_v55 = vsel %vm1463_vm1, %v1883_v59, 0 }
 0x19a   : > { %1932 = vmatpush.bf16.xpose.msrb.mxu3 %v1930_v55  ;;  %v1857_v62 = vpop.permute.xlu1 %1856  ;;  %v4818_v55 = vld [vmem:[%s6547_s2 + $0x40] sm:$0xff] }
 0x19c   : > { %v2170_v17 = vpop.permute.xlu2 %2169 }
 0x1a0   : > { %v1881_v21 = vpop.permute.xlu0 %1880 }
 0x1a1   : > { %v1927_v61 = vsel %vm1463_vm1, %v1881_v21, 0 }
 0x1a2   : > { %1933 = vmatpush.bf16.xpose.msrb.mxu3 %v1927_v61  ;;  %v4734_v1 = vpop.permute.xlu1 %1862 }
 0x1a6   : > { %3750 = vmatmul.msk.bf16.gmra.mxu1 %vm1463_vm1, %v1419_v38 }
 0x1a8   : > { %v1871_v23 = vpop.permute.xlu0 %1870 }
 0x1a9   : > { %v1912_v4 = vsel %vm1463_vm1, %v1871_v23, 0 }
 0x1aa   : > { %1934 = vmatpush.bf16.xpose.msrb.mxu3 %v1924_v26  ;;  %v2178_v58 = vpop.permute.xlu1 %2177 }
 0x1b0   : > { %v1855_v56 = vpop.permute.xlu0 %1854 }
 0x1b2   : > { %1935 = vmatpush.bf16.xpose.msrb.mxu3 %v1921_v34  ;;  %v2174_v10 = vpop.permute.xlu1 %2173 }
 0x1b6   : > { %3751 = vmatmul.msk.bf16.gmra.mxu1 %vm1463_vm1, %v4674_v36 }
 0x1b8   : > { %v4728_v57 = vpop.permute.xlu0 %1860 }
 0x1ba   : > { %1936 = vmatpush.bf16.xpose.msrb.mxu3 %v1918_v60 }
 0x1c0   : > { %v4731_v29 = vpop.permute.xlu0 %1866 }
 0x1c2   : > { %1937 = vmatpush.bf16.xpose.msrb.mxu3 %v1915_v33 }
 0x1c6   : > { %3752 = vmatmul.msk.bf16.gmra.mxu1 %vm1463_vm1, %v4680_v35 }
 0x1c8   : > { %v2172_v15 = vpop.permute.xlu0 %2171 }
 0x1ca   : > { %1938 = vmatpush.bf16.xpose.msrb.mxu3 %v1912_v4 }
 0x1d0   : > { %v2180_v5 = vpop.permute.xlu0 %2179 }
 0x1d1   : > { %2189 = vmatpush.bf16.msrb.mxu0 %v2180_v5  ;;  %3858 = vmatpush.bf16.msra.mxu1 %v2180_v5 }
 0x1d2   : > { %1939 = vmatpush.bf16.xpose.msrb.mxu3 %v1909_v18 }
 0x1d5   : > { %2190 = vmatpush.bf16.msrb.mxu0 %v2178_v58  ;;  %3859 = vmatpush.bf16.msra.mxu1 %v2178_v58 }
 0x1d6   : > { %3753 = vmatmul.msk.bf16.gmra.mxu1 %vm1463_vm1, %v1422_v54 }
 0x1d9   : > { %3754 = vmatmul.msk.bf16.vlgmr.msrb.gmra.mxu3 %vm1463_vm1, %v1853_v63  ;;  %2191 = vmatpush.bf16.msrb.mxu0 %v2176_v14 }
 0x1da   : > { %3860 = vmatpush.bf16.msra.mxu1 %v2176_v14 }
 0x1dd   : > { %2192 = vmatpush.bf16.msrb.mxu0 %v2174_v10 }
 0x1de   : > { %3861 = vmatpush.bf16.msra.mxu1 %v2174_v10 }
 0x1e1   : > { %2193 = vmatpush.bf16.msrb.mxu0 %v2172_v15 }
 0x1e2   : > { %3862 = vmatpush.bf16.msra.mxu1 %v2172_v15 }
 0x1e3   : > { %v1521_v11 = vpop.f32.mrf.mxu1 }
 0x1e4   : > { %v1561_v13 = vmul.f32 0.25, %v1521_v11 }
 0x1e5   : > { %2194 = vmatpush.bf16.msrb.mxu0 %v2170_v17 }
 0x1e6   : > { %v1577_v39 = vadd.f32 %v1561_v13, %v4747_v12  ;;  %3863 = vmatpush.bf16.msra.mxu1 %v2170_v17 }
 0x1e8   : > { %1593 = vmax.xlane.f32.xlu1 %v1577_v39 }
 0x1e9   : > { %3755 = vmatmul.msk.bf16.gmra.mxu3 %vm1463_vm1, %v1855_v56 }
 0x1eb   : > { %v1523_v20 = vpop.f32.mrf.mxu1 }
 0x1ec   : > { %v1562_v19 = vmul.f32 0.25, %v1523_v20 }
 0x1ee   : > { %v1578_v31 = vadd.f32 %v1562_v19, %v4754_v2 }
 0x1f0   : > { %1595 = vmax.xlane.f32.xlu2 %v1578_v31 }
 0x1f3   : > { %v1526_v36 = vpop.f32.mrf.mxu1 }
 0x1f4   : > { %v1563_v37 = vmul.f32 0.25, %v1526_v36 }
 0x1f6   : > { %v4763_v9 = vadd.f32 %v1563_v37, %v4760_v25 }
 0x1f8   : > { %1597 = vmax.xlane.f32.xlu1 %v4763_v9 }
 0x1f9   : > { %3756 = vmatmul.msk.bf16.gmra.mxu3 %vm1463_vm1, %v1857_v62 }
 0x1fb   : > { %v1528_v40 = vpop.f32.mrf.mxu1 }
 0x1fc   : > { %v1564_v41 = vmul.f32 0.25, %v1528_v40 }
 0x1fe   : > { %v4773_v45 = vadd.f32 %v1564_v41, %v4770_v7 }
 0x200   : > { %1599 = vmax.xlane.f32.xlu2 %v4773_v45 }
 0x203   : > { %v1531_v35 = vpop.f32.mrf.mxu1 }
 0x204   : > { %v1565_v30 = vmul.f32 0.25, %v1531_v35 }
 0x206   : > { %v4782_v46 = vadd.f32 %v1565_v30, %v4779_v27 }
 0x208   : > { %1601 = vmax.xlane.f32.xlu2 %v4782_v46 }
 0x209   : > { %3757 = vmatmul.msk.bf16.gmra.mxu3 %vm1463_vm1, %v1859_v6 }
 0x20b   : > { %v1533_v49 = vpop.f32.mrf.mxu1 }
 0x20c   : > { %v1566_v3 = vmul.f32 0.25, %v1533_v49 }
 0x20e   : > { %v4792_v8 = vadd.f32 %v1566_v3, %v4789_v50 }
 0x210   : > { %1603 = vmax.xlane.f32.xlu0 %v4792_v8 }
 0x213   : > { %v1536_v38 = vpop.f32.mrf.mxu1 }
 0x214   : > { %v1567_v48 = vmul.f32 0.25, %v1536_v38 }
 0x216   : > { %v4801_v52 = vadd.f32 %v1567_v48, %v4798_v44 }
 0x218   : > { %1605 = vmax.xlane.f32.xlu1 %v4801_v52 }
 0x219   : > { %3758 = vmatmul.msk.bf16.gmra.mxu3 %vm1463_vm1, %v4728_v57 }
 0x21b   : > { %v1538_v54 = vpop.f32.mrf.mxu1 }
 0x21c   : > { %v1568_v47 = vmul.f32 0.25, %v1538_v54 }
 0x21e   : > { %v4812_v43 = vadd.f32 %v1568_v47, %v4809_v32 }
 0x220   : > { %1607 = vmax.xlane.f32.xlu2 %v4812_v43 }
 0x223   : > { %v1541_v59 = vpop.f32.mrf.mxu1 }
 0x224   : > { %v1569_v16 = vmul.f32 0.25, %v1541_v59 }
 0x226   : > { %v4821_v21 = vadd.f32 %v1569_v16, %v4818_v55 }
 0x228   : > { %1609 = vmax.xlane.f32.xlu2 %v4821_v21 }
 0x229   : > { %3759 = vmatmul.msk.bf16.gmra.mxu3 %vm1463_vm1, %v4734_v1 }
 0x22b   : > { %v1543_v61 = vpop.f32.mrf.mxu1 }
 0x22c   : > { %v1570_v23 = vmul.f32 0.25, %v1543_v61 }
 0x22e   : > { %v4832_v26 = vadd.f32 %v1570_v23, %v4829_v0 }
 0x230   : > { %1611 = vmax.xlane.f32.xlu1 %v4832_v26 }
 0x233   : > { %v4887_v49 = vpop.f32.mrf.mxu1 }
 0x239   : > { %3760 = vmatmul.msk.bf16.gmra.mxu3 %vm1463_vm1, %v4739_v42 }
 0x23b   : > { %v1548_v48 = vpop.f32.mrf.mxu1 }
 0x243   : > { %v4894_v16 = vpop.f32.mrf.mxu1 }
 0x249   : > { %3761 = vmatmul.msk.bf16.gmra.mxu3 %vm1463_vm1, %v4731_v29 }
 0x25b   : > { %v1594_v24 = vpop.xlane.xlu1 %1593 }
 0x25c   : > { %v1625_v56 = vsub.f32 %v1577_v39, %v1594_v24  ;;  %v1941_v34 = vpop.f32.mrf.mxu3 }
 0x25d   : > { %v1981_v28 = vmul.f32 0.25, %v1941_v34 }
 0x25e   : > { %v1641_v53 = vmul.f32 1.442695, %v1625_v56 }
 0x25f   : > { %v4840_v57 = vadd.f32 %v1981_v28, %v4747_v12 }
 0x260   : > { %3931 = vpow2.f32 %v1641_v53  ;;  %v4907_v53 = vld [vmem:[%s6547_s2 + $0x50] sm:$0xff] }
 0x261   : > { %2013 = vmax.xlane.f32.xlu0 %v4840_v57 }
 0x263   : > { %v1596_v60 = vpop.xlane.xlu2 %1595 }
 0x264   : > { %v1626_v63 = vsub.f32 %v1578_v31, %v1596_v60  ;;  %v1943_v62 = vpop.f32.mrf.mxu3  ;;  %v1553_v60 = vpop.f32.mrf.mxu1 }
 0x265   : > { %v1982_v29 = vmul.f32 0.25, %v1943_v62 }
 0x266   : > { %v4843_v33 = vpop.eup %3931  ;;  %v1643_v6 = vmul.f32 1.442695, %v1626_v63 }
 0x267   : > { %1673 = vadd.xlane.f32.xlu2 %v4843_v33  ;;  %v4848_v42 = vadd.f32 %v1982_v29, %v4754_v2 }
 0x268   : > { %3933 = vpow2.f32 %v1643_v6 }
 0x26b   : > { %v1598_v1 = vpop.xlane.xlu1 %1597 }
 0x26c   : > { %v1627_v15 = vsub.f32 %v4763_v9, %v1598_v1  ;;  %v1946_v4 = vpop.f32.mrf.mxu3 }
 0x26d   : > { %v1983_v18 = vmul.f32 0.25, %v1946_v4 }
 0x26e   : > { %v4850_v5 = vpop.eup %3933  ;;  %v1645_v58 = vmul.f32 1.442695, %v1627_v15  ;;  %v1574_v15 = vmul.f32 0.25, %v1553_v60 }
 0x26f   : > { %1675 = vadd.xlane.f32.xlu0 %v4850_v5  ;;  %2015 = vmax.xlane.f32.xlu2 %v4848_v42  ;;  %v4855_v11 = vadd.f32 %v1983_v18, %v4760_v25 }
 0x270   : > { %3935 = vpow2.f32 %v1645_v58  ;;  %v4920_v58 = vld [vmem:[%s6547_s2 + $0x68] sm:$0xff] }
 0x273   : > { %v1600_v10 = vpop.xlane.xlu2 %1599 }
 0x274   : > { %v1948_v14 = vpop.f32.mrf.mxu3  ;;  %v1628_v13 = vsub.f32 %v4773_v45, %v1600_v10  ;;  %v4927_v10 = vadd.f32 %v1574_v15, %v4920_v58 }
 0x275   : > { %v1984_v17 = vmul.f32 0.25, %v1948_v14 }
 0x276   : > { %v4857_v12 = vpop.eup %3935  ;;  %v1647_v39 = vmul.f32 1.442695, %v1628_v13 }
 0x277   : > { %2017 = vmax.xlane.f32.xlu0 %v4855_v11  ;;  %1677 = vadd.xlane.f32.xlu1 %v4857_v12  ;;  %v4863_v2 = vadd.f32 %v1984_v17, %v4770_v7  ;;  %v1572_v17 = vmul.f32 0.25, %v1548_v48 }
 0x278   : > { %3937 = vpow2.f32 %v1647_v39 }
 0x27c   : > { %v1951_v20 = vpop.f32.mrf.mxu3 }
 0x27d   : > { %v1985_v37 = vmul.f32 0.25, %v1951_v20 }
 0x27e   : > { %v4866_v36 = vpop.eup %3937 }
 0x27f   : > { %2019 = vmax.xlane.f32.xlu1 %v4863_v2  ;;  %v4874_v40 = vadd.f32 %v1985_v37, %v4779_v27  ;;  %v1602_v27 = vpop.xlane.xlu2 %1601 }
 0x283   : > { %v1604_v38 = vpop.xlane.xlu0 %1603 }
 0x284   : > { %v1953_v19 = vpop.f32.mrf.mxu3 }
 0x285   : > { %v1986_v31 = vmul.f32 0.25, %v1953_v19 }
 0x287   : > { %1679 = vadd.xlane.f32.xlu1 %v4866_v36  ;;  %v4870_v25 = vadd.f32 %v1986_v31, %v4789_v50 }
 0x289   : > { %2023 = vmax.xlane.f32.xlu2 %v4870_v25 }
 0x28b   : > { %v4899_v23 = vpop.xlane.xlu1 %1605 }
 0x28c   : > { %v1956_v9 = vpop.f32.mrf.mxu3 }
 0x28d   : > { %v1987_v7 = vmul.f32 0.25, %v1956_v9 }
 0x28f   : > { %2021 = vmax.xlane.f32.xlu1 %v4874_v40  ;;  %v4878_v35 = vadd.f32 %v1987_v7, %v4798_v44  ;;  %v1630_v7 = vsub.f32 %v4792_v8, %v1604_v38  ;;  %v3838_v38 = vld [vmem:[#allocation2 + $0x10] sm:$0xff] }
 0x293   : > { %v4889_v3 = vpop.xlane.xlu2 %1607 }
 0x294   : > { %v1958_v41 = vpop.f32.mrf.mxu3 }
 0x295   : > { %v1988_v45 = vmul.f32 0.25, %v1958_v41  ;;  %v1651_v41 = vmul.f32 1.442695, %v1630_v7 }
 0x297   : > { %2025 = vmax.xlane.f32.xlu1 %v4878_v35  ;;  %v4882_v30 = vadd.f32 %v1988_v45, %v4809_v32 }
 0x299   : > { %2027 = vmax.xlane.f32.xlu2 %v4882_v30 }
 0x29b   : > { %v4891_v54 = vpop.xlane.xlu2 %1609 }
 0x29c   : > { %v1961_v50 = vpop.f32.mrf.mxu3 }
 0x29d   : > { %v1989_v62 = vmul.f32 0.25, %v1961_v50 }
 0x29f   : > { %v4923_v18 = vadd.f32 %v1989_v62, %v4818_v55  ;;  %v1378_v55 = vld [vmem:[%s6547_s2 + $0x58] sm:$0xff] }
 0x2a3   : > { %v4913_v63 = vpop.xlane.xlu1 %1611 }
 0x2a4   : > { %v1963_v44 = vpop.f32.mrf.mxu3 }
 0x2a5   : > { %v1990_v47 = vmul.f32 0.25, %v1963_v44 }
 0x2ac   : > { %v1966_v24 = vpop.f32.mrf.mxu3 }
 0x2ad   : > { %v1991_v34 = vmul.f32 0.25, %v1966_v24 }
 0x2b1   : > { %2165 = vrot.lane.b32.xlu2 %v4690_v51, %s4307_s26  ;;  %v4897_v51 = vadd.f32 %v1990_v47, %v4829_v0  ;;  %v4911_v0 = vadd.f32 %v1991_v34, %v4907_v53 }
 0x2b4   : > { %v1968_v50 = vpop.f32.mrf.mxu3 }
 0x2d4   : > { %v2014_v59 = vpop.xlane.xlu0 %2013 }
 0x2d5   : > { %v2045_v32 = vsub.f32 %v4840_v57, %v2014_v59  ;;  %v3836_v57 = vld [vmem:[#allocation2] sm:$0xff] }
 0x2d6   : > { %596 = vmatmul.bf16.vlgmr.msra.gmra.mxu0 %v3836_v57 }
 0x2d7   : > { %v2061_v61 = vmul.f32 1.442695, %v2045_v32  ;;  %v1992_v32 = vmul.f32 0.25, %v1968_v50  ;;  %v1382_v50 = vld [vmem:[%s6547_s2 + $0x78] sm:$0xff] }
 0x2d9   : > { %3939 = vpow2.f32 %v2061_v61 }
 0x2da   : > { %2031 = vmax.xlane.f32.xlu2 %v4897_v51  ;;  %v1674_v56 = vpop.xlane.xlu2 %1673 }
 0x2db   : > { %3941 = vrcp.f32 %v1674_v56 }
 0x2df   : > { %v4902_v28 = vpop.eup %3939 }
 0x2e0   : > { %2093 = vadd.xlane.f32.xlu0 %v4902_v28 }
 0x2e1   : > { %v3942_v14 = vpop.eup %3941 }
 0x2e2   : > { %v1676_v6 = vpop.xlane.xlu0 %1675  ;;  %2033 = vmax.xlane.f32.xlu2 %v4911_v0  ;;  %v2016_v29 = vpop.xlane.xlu2 %2015  ;;  %v1721_v20 = vmul.f32 %v3942_v14, %v4843_v33  ;;  %v3837_v33 = vld [vmem:[#allocation2 + $0x8] sm:$0xff] }
 0x2e3   : > { %3943 = vrcp.f32 %v1676_v6  ;;  %v2046_v1 = vsub.f32 %v4848_v42, %v2016_v29  ;;  %v1629_v42 = vsub.f32 %v4782_v46, %v1602_v27  ;;  %v4939_v46 = vadd.f32 %v1572_v17, %v1378_v55  ;;  %v1379_v17 = vld [vmem:[%s6547_s2 + $0x60] sm:$0xff] }
 0x2e4   : > { %v4953_v29 = vadd.f32 %v1992_v32, %v1378_v55 }
 0x2e5   : > { %v2063_v4 = vmul.f32 1.442695, %v2046_v1  ;;  %v1649_v9 = vmul.f32 1.442695, %v1629_v42  ;;  %v1971_v1 = vpop.f32.mrf.mxu3 }
 0x2e6   : > { %601 = vmatmul.bf16.gmra.mxu0 %v3837_v33  ;;  %v1993_v14 = vmul.f32 0.25, %v1971_v1  ;;  %v3840_v33 = vld [vmem:[#allocation2 + $0x20] sm:$0xff] }
 0x2e7   : > { %3945 = vpow2.f32 %v2063_v4 }
 0x2e8   : > { %2029 = vmax.xlane.f32.xlu0 %v4923_v18  ;;  %3947 = vpow2.f32 %v1649_v9 }
 0x2e9   : > { %v3944_v13 = vpop.eup %3943  ;;  %3949 = vpow2.f32 %v1651_v41 }
 0x2ea   : > { %v1678_v39 = vpop.xlane.xlu1 %1677  ;;  %1619 = vmax.xlane.f32.xlu2 %v4927_v10  ;;  %v1722_v19 = vmul.f32 %v3944_v13, %v4850_v5  ;;  %v2018_v44 = vpop.xlane.xlu0 %2017  ;;  %v3839_v13 = vld [vmem:[#allocation2 + $0x18] sm:$0xff] }
 0x2eb   : > { %3951 = vrcp.f32 %v1678_v39  ;;  %v2047_v59 = vsub.f32 %v4855_v11, %v2018_v44  ;;  %v4971_v39 = vadd.f32 %v1993_v14, %v1379_v17 }
 0x2ec   : > { %v1737_v31 = vpack.c.bf16 %v1722_v19, %v1721_v20  ;;  %v1633_v19 = vsub.f32 %v4821_v21, %v4891_v54 }
 0x2ed   : > { %v4936_v37 = vpop.eup %3945  ;;  %v2065_v62 = vmul.f32 1.442695, %v2047_v59  ;;  %v1973_v42 = vpop.f32.mrf.mxu3 }
 0x2ee   : > { %1801 = vmatmul.bf16.vlgmr.msrb.gmra.mxu2 %v1737_v31  ;;  %2095 = vadd.xlane.f32.xlu1 %v4936_v37  ;;  %v4943_v45 = vpop.eup %3947  ;;  %v1994_v41 = vmul.f32 0.25, %v1973_v42  ;;  %v1556_v59 = vpop.f32.mrf.mxu1 }
 0x2ef   : > { %v4946_v48 = vpop.eup %3949  ;;  %v1575_v32 = vmul.f32 0.25, %v1556_v59 }
 0x2f0   : > { %1615 = vmax.xlane.f32.xlu0 %v4939_v46 }
 0x2f1   : > { %v3952_v8 = vpop.eup %3951 }
 0x2f2   : > { %v2020_v5 = vpop.xlane.xlu1 %2019  ;;  %v1723_v24 = vmul.f32 %v3952_v8, %v4857_v12  ;;  %v5000_v8 = vadd.f32 %v1994_v41, %v4920_v58  ;;  %v1573_v58 = vmul.f32 0.25, %v4894_v16 }
 0x2f3   : > { %v2048_v11 = vsub.f32 %v4863_v2, %v2020_v5 }
 0x2f5   : > { %v1976_v55 = vpop.f32.mrf.mxu3 }
 0x2f6   : > { %606 = vmatmul.bf16.gmra.mxu0 %v3838_v38  ;;  %v1558_v16 = vpop.f32.mrf.mxu1 }
 0x2f8   : > { %1681 = vadd.xlane.f32.xlu0 %v4943_v45 }
 0x2fa   : > { %v1680_v27 = vpop.xlane.xlu1 %1679 }
 0x2fb   : > { %3953 = vrcp.f32 %v1680_v27  ;;  %v1571_v27 = vmul.f32 0.25, %v4887_v49  ;;  %v1634_v49 = vsub.f32 %v4832_v26, %v4913_v63  ;;  %v3842_v63 = vld [vmem:[#allocation2 + $0x30] sm:$0xff] }
 0x2fc   : > { %v2024_v57 = vpop.xlane.xlu2 %2023 }
 0x2fd   : > { %v1978_v54 = vpop.f32.mrf.mxu3  ;;  %v5003_v38 = vadd.f32 %v1571_v27, %v4907_v53  ;;  %v1381_v53 = vld [vmem:[%s6547_s2 + $0x70] sm:$0xff] }
 0x2fe   : > { %v1996_v5 = vmul.f32 0.25, %v1978_v54 }
 0x300   : > { %1683 = vadd.xlane.f32.xlu0 %v4946_v48  ;;  %v4996_v44 = vadd.f32 %v1996_v5, %v1382_v50 }
 0x301   : > { %v3954_v47 = vpop.eup %3953 }
 0x302   : > { %v2022_v61 = vpop.xlane.xlu1 %2021  ;;  %v1724_v56 = vmul.f32 %v3954_v47, %v4866_v36  ;;  %v3841_v47 = vld [vmem:[#allocation2 + $0x28] sm:$0xff] }
 0x303   : > { %v2049_v34 = vsub.f32 %v4874_v40, %v2022_v61  ;;  %v2067_v40 = vmul.f32 1.442695, %v2048_v11  ;;  %v1632_v61 = vsub.f32 %v4812_v43, %v4889_v3 }
 0x304   : > { %v1738_v60 = vpack.c.bf16 %v1724_v56, %v1723_v24  ;;  %v1659_v24 = vmul.f32 1.442695, %v1634_v49 }
 0x305   : > { %v2069_v6 = vmul.f32 1.442695, %v2049_v34  ;;  %v1655_v56 = vmul.f32 1.442695, %v1632_v61  ;;  %v5015_v34 = vadd.f32 %v1575_v32, %v1381_v53 }
 0x306   : > { %1806 = vmatmul.bf16.gmra.mxu2 %v1738_v60  ;;  %611 = vmatmul.bf16.gmra.mxu0 %v3839_v13 }
 0x307   : > { %3955 = vpow2.f32 %v2069_v6  ;;  %2167 = vrot.lane.b32.xlu1 %v4678_v22, %s4307_s26  ;;  %v1631_v22 = vsub.f32 %v4801_v52, %v4899_v23  ;;  %v2050_v52 = vsub.f32 %v4870_v25, %v2024_v57  ;;  %v1657_v23 = vmul.f32 1.442695, %v1633_v19 }
 0x308   : > { %2035 = vmax.xlane.f32.xlu0 %v4953_v29  ;;  %3957 = vpow2.f32 %v2065_v62  ;;  %v5017_v57 = vadd.f32 %v1573_v58, %v1379_v17  ;;  %v1576_v62 = vmul.f32 0.25, %v1558_v16 }
 0x309   : > { %3959 = vpow2.f32 %v2067_v40  ;;  %v1653_v20 = vmul.f32 1.442695, %v1631_v22  ;;  %v2071_v9 = vmul.f32 1.442695, %v2050_v52 }
 0x30a   : > { %v2026_v26 = vpop.xlane.xlu1 %2025  ;;  %v5030_v11 = vadd.f32 %v1576_v62, %v1382_v50 }
 0x30b   : > { %v2051_v60 = vsub.f32 %v4878_v35, %v2026_v26  ;;  %v1995_v35 = vmul.f32 0.25, %v1976_v55 }
 0x30c   : > { %v2028_v12 = vpop.xlane.xlu2 %2027 }
 0x30d   : > { %v4959_v36 = vpop.eup %3955  ;;  %v2052_v4 = vsub.f32 %v4882_v30, %v2028_v12  ;;  %v2073_v1 = vmul.f32 1.442695, %v2051_v60 }
 0x30e   : > { %2101 = vadd.xlane.f32.xlu2 %v4959_v36  ;;  %v4962_v15 = vpop.eup %3957 }
 0x30f   : > { %v2075_v2 = vmul.f32 1.442695, %v2052_v4  ;;  %v4974_v30 = vpop.eup %3959  ;;  %v3843_v4 = vld [vmem:[#allocation2 + $0x38] sm:$0xff] }
 0x310   : > { %2097 = vadd.xlane.f32.xlu0 %v4962_v15 }
 0x311   : > { %3961 = vpow2.f32 %v2075_v2  ;;  %v5037_v2 = vadd.f32 %v1995_v35, %v1381_v53 }
 0x312   : > { %3963 = vpow2.f32 %v1653_v20 }
 0x313   : > { %3965 = vpow2.f32 %v1657_v23 }
 0x314   : > { %3967 = vpow2.f32 %v2071_v9  ;;  %v5028_v6 = vpop.permute.xlu2 %2165 }
 0x315   : > { %3969 = vpow2.f32 %v1659_v24 }
 0x316   : > { %2037 = vmax.xlane.f32.xlu2 %v4971_v39  ;;  %616 = vmatmul.bf16.gmra.mxu0 %v3840_v33  ;;  %3971 = vpow2.f32 %v1655_v56 }
 0x317   : > { %v4980_v31 = vpop.eup %3961  ;;  %3973 = vpow2.f32 %v2073_v1 }
 0x318   : > { %2099 = vadd.xlane.f32.xlu0 %v4974_v30  ;;  %v4983_v7 = vpop.eup %3963 }
 0x319   : > { %v4986_v21 = vpop.eup %3965 }
 0x31a   : > { %v4989_v25 = vpop.eup %3967 }
 0x31b   : > { %v5021_v43 = vpop.eup %3969 }
 0x31c   : > { %v5023_v3 = vpop.eup %3971 }
 0x31d   : > { %v5033_v40 = vpop.eup %3973 }
 0x31e   : > { %2107 = vadd.xlane.f32.xlu2 %v4980_v31 }
 0x320   : > { %1685 = vadd.xlane.f32.xlu0 %v4983_v7 }
 0x326   : > { %1689 = vadd.xlane.f32.xlu2 %v4986_v21  ;;  %621 = vmatmul.bf16.gmra.mxu0 %v3841_v47 }
 0x328   : > { %2103 = vadd.xlane.f32.xlu0 %v4989_v25 }
 0x32e   : > { %2043 = vmax.xlane.f32.xlu2 %v4996_v44 }
 0x330   : > { %2039 = vmax.xlane.f32.xlu0 %v5000_v8 }
 0x331   : > { %1613 = vmax.xlane.f32.xlu1 %v5003_v38 }
 0x336   : > { %626 = vmatmul.bf16.gmra.mxu0 %v3842_v63 }
 0x338   : > { %1621 = vmax.xlane.f32.xlu0 %v5015_v34 }
 0x339   : > { %1617 = vmax.xlane.f32.xlu1 %v5017_v57 }
 0x340   : > { %1691 = vadd.xlane.f32.xlu0 %v5021_v43 }
 0x341   : > { %1687 = vadd.xlane.f32.xlu1 %v5023_v3 }
 0x346   : > { %631 = vmatmul.bf16.gmra.mxu0 %v3843_v4 }
 0x349   : > { %1623 = vmax.xlane.f32.xlu1 %v5030_v11 }
 0x34d   : > { %v2032_v12 = vpop.xlane.xlu2 %2031 }
 0x34e   : > { %v2054_v14 = vsub.f32 %v4897_v51, %v2032_v12 }
 0x350   : > { %v2079_v42 = vmul.f32 1.442695, %v2054_v14 }
 0x351   : > { %2105 = vadd.xlane.f32.xlu1 %v5033_v40 }
 0x352   : > { %3975 = vpow2.f32 %v2079_v42 }
 0x353   : > { %v2094_v13 = vpop.xlane.xlu0 %2093  ;;  %v5065_v14 = vpop.f32.mrf.mxu0 }
 0x355   : > { %v2034_v22 = vpop.xlane.xlu2 %2033 }
 0x356   : > { %v2055_v17 = vsub.f32 %v4911_v0, %v2034_v22 }
 0x358   : > { %v2081_v52 = vmul.f32 1.442695, %v2055_v17  ;;  %v5042_v33 = vpop.eup %3975 }
 0x359   : > { %2041 = vmax.xlane.f32.xlu1 %v5037_v2 }
 0x35b   : > { %v2030_v20 = vpop.xlane.xlu0 %2029  ;;  %v5071_v42 = vpop.f32.mrf.mxu0 }
 0x35c   : > { %v2053_v19 = vsub.f32 %v4923_v18, %v2030_v20 }
 0x35d   : > { %v1620_v9 = vpop.xlane.xlu2 %1619 }
 0x35e   : > { %v2077_v23 = vmul.f32 1.442695, %v2053_v19  ;;  %v1638_v51 = vsub.f32 %v4927_v10, %v1620_v9 }
 0x360   : > { %3977 = vpow2.f32 %v2077_v23  ;;  %v1667_v0 = vmul.f32 1.442695, %v1638_v51 }
 0x361   : > { %2111 = vadd.xlane.f32.xlu1 %v5042_v33  ;;  %3979 = vpow2.f32 %v2081_v52  ;;  %v2096_v47 = vpop.xlane.xlu1 %2095 }
 0x363   : > { %v1616_v55 = vpop.xlane.xlu0 %1615 }
 0x364   : > { %v1636_v54 = vsub.f32 %v4939_v46, %v1616_v55 }
 0x366   : > { %v5047_v5 = vpop.eup %3977  ;;  %v1663_v41 = vmul.f32 1.442695, %v1636_v54  ;;  %v5079_v54 = vpop.f32.mrf.mxu0 }
 0x367   : > { %2109 = vadd.xlane.f32.xlu0 %v5047_v5  ;;  %v5050_v18 = vpop.eup %3979 }
 0x368   : > { %3981 = vpow2.f32 %v1663_v41 }
 0x369   : > { %2113 = vadd.xlane.f32.xlu1 %v5050_v18  ;;  %3983 = vpow2.f32 %v1667_v0 }
 0x36a   : > { %3985 = vrcp.f32 %v2096_v47 }
 0x36b   : > { %v1682_v27 = vpop.xlane.xlu0 %1681 }
 0x36c   : > { %3987 = vrcp.f32 %v1682_v27 }
 0x36d   : > { %3989 = vrcp.f32 %v2094_v13 }
 0x36e   : > { %v5053_v50 = vpop.eup %3981 }
 0x36f   : > { %1695 = vadd.xlane.f32.xlu0 %v5053_v50  ;;  %v5056_v10 = vpop.eup %3983 }
 0x370   : > { %v3986_v59 = vpop.eup %3985 }
 0x371   : > { %1699 = vadd.xlane.f32.xlu1 %v5056_v10  ;;  %v2142_v26 = vmul.f32 %v3986_v59, %v4936_v37 }
 0x372   : > { %v3988_v49 = vpop.eup %3987 }
 0x373   : > { %v1684_v46 = vpop.xlane.xlu0 %1683  ;;  %v3990_v32 = vpop.eup %3989  ;;  %v1725_v24 = vmul.f32 %v3988_v49, %v4943_v45 }
 0x374   : > { %3991 = vrcp.f32 %v1684_v46  ;;  %v2141_v63 = vmul.f32 %v3990_v32, %v4902_v28 }
 0x376   : > { %v2157_v60 = vpack.c.bf16 %v2142_v26, %v2141_v63 }
 0x379   : > { %v2168_v61 = vpop.permute.xlu1 %2167 }
 0x37a   : > { %v3992_v58 = vpop.eup %3991  ;;  %2195 = vmatpush.bf16.msrb.mxu0 %v2168_v61  ;;  %3864 = vmatpush.bf16.msra.mxu1 %v2168_v61 }
 0x37b   : > { %v2036_v53 = vpop.xlane.xlu0 %2035  ;;  %v1726_v56 = vmul.f32 %v3992_v58, %v4946_v48 }
 0x37c   : > { %v2056_v55 = vsub.f32 %v4953_v29, %v2036_v53 }
 0x37d   : > { %v1739_v16 = vpack.c.bf16 %v1726_v56, %v1725_v24  ;;  %v604_v24 = vpop.f32.mrf.mxu0 }
 0x37e   : > { %2196 = vmatpush.bf16.msrb.mxu0 %v5028_v6  ;;  %3865 = vmatpush.bf16.msra.mxu1 %v5028_v6  ;;  %v2083_v41 = vmul.f32 1.442695, %v2056_v55 }
 0x37f   : > { %1811 = vmatmul.bf16.gmra.mxu2 %v1739_v16 }
 0x381   : > { %2197 = vmatmul.bf16.vlgmr.msrb.gmra.mxu0 %v2157_v60  ;;  %v2102_v1 = vpop.xlane.xlu2 %2101 }
 0x383   : > { %v2098_v62 = vpop.xlane.xlu0 %2097 }
 0x384   : > { %3993 = vrcp.f32 %v2098_v62  ;;  %v435_v62 = vld [vmem:[%s4435_s29 + $0x10] sm:$0xff]  }
 0x389   : > { %v2038_v45 = vpop.xlane.xlu2 %2037 }
 0x38a   : > { %v3994_v4 = vpop.eup %3993  ;;  %v2057_v53 = vsub.f32 %v4971_v39, %v2038_v45  ;;  %v431_v45 = vld [vmem:[%s4435_s29] sm:$0xff]  }
 0x38b   : > { %v2100_v12 = vpop.xlane.xlu0 %2099  ;;  %v2143_v28 = vmul.f32 %v3994_v4, %v4962_v15  ;;  %v5111_v4 = vunpack.c.l.bf16 %v435_v62 }
 0x38c   : > { %3995 = vrcp.f32 %v2100_v12 }
 0x38d   : > { %3997 = vrcp.f32 %v2102_v1 }
 0x391   : > { %v5069_v6 = vpop.xlane.xlu2 %2107 }
 0x392   : > { %v3996_v48 = vpop.eup %3995 }
 0x393   : > { %v1686_v37 = vpop.xlane.xlu0 %1685  ;;  %v2144_v35 = vmul.f32 %v3996_v48, %v4974_v30  ;;  %v3998_v17 = vpop.eup %3997 }
 0x394   : > { %v2145_v23 = vmul.f32 %v3998_v17, %v4959_v36  ;;  %v463_v36 = vld [vmem:[%s6548_s3] sm:$0x1] }
 0x395   : > { %v2158_v13 = vpack.c.bf16 %v2144_v35, %v2143_v28  ;;  %v653_v61 = vmul.f32 %v463_v36, %v463_v36  ;;  %v607_v35 = vpop.f32.mrf.mxu0 }
 0x397   : > { %2202 = vmatmul.bf16.gmra.mxu0 %v2158_v13  ;;  %v5098_v56 = vperm.slane %v653_v61, 0 }
 0x399   : > { %v5073_v19 = vpop.xlane.xlu2 %1689 }
 0x39b   : > { %v2104_v22 = vpop.xlane.xlu0 %2103 }
 0x39c   : > { %3999 = vrcp.f32 %v2104_v22  ;;  %v641_v22 = vsub.f32 %v5111_v4, %v607_v35 }
 0x3a2   : > { %v4000_v20 = vpop.eup %3999 }
 0x3a3   : > { %v2040_v52 = vpop.xlane.xlu0 %2039  ;;  %v2146_v15 = vmul.f32 %v4000_v20, %v4989_v25  ;;  %v5086_v25 = vld [vmem:[%s4435_s29 + $0x8] sm:$0xff]  }
 0x3a4   : > { %v1614_v30 = vpop.xlane.xlu1 %1613  ;;  %v5092_v58 = vunpack.c.h.bf16 %v5086_v25 }
 0x3a5   : > { %v1635_v9 = vsub.f32 %v5003_v38, %v1614_v30  ;;  %v2159_v51 = vpack.c.bf16 %v2146_v15, %v2145_v23  ;;  %v2044_v38 = vpop.xlane.xlu2 %2043 }
 0x3a6   : > { %v640_v26 = vsub.f32 %v5092_v58, %v604_v24 }
 0x3a7   : > { %v1661_v0 = vmul.f32 1.442695, %v1635_v9  ;;  %2207 = vmatmul.bf16.gmra.mxu0 %v2159_v51 }
 0x3a9   : > { %4001 = vpow2.f32 %v1661_v0 }
 0x3aa   : > { %4003 = vpow2.f32 %v2083_v41 }
 0x3ab   : > { %v1622_v27 = vpop.xlane.xlu0 %1621 }
 0x3ac   : > { %v1639_v47 = vsub.f32 %v5015_v34, %v1622_v27  ;;  %v1618_v46 = vpop.xlane.xlu1 %1617  ;;  %v2060_v34 = vsub.f32 %v4996_v44, %v2044_v38  ;;  %v2085_v44 = vmul.f32 1.442695, %v2057_v53  ;;  %v5138_v27 = vunpack.c.h.bf16 %v435_v62  ;;  %v609_v38 = vpop.f32.mrf.mxu0 }
 0x3ad   : > { %v1637_v59 = vsub.f32 %v5017_v57, %v1618_v46  ;;  %v2058_v57 = vsub.f32 %v5000_v8, %v2040_v52  ;;  %v658_v8 = vmul.f32 %v5098_v56, %v640_v26  ;;  %v5151_v53 = vunpack.c.h.bf16 %v431_v45 }
 0x3ae   : > { %v1669_v29 = vmul.f32 1.442695, %v1639_v47  ;;  %v2091_v16 = vmul.f32 1.442695, %v2060_v34 }
 0x3af   : > { %v5089_v49 = vpop.eup %4001  ;;  %v1665_v32 = vmul.f32 1.442695, %v1637_v59  ;;  %v2087_v39 = vmul.f32 1.442695, %v2058_v57  ;;  %v674_v13 = vadd.f32 %v658_v8, %v604_v24 }
 0x3b0   : > { %4005 = vpow2.f32 %v1669_v29  ;;  %1693 = vadd.xlane.f32.xlu2 %v5089_v49  ;;  %v5101_v60 = vpop.eup %4003 }
 0x3b1   : > { %4007 = vpow2.f32 %v1665_v32  ;;  %v642_v32 = vsub.f32 %v5138_v27, %v609_v38 }
 0x3b2   : > { %4009 = vrcp.f32 %v1686_v37  ;;  %v5115_v37 = vunpack.c.l.bf16 %v431_v45  ;;  %v638_v45 = vsub.f32 %v5151_v53, %v5071_v42 }
 0x3b3   : > { %v1692_v23 = vpop.xlane.xlu0 %1691  ;;  %v660_v24 = vmul.f32 %v5098_v56, %v642_v32 }
 0x3b4   : > { %v1688_v63 = vpop.xlane.xlu1 %1687  ;;  %v637_v9 = vsub.f32 %v5115_v37, %v5065_v14 }
 0x3b5   : > { %4011 = vrcp.f32 %v1688_v63 }
 0x3b6   : > { %v5104_v1 = vpop.eup %4005  ;;  %4013 = vpow2.f32 %v2091_v16 }
 0x3b7   : > { %v5106_v12 = vpop.eup %4007  ;;  %1701 = vadd.xlane.f32.xlu1 %v5104_v1  ;;  %4015 = vpow2.f32 %v2085_v44 }
 0x3b8   : > { %2115 = vadd.xlane.f32.xlu2 %v5101_v60  ;;  %1697 = vadd.xlane.f32.xlu0 %v5106_v12  ;;  %v4010_v48 = vpop.eup %4009  ;;  %4017 = vpow2.f32 %v2087_v39 }
 0x3b9   : > { %v1727_v20 = vmul.f32 %v4010_v48, %v4983_v7  ;;  %v659_v7 = vmul.f32 %v5098_v56, %v641_v22  ;;  %4019 = vrcp.f32 %v1692_v23 }
 0x3bb   : > { %v4012_v28 = vpop.eup %4011  ;;  %v675_v47 = vadd.f32 %v659_v7, %v607_v35 }
 0x3bc   : > { %v1624_v17 = vpop.xlane.xlu1 %1623  ;;  %v1728_v52 = vmul.f32 %v4012_v28, %v5023_v3  ;;  %v5121_v30 = vpop.eup %4013  ;;  %v5133_v3 = vadd.f32 %v674_v13, %v5092_v58 }
 0x3bd   : > { %v1640_v15 = vsub.f32 %v5030_v11, %v1624_v17  ;;  %v5125_v55 = vpop.eup %4015  ;;  %v655_v11 = vmul.f32 %v5098_v56, %v637_v9 }
 0x3be   : > { %v1740_v51 = vpack.c.bf16 %v1728_v52, %v1727_v20  ;;  %v5128_v41 = vpop.eup %4017  ;;  %v713_v36 = vsel %vm703_vm0, %v5133_v3, 0.0 }
 0x3bf   : > { %v1671_v0 = vmul.f32 1.442695, %v1640_v15  ;;  %2123 = vadd.xlane.f32.xlu1 %v5121_v30  ;;  %v4020_v59 = vpop.eup %4019  ;;  %v671_v29 = vadd.f32 %v655_v11, %v5065_v14 }
 0x3c0   : > { %1816 = vmatmul.bf16.gmra.mxu2 %v1740_v51  ;;  %2117 = vadd.xlane.f32.xlu2 %v5125_v55  ;;  %v1730_v57 = vmul.f32 %v4020_v59, %v5021_v43  ;;  %v676_v43 = vadd.f32 %v660_v24, %v609_v38  ;;  %v3850_v59 = vld [vmem:[#allocation6] sm:$0xff] }
 0x3c1   : > { %4021 = vpow2.f32 %v1671_v0  ;;  %2119 = vadd.xlane.f32.xlu0 %v5128_v41  ;;  %v5156_v14 = vadd.f32 %v671_v29, %v5115_v37  ;;  %2364 = vmatpush.bf16.msra.mxu2 %v3850_v59 }
 0x3c2   : > { %4023 = vrcp.f32 %v5069_v6 }
 0x3c3   : > { %4025 = vrcp.f32 %v5073_v19  ;;  %v5149_v19 = vadd.f32 %v675_v47, %v5111_v4  ;;  %v704_v35 = vsel %vm703_vm0, %v5156_v14, 0.0 }
 0x3c4   : > { %v2106_v46 = vpop.xlane.xlu1 %2105 }
 0x3c5   : > { %4027 = vrcp.f32 %v2106_v46  ;;  %v716_v63 = vsel %vm703_vm0, %v5149_v19, 0.0 }
 0x3c7   : > { %v5145_v61 = vpop.eup %4021  ;;  %714 = vadd.xlane.f32.xlu1 %v713_v36 }
 0x3c8   : > { %v4024_v6 = vpop.eup %4023  ;;  %1703 = vadd.xlane.f32.xlu2 %v5145_v61 }
 0x3c9   : > { %v4026_v34 = vpop.eup %4025  ;;  %v2148_v39 = vmul.f32 %v4024_v6, %v4980_v31  ;;  %v5173_v31 = vadd.f32 %v676_v43, %v5138_v27 }
 0x3ca   : > { %v1729_v44 = vmul.f32 %v4026_v34, %v4986_v21  ;;  %v656_v21 = vmul.f32 %v5098_v56, %v638_v45  ;;  %v4308_v45 = vmov 32.0  }
 0x3cb   : > { %v4028_v26 = vpop.eup %4027  ;;  %v719_v20 = vsel %vm703_vm0, %v5173_v31, 0.0 }
 0x3cc   : > { %v2042_v16 = vpop.xlane.xlu1 %2041  ;;  %v2147_v62 = vmul.f32 %v4028_v26, %v5033_v40  ;;  %v1741_v48 = vpack.c.bf16 %v1730_v57, %v1729_v44  ;;  %v5170_v40 = vunpack.c.l.bf16 %v5086_v25 }
 0x3cd   : > { %v2059_v8 = vsub.f32 %v5037_v2, %v2042_v16  ;;  %v672_v2 = vadd.f32 %v656_v21, %v5071_v42 }
 0x3ce   : > { %v2160_v28 = vpack.c.bf16 %v2148_v39, %v2147_v62  ;;  %v639_v22 = vsub.f32 %v5170_v40, %v5079_v54 }
 0x3cf   : > { %v2089_v13 = vmul.f32 1.442695, %v2059_v8  ;;  %717 = vadd.xlane.f32.xlu1 %v716_v63  ;;  %v5185_v23 = vadd.f32 %v672_v2, %v5151_v53 }
 0x3d0   : > { %1821 = vmatmul.bf16.gmra.mxu2 %v1741_v48  ;;  %2212 = vmatmul.bf16.gmra.mxu0 %v2160_v28  ;;  %v657_v25 = vmul.f32 %v5098_v56, %v639_v22 }
 0x3d1   : > { %4029 = vpow2.f32 %v2089_v13  ;;  %705 = vadd.xlane.f32.xlu2 %v704_v35  ;;  %v707_v9 = vsel %vm703_vm0, %v5185_v23, 0.0 }
 0x3d2   : > { %v673_v42 = vadd.f32 %v657_v25, %v5079_v54  ;;  %v5197_v54 = vpop.f32.mrf.mxu0 }
 0x3d4   : > { %v2112_v17 = vpop.xlane.xlu1 %2111  ;;  %v5191_v7 = vadd.f32 %v673_v42, %v5170_v40 }
 0x3d5   : > { %4031 = vrcp.f32 %v2112_v17 }
 0x3d6   : > { %v710_v36 = vsel %vm703_vm0, %v5191_v7, 0.0 }
 0x3d7   : > { %v5180_v52 = vpop.eup %4029 }
 0x3d8   : > { %2121 = vadd.xlane.f32.xlu0 %v5180_v52 }
 0x3d9   : > { %720 = vadd.xlane.f32.xlu2 %v719_v20 }
 0x3da   : > { %v2110_v15 = vpop.xlane.xlu0 %2109  ;;  %v5199_v38 = vpop.f32.mrf.mxu0 }
 0x3db   : > { %4033 = vrcp.f32 %v2110_v15  ;;  %v4032_v51 = vpop.eup %4031 }
 0x3dc   : > { %v2150_v47 = vmul.f32 %v4032_v51, %v5042_v33  ;;  %v2114_v24 = vpop.xlane.xlu1 %2113 }
 0x3e0   : > { %708 = vadd.xlane.f32.xlu0 %v707_v9 }
 0x3e1   : > { %v4034_v0 = vpop.eup %4033 }
 0x3e2   : > { %v2149_v11 = vmul.f32 %v4034_v0, %v5047_v5  ;;  %v5201_v29 = vpop.f32.mrf.mxu0  ;;  %v1696_v33 = vpop.xlane.xlu0 %1695 }
 0x3e3   : > { %4035 = vrcp.f32 %v1696_v33 }
 0x3e4   : > { %v2161_v46 = vpack.c.bf16 %v2150_v47, %v2149_v11  ;;  %v1700_v43 = vpop.xlane.xlu1 %1699 }
 0x3e6   : > { %2217 = vmatmul.bf16.gmra.mxu0 %v2161_v46 }
 0x3e8   : > { %711 = vadd.xlane.f32.xlu0 %v710_v36 }
 0x3e9   : > { %v4036_v26 = vpop.eup %4035 }
 0x3ea   : > { %v5203_v32 = vpop.f32.mrf.mxu0  ;;  %v1732_v39 = vmul.f32 %v4036_v26, %v5053_v50 }
 0x3f2   : > { %v5205_v6 = vpop.f32.mrf.mxu0 }
 0x3fa   : > { %v5207_v5 = vpop.f32.mrf.mxu0 }
 0x402   : > { %v5209_v57 = vpop.f32.mrf.mxu0 }
 0x40a   : > { %v5213_v28 = vpop.f32.mrf.mxu0 }
 0x412   : > { %v5218_v9 = vpop.f32.mrf.mxu0 }
 0x423   : > { %v1694_v34 = vpop.xlane.xlu2 %1693 }
 0x424   : > { %4037 = vrcp.f32 %v1694_v34  ;;  %v5223_v34 = vpop.f32.mrf.mxu0 }
 0x425   : > { %4039 = vrcp.f32 %v2114_v24 }
 0x426   : > { %4041 = vrcp.f32 %v4308_v45 }
 0x42a   : > { %v4038_v16 = vpop.eup %4037  ;;  %v1702_v47 = vpop.xlane.xlu1 %1701 }
 0x42b   : > { %v2116_v63 = vpop.xlane.xlu2 %2115  ;;  %v1698_v44 = vpop.xlane.xlu0 %1697  ;;  %v1731_v62 = vmul.f32 %v4038_v16, %v5089_v49 }
 0x42c   : > { %4043 = vrcp.f32 %v2116_v63  ;;  %v4040_v48 = vpop.eup %4039 }
 0x42d   : > { %v1742_v8 = vpack.c.bf16 %v1732_v39, %v1731_v62  ;;  %4045 = vrcp.f32 %v1698_v44  ;;  %v4042_v35 = vpop.eup %4041  ;;  %v2151_v2 = vmul.f32 %v4040_v48, %v5050_v18  ;;  %v1802_v44 = vpop.f32.mrf.mxu2 }
 0x42e   : > { %4047 = vrcp.f32 %v1700_v43  ;;  %v753_v22 = vmul.f32 32.0, %v4042_v35  ;;  %vm757_vm2 = vweird.f32 %v4042_v35 }
 0x42f   : > { %1826 = vmatmul.bf16.gmra.mxu2 %v1742_v8  ;;  %v5235_v8 = vld [vmem:[%s4435_s29 + $0x18] sm:$0xff]  }
 0x430   : > { %v754_v15 = vsub.f32 1.0, %v753_v22 }
 0x432   : > { %v4044_v13 = vpop.eup %4043  ;;  %v755_v11 = vmul.f32 %v4042_v35, %v754_v15  ;;  %v2124_v62 = vpop.xlane.xlu1 %2123 }
 0x433   : > { %v2118_v21 = vpop.xlane.xlu2 %2117  ;;  %v2152_v49 = vmul.f32 %v4044_v13, %v5101_v60  ;;  %v4046_v20 = vpop.eup %4045 }
 0x434   : > { %v2120_v50 = vpop.xlane.xlu0 %2119  ;;  %4049 = vrcp.f32 %v2118_v21  ;;  %v4048_v25 = vpop.eup %4047  ;;  %v1733_v42 = vmul.f32 %v4046_v20, %v5106_v12  ;;  %v756_v36 = vadd.f32 %v4042_v35, %v755_v11  ;;  %v3851_v12 = vld [vmem:[#allocation6 + $0x8] sm:$0xff] }
 0x435   : > { %v2162_v17 = vpack.c.bf16 %v2152_v49, %v2151_v2  ;;  %4051 = vrcp.f32 %v2120_v50  ;;  %v1734_v0 = vmul.f32 %v4048_v25, %v5056_v10  ;;  %2285 = vmatpush.bf16.msrb.mxu1 %v3851_v12  ;;  %v2198_v21 = vpop.f32.mrf.mxu0  ;;  %v1804_v49 = vpop.f32.mrf.mxu2 }
 0x436   : > { %v5225_v24 = vsel %vm757_vm2, %v4042_v35, %v756_v36 }
 0x437   : > { %2222 = vmatmul.bf16.gmra.mxu0 %v2162_v17  ;;  %v1743_v60 = vpack.c.bf16 %v1734_v0, %v1733_v42 }
 0x43a   : > { %v4050_v18 = vpop.eup %4049 }
 0x43b   : > { %v1704_v51 = vpop.xlane.xlu2 %1703  ;;  %v4052_v46 = vpop.eup %4051  ;;  %v2153_v59 = vmul.f32 %v4050_v18, %v5125_v55 }
 0x43c   : > { %4053 = vrcp.f32 %v1704_v51  ;;  %v2154_v33 = vmul.f32 %v4052_v46, %v5128_v41 }
 0x43d   : > { %4055 = vrcp.f32 %v1702_v47  ;;  %v1807_v51 = vpop.f32.mrf.mxu2  ;;  %v2200_v0 = vpop.f32.mrf.mxu0 }
 0x43e   : > { %v2163_v16 = vpack.c.bf16 %v2154_v33, %v2153_v59  ;;  %4057 = vrcp.f32 %v2124_v62  ;;  %v2238_v36 = vpack.c.bf16 %v2200_v0, %v2198_v21 }
 0x43f   : > { %1831 = vmatmul.bf16.gmra.mxu2 %v1743_v60 }
 0x442   : > { %v4054_v63 = vpop.eup %4053 }
 0x443   : > { %v4056_v55 = vpop.eup %4055  ;;  %v1736_v45 = vmul.f32 %v4054_v63, %v5145_v61 }
 0x444   : > { %v706_v10 = vpop.xlane.xlu2 %705  ;;  %v1735_v35 = vmul.f32 %v4056_v55, %v5104_v1  ;;  %v4058_v2 = vpop.eup %4057 }
 0x445   : > { %v759_v26 = vmul.f32 %v5225_v24, %v706_v10  ;;  %v2156_v50 = vmul.f32 %v4058_v2, %v5121_v30  ;;  %v2203_v60 = vpop.f32.mrf.mxu0 }
 0x446   : > { %v1744_v13 = vpack.c.bf16 %v1736_v45, %v1735_v35 }
 0x447   : > { %v5229_v39 = vsub.f32 %v5156_v14, %v759_v26  ;;  %2227 = vmatmul.bf16.gmra.mxu0 %v2163_v16  ;;  %v5240_v14 = vunpack.c.l.bf16 %v5235_v8 }
 0x449   : > { %v791_v41 = vmul.f32 %v5229_v39, %v5229_v39  ;;  %v643_v61 = vsub.f32 %v5240_v14, %v5197_v54 }
 0x44b   : > { %v2122_v43 = vpop.xlane.xlu0 %2121  ;;  %v807_v48 = vsel %vm703_vm0, %v791_v41, 0.0  ;;  %v661_v15 = vmul.f32 %v5098_v56, %v643_v61 }
 0x44c   : > { %4059 = vrcp.f32 %v2122_v43  ;;  %808 = vadd.xlane.f32.xlu2 %v807_v48 }
 0x44d   : > { %v677_v18 = vadd.f32 %v661_v15, %v5197_v54  ;;  %v2205_v54 = vpop.f32.mrf.mxu0 }
 0x44e   : > { %v2239_v26 = vpack.c.bf16 %v2205_v54, %v2203_v60  ;;  %v5276_v54 = vunpack.c.h.bf16 %v5235_v8 }
 0x44f   : > { %1836 = vmatmul.bf16.gmra.mxu2 %v1744_v13  ;;  %v5256_v47 = vadd.f32 %v677_v18, %v5240_v14 }
 0x451   : > { %v722_v46 = vsel %vm703_vm0, %v5256_v47, 0.0 }
 0x452   : > { %v4060_v22 = vpop.eup %4059 }
 0x453   : > { %v2155_v17 = vmul.f32 %v4060_v22, %v5180_v52  ;;  %v709_v20 = vpop.xlane.xlu0 %708  ;;  %v1842_v52 = vpack.c.bf16 %v1804_v49, %v1802_v44 }
 0x454   : > { %v760_v1 = vmul.f32 %v5225_v24, %v709_v20 }
 0x455   : > { %v2164_v25 = vpack.c.bf16 %v2156_v50, %v2155_v17  ;;  %v2208_v10 = vpop.f32.mrf.mxu0 }
 0x456   : > { %v5249_v42 = vsub.f32 %v5185_v23, %v760_v1  ;;  %v1809_v23 = vpop.f32.mrf.mxu2 }
 0x457   : > { %2232 = vmatmul.bf16.vlgmr.msra.gmra.mxu1 %v2164_v25  ;;  %v1843_v33 = vpack.c.bf16 %v1809_v23, %v1807_v51 }
 0x458   : > { %v792_v11 = vmul.f32 %v5249_v42, %v5249_v42 }
 0x45a   : > { %v810_v30 = vsel %vm703_vm0, %v792_v11, 0.0 }
 0x45b   : > { %811 = vadd.xlane.f32.xlu0 %v810_v30 }
 0x45d   : > { %v2210_v44 = vpop.f32.mrf.mxu0 }
 0x45e   : > { %v1812_v59 = vpop.f32.mrf.mxu2  ;;  %v2240_v62 = vpack.c.bf16 %v2210_v44, %v2208_v10  ;;  %v5284_v10 = vld [vmem:[%s6548_s3 + $0x6] ss:$0 sm:$0xff] }
 0x45f   : > { %3778 = vmatmul.msk.bf16.vlgmr.msra.gmra.mxu2 %vm1463_vm1, %v1842_v52 }
 0x463   : > { %723 = vadd.xlane.f32.xlu0 %v722_v46 }
 0x465   : > { %v2213_v41 = vpop.f32.mrf.mxu0 }
 0x466   : > { %v1814_v12 = vpop.f32.mrf.mxu2 }
 0x467   : > { %3766 = vmatmul.msk.bf16.vlgmr.msrb.gmra.mxu1 %vm1463_vm1, %v2238_v36  ;;  %v1844_v63 = vpack.c.bf16 %v1814_v12, %v1812_v59  ;;  %v644_v12 = vsub.f32 %v5276_v54, %v5199_v38 }
 0x46d   : > { %v2215_v48 = vpop.f32.mrf.mxu0 }
 0x46e   : > { %v1817_v16 = vpop.f32.mrf.mxu2  ;;  %v2241_v35 = vpack.c.bf16 %v2215_v48, %v2213_v41  ;;  %v715_v41 = vpop.xlane.xlu1 %714 }
 0x46f   : > { %3779 = vmatmul.msk.bf16.gmra.mxu2 %vm1463_vm1, %v1843_v33 }
 0x475   : > { %v2218_v13 = vpop.f32.mrf.mxu0 }
 0x476   : > { %v1819_v55 = vpop.f32.mrf.mxu2 }
 0x477   : > { %3767 = vmatmul.msk.bf16.gmra.mxu1 %vm1463_vm1, %v2239_v26  ;;  %v1845_v45 = vpack.c.bf16 %v1819_v55, %v1817_v16 }
 0x47d   : > { %v2220_v49 = vpop.f32.mrf.mxu0 }
 0x47e   : > { %v1822_v43 = vpop.f32.mrf.mxu2  ;;  %v2242_v22 = vpack.c.bf16 %v2220_v49, %v2218_v13  ;;  %v762_v13 = vmul.f32 %v5225_v24, %v715_v41 }
 0x47f   : > { %3780 = vmatmul.msk.bf16.gmra.mxu2 %vm1463_vm1, %v1844_v63  ;;  %v662_v63 = vmul.f32 %v5098_v56, %v644_v12 }
 0x481   : > { %v678_v55 = vadd.f32 %v662_v63, %v5199_v38 }
 0x486   : > { %v1824_v21 = vpop.f32.mrf.mxu2 }
 0x487   : > { %3768 = vmatmul.msk.bf16.gmra.mxu1 %vm1463_vm1, %v2240_v62  ;;  %v1846_v2 = vpack.c.bf16 %v1824_v21, %v1822_v43  ;;  %v712_v43 = vpop.xlane.xlu0 %711 }
 0x488   : > { %v761_v21 = vmul.f32 %v5225_v24, %v712_v43 }
 0x48f   : > { %3781 = vmatmul.msk.bf16.gmra.mxu2 %vm1463_vm1, %v1845_v45 }
 0x497   : > { %3769 = vmatmul.msk.bf16.gmra.mxu1 %vm1463_vm1, %v2241_v35 }
 0x49f   : > { %3782 = vmatmul.msk.bf16.gmra.mxu2 %vm1463_vm1, %v1846_v2 }
 0x4a7   : > { %3770 = vmatmul.msk.bf16.gmra.mxu1 %vm1463_vm1, %v2242_v22  ;;  %v439_v22 = vld [vmem:[%s4435_s29 + $0x20] sm:$0xff]  }
 0x4b2   : > { %v1827_v61 = vpop.f32.mrf.mxu2 }
 0x4b4   : > { %v2223_v50 = vpop.f32.mrf.mxu0 }
 0x4ba   : > { %v1829_v17 = vpop.f32.mrf.mxu2 }
 0x4bb   : > { %v1847_v20 = vpack.c.bf16 %v1829_v17, %v1827_v61  ;;  %v5305_v61 = vsub.f32 %v5133_v3, %v762_v13 }
 0x4bc   : > { %v2225_v1 = vpop.f32.mrf.mxu0 }
 0x4bd   : > { %v2243_v25 = vpack.c.bf16 %v2225_v1, %v2223_v50  ;;  %3783 = vmatmul.msk.bf16.gmra.mxu2 %vm1463_vm1, %v1847_v20  ;;  %v5308_v50 = vsub.f32 %v5191_v7, %v761_v21  ;;  %v794_v7 = vmul.f32 %v5305_v61, %v5305_v61 }
 0x4bf   : > { %3771 = vmatmul.msk.bf16.gmra.mxu1 %vm1463_vm1, %v2243_v25  ;;  %v5314_v25 = vunpack.c.l.bf16 %v439_v22  ;;  %v793_v3 = vmul.f32 %v5308_v50, %v5308_v50 }
 0x4c2   : > { %v1832_v15 = vpop.f32.mrf.mxu2 }
 0x4c4   : > { %v2228_v51 = vpop.f32.mrf.mxu0 }
 0x4ca   : > { %v1834_v0 = vpop.f32.mrf.mxu2 }
 0x4cb   : > { %v1848_v11 = vpack.c.bf16 %v1834_v0, %v1832_v15 }
 0x4cc   : > { %v2230_v18 = vpop.f32.mrf.mxu0 }
 0x4cd   : > { %v2244_v30 = vpack.c.bf16 %v2230_v18, %v2228_v51  ;;  %3784 = vmatmul.msk.bf16.gmra.mxu2 %vm1463_vm1, %v1848_v11  ;;  %v645_v51 = vsub.f32 %v5314_v25, %v5201_v29 }
 0x4cf   : > { %3772 = vmatmul.msk.bf16.gmra.mxu1 %vm1463_vm1, %v2244_v30  ;;  %v813_v30 = vsel %vm703_vm0, %v793_v3, 0.0 }
 0x4d2   : > { %v1837_v52 = vpop.f32.mrf.mxu2 }
 0x4d4   : > { %v2233_v60 = vpop.f32.mrf.mxu1 }
 0x4da   : > { %v1839_v23 = vpop.f32.mrf.mxu2 }
 0x4db   : > { %v1849_v46 = vpack.c.bf16 %v1839_v23, %v1837_v52  ;;  %v816_v52 = vsel %vm703_vm0, %v794_v7, 0.0  ;;  %v718_v7 = vpop.xlane.xlu1 %717 }
 0x4dc   : > { %v2235_v36 = vpop.f32.mrf.mxu1 }
 0x4dd   : > { %v2245_v59 = vpack.c.bf16 %v2235_v36, %v2233_v60  ;;  %3785 = vmatmul.msk.bf16.gmra.mxu2 %vm1463_vm1, %v1849_v46  ;;  %v663_v46 = vmul.f32 %v5098_v56, %v645_v51 }
 0x4df   : > { %3773 = vmatmul.msk.bf16.gmra.mxu1 %vm1463_vm1, %v2245_v59 }
 0x4e2   : > { %v2366_v33 = vpop.f32.mrf.mxu2 }
 0x4e4   : > { %v2287_v26 = vpop.f32.mrf.mxu1 }
 0x4e5   : > { %v2367_v16 = vadd.f32 %v2366_v33, %v2287_v26 }
 0x4e7   : > { %v2407_v44 = vadd.f32 %v5284_v10, %v2367_v16  ;;  %v679_v16 = vadd.f32 %v663_v46, %v5201_v29 }
 0x4e9   : > { %v5289_v8 = vadd.f32 %v2407_v44, %v5115_v37  ;;  %v5298_v37 = vadd.f32 %v678_v55, %v5276_v54 }
 0x4ea   : > { %v2368_v62 = vpop.f32.mrf.mxu2 }
 0x4eb   : > { %v2439_v45 = vsel %vm703_vm0, %v5289_v8, 0.0  ;;  %v725_v17 = vsel %vm703_vm0, %v5298_v37, 0.0 }
 0x4ec   : > { %v2289_v48 = vpop.f32.mrf.mxu1  ;;  %2440 = vadd.xlane.f32.xlu1 %v2439_v45 }
 0x4ed   : > { %v2369_v35 = vadd.f32 %v2368_v62, %v2289_v48 }
 0x4ef   : > { %v2408_v2 = vadd.f32 %v5284_v10, %v2369_v35 }
 0x4f1   : > { %v5301_v49 = vadd.f32 %v2408_v2, %v5151_v53  ;;  %v5316_v53 = vunpack.c.h.bf16 %v439_v22 }
 0x4f2   : > { %v2371_v38 = vpop.f32.mrf.mxu2 }
 0x4f3   : > { %v2442_v20 = vsel %vm703_vm0, %v5301_v49, 0.0  ;;  %v646_v11 = vsub.f32 %v5316_v53, %v5203_v32 }
 0x4f4   : > { %v2292_v1 = vpop.f32.mrf.mxu1  ;;  %726 = vadd.xlane.f32.xlu1 %v725_v17  ;;  %2443 = vadd.xlane.f32.xlu2 %v2442_v20 }
 0x4f5   : > { %v2372_v15 = vadd.f32 %v2371_v38, %v2292_v1  ;;  %v664_v36 = vmul.f32 %v5098_v56, %v646_v11  ;;  %v763_v11 = vmul.f32 %v5225_v24, %v718_v7 }
 0x4f7   : > { %v2409_v18 = vadd.f32 %v5284_v10, %v2372_v15  ;;  %v680_v63 = vadd.f32 %v664_v36, %v5203_v32 }
 0x4f9   : > { %v5333_v33 = vadd.f32 %v2409_v18, %v5170_v40  ;;  %v5345_v40 = vadd.f32 %v680_v63, %v5316_v53 }
 0x4fa   : > { %v2373_v0 = vpop.f32.mrf.mxu2 }
 0x4fb   : > { %v2445_v62 = vsel %vm703_vm0, %v5333_v33, 0.0  ;;  %v731_v32 = vsel %vm703_vm0, %v5345_v40, 0.0 }
 0x4fc   : > { %v2294_v60 = vpop.f32.mrf.mxu1  ;;  %814 = vadd.xlane.f32.xlu1 %v813_v30  ;;  %817 = vadd.xlane.f32.xlu2 %v816_v52  ;;  %v5378_v52 = vsub.f32 %v5149_v19, %v763_v11 }
 0x4fd   : > { %v2374_v23 = vadd.f32 %v2373_v0, %v2294_v60 }
 0x4ff   : > { %v2410_v59 = vadd.f32 %v5284_v10, %v2374_v23 }
 0x501   : > { %v5336_v12 = vadd.f32 %v2410_v59, %v5092_v58  ;;  %v5348_v58 = vadd.f32 %v679_v16, %v5314_v25  ;;  %v795_v59 = vmul.f32 %v5378_v52, %v5378_v52 }
 0x502   : > { %v2376_v26 = vpop.f32.mrf.mxu2 }
 0x503   : > { %v2448_v44 = vsel %vm703_vm0, %v5336_v12, 0.0  ;;  %v728_v43 = vsel %vm703_vm0, %v5348_v58, 0.0 }
 0x504   : > { %2449 = vadd.xlane.f32.xlu0 %v2448_v44  ;;  %v2297_v55 = vpop.f32.mrf.mxu1  ;;  %2446 = vadd.xlane.f32.xlu2 %v2445_v62 }
 0x505   : > { %v2377_v41 = vadd.f32 %v2376_v26, %v2297_v55 }
 0x507   : > { %v2411_v29 = vadd.f32 %v5284_v10, %v2377_v41 }
 0x509   : > { %v5357_v21 = vadd.f32 %v2411_v29, %v5111_v4 }
 0x50a   : > { %v2378_v45 = vpop.f32.mrf.mxu2 }
 0x50b   : > { %v2451_v22 = vsel %vm703_vm0, %v5357_v21, 0.0 }
 0x50c   : > { %732 = vadd.xlane.f32.xlu0 %v731_v32  ;;  %v2299_v48 = vpop.f32.mrf.mxu1  ;;  %729 = vadd.xlane.f32.xlu2 %v728_v43  ;;  %v721_v32 = vpop.xlane.xlu2 %720 }
 0x50d   : > { %v2379_v35 = vadd.f32 %v2378_v45, %v2299_v48 }
 0x50f   : > { %v2412_v13 = vadd.f32 %v5284_v10, %v2379_v35 }
 0x511   : > { %v5360_v2 = vadd.f32 %v2412_v13, %v5138_v27 }
 0x512   : > { %v2381_v38 = vpop.f32.mrf.mxu2 }
 0x513   : > { %v2454_v17 = vsel %vm703_vm0, %v5360_v2, 0.0 }
 0x514   : > { %2452 = vadd.xlane.f32.xlu0 %v2451_v22  ;;  %v2302_v20 = vpop.f32.mrf.mxu1  ;;  %2455 = vadd.xlane.f32.xlu1 %v2454_v17  ;;  %v5403_v48 = vpop.xlane.xlu2 %808 }
 0x515   : > { %v2382_v1 = vadd.f32 %v2381_v38, %v2302_v20  ;;  %v764_v20 = vmul.f32 %v5225_v24, %v721_v32 }
 0x517   : > { %v2413_v15 = vadd.f32 %v5284_v10, %v2382_v1 }
 0x519   : > { %v5368_v3 = vadd.f32 %v2413_v15, %v5240_v14 }
 0x51a   : > { %v2383_v4 = vpop.f32.mrf.mxu2 }
 0x51b   : > { %v2457_v27 = vsel %vm703_vm0, %v5368_v3, 0.0 }
 0x51c   : > { %v2304_v51 = vpop.f32.mrf.mxu1  ;;  %2458 = vadd.xlane.f32.xlu2 %v2457_v27  ;;  %v5417_v27 = vsub.f32 %v5173_v31, %v764_v20 }
 0x51d   : > { %v2384_v0 = vadd.f32 %v2383_v4, %v2304_v51  ;;  %v5414_v4 = vpop.xlane.xlu0 %811  ;;  %v441_v51 = vld [vmem:[%s4435_s29 + $0x28] sm:$0xff]  }
 0x51f   : > { %v2414_v18 = vadd.f32 %v5284_v10, %v2384_v0 }
 0x521   : > { %v5375_v30 = vadd.f32 %v2414_v18, %v5276_v54  ;;  %v819_v54 = vsel %vm703_vm0, %v795_v59, 0.0  ;;  %v5422_v18 = vunpack.c.h.bf16 %v441_v51 }
 0x522   : > { %v2386_v60 = vpop.f32.mrf.mxu2 }
 0x523   : > { %v2460_v14 = vsel %vm703_vm0, %v5375_v30, 0.0 }
 0x524   : > { %2461 = vadd.xlane.f32.xlu0 %v2460_v14  ;;  %v2307_v23 = vpop.f32.mrf.mxu1 }
 0x525   : > { %v2387_v46 = vadd.f32 %v2386_v60, %v2307_v23  ;;  %v796_v60 = vmul.f32 %v5417_v27, %v5417_v27  ;;  %v648_v23 = vsub.f32 %v5422_v18, %v5207_v5 }
 0x527   : > { %v2415_v36 = vadd.f32 %v5284_v10, %v2387_v46 }
 0x529   : > { %v5386_v26 = vadd.f32 %v2415_v36, %v5314_v25  ;;  %v822_v36 = vsel %vm703_vm0, %v796_v60, 0.0 }
 0x52a   : > { %v2388_v63 = vpop.f32.mrf.mxu2 }
 0x52b   : > { %v2463_v19 = vsel %vm703_vm0, %v5386_v26, 0.0 }
 0x52c   : > { %820 = vadd.xlane.f32.xlu0 %v819_v54  ;;  %2464 = vadd.xlane.f32.xlu1 %v2463_v19  ;;  %v2309_v16 = vpop.f32.mrf.mxu1  ;;  %v724_v54 = vpop.xlane.xlu0 %723  ;;  %v457_v19 = vunpack.c.l.bf16 %v441_v51 }
 0x52d   : > { %v2389_v14 = vadd.f32 %v2388_v63, %v2309_v16  ;;  %v666_v16 = vmul.f32 %v5098_v56, %v648_v23 }
 0x52e   : > { %v647_v32 = vsub.f32 %v457_v19, %v5205_v6 }
 0x52f   : > { %v2416_v46 = vadd.f32 %v5284_v10, %v2389_v14 }
 0x530   : > { %v665_v51 = vmul.f32 %v5098_v56, %v647_v32 }
 0x531   : > { %v5440_v63 = vadd.f32 %v2416_v46, %v5316_v53  ;;  %v765_v53 = vmul.f32 %v5225_v24, %v724_v54 }
 0x532   : > { %v681_v23 = vadd.f32 %v665_v51, %v5205_v6 }
 0x533   : > { %v5465_v46 = vsub.f32 %v5256_v47, %v765_v53 }
 0x535   : > { %v797_v32 = vmul.f32 %v5465_v46, %v5465_v46 }
 0x53c   : > { %v2312_v44 = vpop.f32.mrf.mxu1 }
 0x540   : > { %v2391_v62 = vpop.f32.mrf.mxu2 }
 0x541   : > { %v2392_v14 = vadd.f32 %v2391_v62, %v2312_v44 }
 0x543   : > { %v2417_v44 = vadd.f32 %v5284_v10, %v2392_v14 }
 0x544   : > { %v5391_v55 = vpop.f32.mrf.mxu1 }
 0x548   : > { %v5393_v41 = vpop.f32.mrf.mxu2 }
 0x549   : > { %v2394_v47 = vadd.f32 %v5393_v41, %v5391_v55 }
 0x54c   : > { %v5395_v45 = vpop.f32.mrf.mxu1 }
 0x550   : > { %v5397_v29 = vpop.f32.mrf.mxu2 }
 0x554   : > { %v5399_v25 = vpop.f32.mrf.mxu1 }
 0x558   : > { %v5401_v43 = vpop.f32.mrf.mxu2 }
 0x55c   : > { %v2322_v13 = vpop.f32.mrf.mxu1 }
 0x55f   : > { %v2441_v35 = vpop.xlane.xlu1 %2440 }
 0x560   : > { %v2487_v38 = vmul.f32 %v2441_v35, %v5225_v24  ;;  %v2401_v22 = vpop.f32.mrf.mxu2  ;;  %v682_v35 = vadd.f32 %v666_v16, %v5207_v5  ;;  %v5479_v16 = vadd.f32 %v681_v23, %v457_v19 }
 0x561   : > { %v5406_v17 = vadd.f32 %v2401_v22, %v2322_v13 }
 0x562   : > { %v5410_v1 = vsub.f32 %v5289_v8, %v2487_v38  ;;  %v2466_v38 = vsel %vm703_vm0, %v5440_v63, 0.0 }
 0x564   : > { %v2519_v15 = vmul.f32 %v5410_v1, %v5410_v1 }
 0x566   : > { %v2535_v7 = vsel %vm703_vm0, %v2519_v15, 0.0 }
 0x567   : > { %2536 = vadd.xlane.f32.xlu1 %v2535_v7  ;;  %v2444_v0 = vpop.xlane.xlu2 %2443  ;;  %v727_v13 = vpop.xlane.xlu1 %726 }
 0x568   : > { %v2488_v11 = vmul.f32 %v2444_v0, %v5225_v24 }
 0x56a   : > { %v5425_v8 = vsub.f32 %v5301_v49, %v2488_v11  ;;  %v5457_v11 = vadd.f32 %v682_v35, %v5422_v18  ;;  %v766_v35 = vmul.f32 %v5225_v24, %v727_v13 }
 0x56c   : > { %v2520_v31 = vmul.f32 %v5425_v8, %v5425_v8  ;;  %v5493_v55 = vsub.f32 %v5298_v37, %v766_v35 }
 0x56e   : > { %v2538_v59 = vsel %vm703_vm0, %v2520_v31, 0.0 }
 0x56f   : > { %823 = vadd.xlane.f32.xlu1 %v822_v36  ;;  %2539 = vadd.xlane.f32.xlu2 %v2538_v59  ;;  %v5436_v49 = vpop.xlane.xlu2 %817  ;;  %v443_v59 = vld [vmem:[%s4435_s29 + $0x30] sm:$0xff]   ;;  %v5473_v54 = vpop.xlane.xlu1 %814 }
 0x570   : > { %v5475_v6 = vunpack.c.h.bf16 %v443_v59  ;;  %v459_v23 = vunpack.c.l.bf16 %v443_v59 }
 0x577   : > { %v2450_v22 = vpop.xlane.xlu0 %2449  ;;  %2467 = vadd.xlane.f32.xlu2 %v2466_v38  ;;  %v2447_v20 = vpop.xlane.xlu2 %2446  ;;  %v5484_v38 = vadd.f32 %v2417_v44, %v457_v19 }
 0x578   : > { %v2490_v15 = vmul.f32 %v2450_v22, %v5225_v24  ;;  %v2489_v7 = vmul.f32 %v2447_v20, %v5225_v24  ;;  %v650_v22 = vsub.f32 %v5475_v6, %v5213_v28  ;;  %v2418_v20 = vadd.f32 %v5284_v10, %v2394_v47 }
 0x579   : > { %v2469_v19 = vsel %vm703_vm0, %v5484_v38, 0.0 }
 0x57a   : > { %v5451_v0 = vsub.f32 %v5336_v12, %v2490_v15  ;;  %v5454_v5 = vsub.f32 %v5333_v33, %v2489_v7  ;;  %v737_v33 = vsel %vm703_vm0, %v5457_v11, 0.0  ;;  %v734_v15 = vsel %vm703_vm0, %v5479_v16, 0.0 }
 0x57b   : > { %v825_v7 = vsel %vm703_vm0, %v797_v32, 0.0  ;;  %v668_v14 = vmul.f32 %v5098_v56, %v650_v22  ;;  %v5505_v37 = vadd.f32 %v2418_v20, %v5422_v18  ;;  %v649_v18 = vsub.f32 %v459_v23, %v5209_v57 }
 0x57c   : > { %v2522_v60 = vmul.f32 %v5451_v0, %v5451_v0  ;;  %v2521_v31 = vmul.f32 %v5454_v5, %v5454_v5 }
 0x57d   : > { %v684_v44 = vadd.f32 %v668_v14, %v5213_v28  ;;  %v667_v20 = vmul.f32 %v5098_v56, %v649_v18 }
 0x57e   : > { %v2544_v12 = vsel %vm703_vm0, %v2522_v60, 0.0  ;;  %v2541_v36 = vsel %vm703_vm0, %v2521_v31, 0.0  ;;  %v2397_v60 = vadd.f32 %v5397_v29, %v5395_v45 }
 0x57f   : > { %v733_v62 = vpop.xlane.xlu0 %732  ;;  %2545 = vadd.xlane.f32.xlu1 %v2544_v12  ;;  %738 = vadd.xlane.f32.xlu2 %v737_v33  ;;  %v730_v41 = vpop.xlane.xlu2 %729  ;;  %v798_v33 = vmul.f32 %v5493_v55, %v5493_v55  ;;  %v5524_v35 = vadd.f32 %v684_v44, %v5475_v6 }
 0x580   : > { %2542 = vadd.xlane.f32.xlu0 %v2541_v36  ;;  %v2419_v45 = vadd.f32 %v5284_v10, %v2397_v60 }
 0x581   : > { %v828_v47 = vsel %vm703_vm0, %v798_v33, 0.0  ;;  %v767_v33 = vmul.f32 %v5225_v24, %v730_v41 }
 0x582   : > { %v5526_v22 = vadd.f32 %v2419_v45, %v459_v23  ;;  %v2399_v45 = vadd.f32 %v5401_v43, %v5399_v25 }
 0x584   : > { %v2420_v43 = vadd.f32 %v5284_v10, %v2399_v45 }
 0x587   : > { %v2453_v51 = vpop.xlane.xlu0 %2452  ;;  %735 = vadd.xlane.f32.xlu1 %v734_v15  ;;  %826 = vadd.xlane.f32.xlu2 %v825_v7  ;;  %v2456_v53 = vpop.xlane.xlu1 %2455 }
 0x588   : > { %v2491_v13 = vmul.f32 %v2453_v51, %v5225_v24  ;;  %2470 = vadd.xlane.f32.xlu0 %v2469_v19  ;;  %v2492_v12 = vmul.f32 %v2456_v53, %v5225_v24  ;;  %v743_v51 = vsel %vm703_vm0, %v5524_v35, 0.0  ;;  %v2475_v19 = vsel %vm703_vm0, %v5526_v22, 0.0 }
 0x58a   : > { %v5502_v31 = vsub.f32 %v5357_v21, %v2491_v13  ;;  %v2472_v21 = vsel %vm703_vm0, %v5505_v37, 0.0  ;;  %v5519_v59 = vsub.f32 %v5360_v2, %v2492_v12  ;;  %v445_v2 = vld [vmem:[%s4435_s29 + $0x38] sm:$0xff]   ;;  %v683_v13 = vadd.f32 %v667_v20, %v5209_v57 }
 0x58b   : > { %v5542_v12 = vunpack.c.l.bf16 %v445_v2  ;;  %v462_v44 = vunpack.c.h.bf16 %v445_v2  ;;  %v5578_v20 = vadd.f32 %v2420_v43, %v5475_v6 }
 0x58c   : > { %v2523_v36 = vmul.f32 %v5502_v31, %v5502_v31  ;;  %v2524_v15 = vmul.f32 %v5519_v59, %v5519_v59 }
 0x58d   : > { %v652_v25 = vsub.f32 %v462_v44, %v5223_v34 }
 0x58e   : > { %v2547_v29 = vsel %vm703_vm0, %v2523_v36, 0.0  ;;  %v2550_v14 = vsel %vm703_vm0, %v2524_v15, 0.0 }
 0x58f   : > { %2473 = vadd.xlane.f32.xlu1 %v2472_v21  ;;  %2548 = vadd.xlane.f32.xlu2 %v2547_v29  ;;  %v2459_v32 = vpop.xlane.xlu2 %2458  ;;  %v5553_v21 = vadd.f32 %v683_v13, %v459_v23  ;;  %v2403_v13 = vpop.f32.mrf.mxu2 }
 0x590   : > { %829 = vadd.xlane.f32.xlu0 %v828_v47  ;;  %v2493_v28 = vmul.f32 %v2459_v32, %v5225_v24 }
 0x591   : > { %v740_v23 = vsel %vm703_vm0, %v5553_v21, 0.0 }
 0x592   : > { %v5533_v7 = vsub.f32 %v5368_v3, %v2493_v28  ;;  %v768_v3 = vmul.f32 %v5225_v24, %v733_v62  ;;  %v651_v62 = vsub.f32 %v5542_v12, %v5218_v9  ;;  %v670_v28 = vmul.f32 %v5098_v56, %v652_v25 }
 0x593   : > { %v856_v25 = vmul.f32 %v5414_v4, %v5225_v24 }
 0x594   : > { %v2525_v57 = vmul.f32 %v5533_v7, %v5533_v7  ;;  %v5560_v41 = vsub.f32 %v5345_v40, %v768_v3  ;;  %v669_v40 = vmul.f32 %v5098_v56, %v651_v62  ;;  %v2324_v56 = vpop.f32.mrf.mxu1 }
 0x596   : > { %v2553_v47 = vsel %vm703_vm0, %v2525_v57, 0.0  ;;  %v685_v15 = vadd.f32 %v669_v40, %v5218_v9 }
 0x597   : > { %v2462_v53 = vpop.xlane.xlu0 %2461  ;;  %744 = vadd.xlane.f32.xlu1 %v743_v51  ;;  %2476 = vadd.xlane.f32.xlu2 %v2475_v19  ;;  %v686_v19 = vadd.f32 %v670_v28, %v5223_v34  ;;  %v857_v28 = vmul.f32 %v5473_v54, %v5225_v24  ;;  %v3853_v54 = vld [vmem:[#allocation7 + $0x8] sm:$0xff] }
 0x598   : > { %v2494_v60 = vmul.f32 %v2462_v53, %v5225_v24  ;;  %2551 = vadd.xlane.f32.xlu0 %v2550_v14  ;;  %v2478_v53 = vsel %vm703_vm0, %v5578_v20, 0.0  ;;  %v5587_v6 = vadd.f32 %v685_v15, %v5542_v12  ;;  %v858_v15 = vmul.f32 %v5436_v49, %v5225_v24  ;;  %2928 = vmatpush.bf16.msra.mxu3 %v3853_v54 }
 0x599   : > { %v5590_v3 = vadd.f32 %v686_v19, %v462_v44 }
 0x59a   : > { %v5547_v36 = vsub.f32 %v5375_v30, %v2494_v60  ;;  %v5563_v30 = vsub.f32 %v5348_v58, %v767_v33  ;;  %v800_v58 = vmul.f32 %v5560_v41, %v5560_v41  ;;  %v2404_v60 = vadd.f32 %v2403_v13, %v2324_v56 }
 0x59b   : > { %v746_v34 = vsel %vm703_vm0, %v5587_v6, 0.0  ;;  %v749_v45 = vsel %vm703_vm0, %v5590_v3, 0.0  ;;  %v5617_v19 = vadd.f32 1e-12, %v858_v15 }
 0x59c   : > { %v2526_v29 = vmul.f32 %v5547_v36, %v5547_v36  ;;  %v799_v32 = vmul.f32 %v5563_v30, %v5563_v30  ;;  %v834_v2 = vsel %vm703_vm0, %v800_v58, 0.0  ;;  %v2422_v33 = vadd.f32 %v5284_v10, %v2404_v60 }
 0x59e   : > { %v2556_v18 = vsel %vm703_vm0, %v2526_v29, 0.0  ;;  %v831_v51 = vsel %vm703_vm0, %v799_v32, 0.0  ;;  %v5600_v29 = vadd.f32 %v2422_v33, %v462_v44 }
 0x59f   : > { %2557 = vadd.xlane.f32.xlu2 %v2556_v18  ;;  %2554 = vadd.xlane.f32.xlu1 %v2553_v47  ;;  %v2465_v14 = vpop.xlane.xlu1 %2464  ;;  %v821_v49 = vpop.xlane.xlu0 %820 }
 0x5a0   : > { %741 = vadd.xlane.f32.xlu0 %v740_v23  ;;  %v2495_v9 = vmul.f32 %v2465_v14, %v5225_v24  ;;  %v2484_v18 = vsel %vm703_vm0, %v5600_v29, 0.0  ;;  %v872_v23 = vadd.f32 1e-12, %v856_v25 }
 0x5a2   : > { %v5596_v57 = vsub.f32 %v5386_v26, %v2495_v9  ;;  %v855_v26 = vmul.f32 %v5403_v48, %v5225_v24  ;;  %v5615_v48 = vadd.f32 1e-12, %v857_v28  ;;  %vm903_vm7 = vweird.f32 %v872_v23 }
 0x5a4   : > { %v2527_v62 = vmul.f32 %v5596_v57, %v5596_v57  ;;  %v871_v43 = vadd.f32 1e-12, %v855_v26  ;;  %vm913_vm14 = vweird.f32 %v5615_v48 }
 0x5a6   : > { %v2559_v47 = vsel %vm703_vm0, %v2527_v62, 0.0  ;;  %4061 = vrsqrt.f32 %v871_v43  ;;  %v859_v62 = vmul.f32 %v821_v49, %v5225_v24  ;;  %vm893_vm5 = vweird.f32 %v871_v43 }
 0x5a7   : > { %835 = vadd.xlane.f32.xlu2 %v834_v2  ;;  %832 = vadd.xlane.f32.xlu1 %v831_v51  ;;  %4063 = vrsqrt.f32 %v872_v23 }
 0x5a8   : > { %2479 = vadd.xlane.f32.xlu0 %v2478_v53  ;;  %4065 = vrsqrt.f32 %v5615_v48 }
 0x5a9   : > { %4067 = vrsqrt.f32 %v5617_v19 }
 0x5ac   : > { %v4062_v44 = vpop.eup %4061 }
 0x5ad   : > { %v4064_v40 = vpop.eup %4063  ;;  %v888_v58 = vmul.f32 %v4062_v44, %v871_v43  ;;  %vm894_vm3 = vweird.f32 %v4062_v44 }
 0x5ae   : > { %v898_v32 = vmul.f32 %v4064_v40, %v872_v23  ;;  %v5622_v33 = vpop.eup %4065  ;;  %vm904_vm4 = vweird.f32 %v4064_v40  ;;  %vm895_vm6 = vmor %vm893_vm5, %vm894_vm3  ;;  %v5642_v23 = vld [vmem:[%s6548_s3 + $0x1] ss:$0 sm:$0xff]  ;;  %vm923_vm3 = vweird.f32 %v5617_v19 }
 0x5af   : > { %747 = vadd.xlane.f32.xlu2 %v746_v34  ;;  %v889_v2 = vmul.f32 %v4062_v44, %v888_v58  ;;  %v3852_v34 = vld [vmem:[#allocation7] sm:$0xff]  ;;  %v908_v58 = vmul.f32 %v5622_v33, %v5615_v48  ;;  %vm905_vm8 = vmor %vm903_vm7, %vm904_vm4  ;;  %vm914_vm12 = vweird.f32 %v5622_v33 }
 0x5b0   : > { %750 = vadd.xlane.f32.xlu0 %v749_v45  ;;  %v899_v51 = vmul.f32 %v4064_v40, %v898_v32  ;;  %2929 = vmatpush.bf16.msra.mxu3 %v3852_v34  ;;  %vm5703_vm1 = vmor %vm913_vm14, %vm914_vm12 }
 0x5b1   : > { %v890_v4 = vmul.f32 0.5, %v889_v2  ;;  %v909_v43 = vmul.f32 %v5622_v33, %v908_v58 }
 0x5b2   : > { %v900_v53 = vmul.f32 0.5, %v899_v51 }
 0x5b3   : > { %v891_v60 = vsub.f32 1.5, %v890_v4  ;;  %v5634_v4 = vadd.f32 1e-12, %v859_v62 }
 0x5b4   : > { %v901_v9 = vsub.f32 1.5, %v900_v53 }
 0x5b5   : > { %v892_v45 = vmul.f32 %v4062_v44, %v891_v60 }
 0x5b6   : > { %v902_v26 = vmul.f32 %v4064_v40, %v901_v9 }
 0x5b7   : > { %2485 = vadd.xlane.f32.xlu2 %v2484_v18  ;;  %v896_v2 = vsel %vm895_vm6, %v4062_v44, %v892_v45  ;;  %v910_v45 = vmul.f32 0.5, %v909_v43 }
 0x5b8   : > { %2560 = vadd.xlane.f32.xlu0 %v2559_v47  ;;  %v5625_v47 = vpop.eup %4067  ;;  %v906_v53 = vsel %vm905_vm8, %v4064_v40, %v902_v26  ;;  %v1047_v44 = vmul.f32 %v896_v2, %v5229_v39 }
 0x5b9   : > { %v918_v51 = vmul.f32 %v5625_v47, %v5617_v19  ;;  %v1048_v60 = vmul.f32 %v906_v53, %v5249_v42  ;;  %v5658_v42 = vld [vmem:[%s6548_s3 + $0x2] ss:$0 sm:$0xff]  ;;  %v911_v43 = vsub.f32 1.5, %v910_v45  ;;  %vm924_vm15 = vweird.f32 %v5625_v47 }
 0x5ba   : > { %v1064_v26 = vmul.f32 %v5642_v23, %v1047_v44  ;;  %vm5726_vm5 = vmor %vm923_vm3, %vm924_vm15 }
 0x5bb   : > { %v919_v9 = vmul.f32 %v5625_v47, %v918_v51  ;;  %v1065_v58 = vmul.f32 %v5642_v23, %v1048_v60  ;;  %v2421_v51 = vadd.f32 %v5284_v10, %v5406_v17 }
 0x5bc   : > { %v1081_v44 = vadd.f32 %v5658_v42, %v1064_v26 }
 0x5bd   : > { %v1082_v60 = vadd.f32 %v5658_v42, %v1065_v58  ;;  %v5690_v58 = vld [vmem:[%s6548_s3 + $0x8] ss:$0 sm:$0xff] }
 0x5da   : > { %v2537_v13 = vpop.xlane.xlu1 %2536 }
 0x5db   : > { %v2583_v14 = vmul.f32 %v2537_v13, %v5225_v24 }
 0x5dd   : > { %v2599_v56 = vadd.f32 1e-12, %v2583_v14 }
 0x5df   : > { %4069 = vrsqrt.f32 %v2599_v56  ;;  %vm2621_vm10 = vweird.f32 %v2599_v56 }
 0x5e2   : > { %v2540_v18 = vpop.xlane.xlu2 %2539  ;;  %v824_v28 = vpop.xlane.xlu1 %823 }
 0x5e3   : > { %v2584_v25 = vmul.f32 %v2540_v18, %v5225_v24  ;;  %v860_v54 = vmul.f32 %v824_v28, %v5225_v24  ;;  %v920_v28 = vmul.f32 0.5, %v919_v9 }
 0x5e5   : > { %v4070_v32 = vpop.eup %4069  ;;  %v5630_v15 = vadd.f32 1e-12, %v2584_v25  ;;  %v5649_v18 = vadd.f32 1e-12, %v860_v54  ;;  %v5672_v54 = vld [vmem:[%s6548_s3 + $0x7] ss:$0 sm:$0xff] }
 0x5e6   : > { %v2616_v13 = vmul.f32 %v4070_v32, %v2599_v56  ;;  %vm2622_vm9 = vweird.f32 %v4070_v32  ;;  %v921_v9 = vsub.f32 1.5, %v920_v28 }
 0x5e7   : > { %4071 = vrsqrt.f32 %v5630_v15  ;;  %vm2623_vm11 = vmor %vm2621_vm10, %vm2622_vm9  ;;  %vm2631_vm2 = vweird.f32 %v5630_v15 }
 0x5e8   : > { %v2617_v14 = vmul.f32 %v4070_v32, %v2616_v13  ;;  %4073 = vrsqrt.f32 %v5634_v4 }
 0x5e9   : > { %4075 = vrsqrt.f32 %v5649_v18 }
 0x5ea   : > { %v2618_v40 = vmul.f32 0.5, %v2617_v14  ;;  %v2468_v49 = vpop.xlane.xlu2 %2467 }
 0x5eb   : > { %v2496_v34 = vmul.f32 %v2468_v49, %v5225_v24 }
 0x5ec   : > { %v2619_v62 = vsub.f32 1.5, %v2618_v40 }
 0x5ed   : > { %v5653_v25 = vsub.f32 %v5440_v63, %v2496_v34  ;;  %v4072_v39 = vpop.eup %4071 }
 0x5ee   : > { %v2620_v2 = vmul.f32 %v4070_v32, %v2619_v62  ;;  %v2626_v13 = vmul.f32 %v4072_v39, %v5630_v15  ;;  %v5666_v53 = vpop.eup %4073  ;;  %vm2632_vm13 = vweird.f32 %v4072_v39 }
 0x5ef   : > { %v2528_v63 = vmul.f32 %v5653_v25, %v5653_v25  ;;  %v928_v49 = vmul.f32 %v5666_v53, %v5634_v4  ;;  %vm2633_vm4 = vmor %vm2631_vm2, %vm2632_vm13  ;;  %vm934_vm8 = vweird.f32 %v5666_v53  ;;  %vm933_vm13 = vweird.f32 %v5634_v4 }
 0x5f0   : > { %v2624_v14 = vsel %vm2623_vm11, %v4070_v32, %v2620_v2  ;;  %v2627_v10 = vmul.f32 %v4072_v39, %v2626_v13  ;;  %v912_v2 = vmul.f32 %v5622_v33, %v911_v43  ;;  %v922_v43 = vmul.f32 %v5625_v47, %v921_v9  ;;  %vm5800_vm14 = vmor %vm933_vm13, %vm934_vm8 }
 0x5f1   : > { %v2775_v56 = vmul.f32 %v2624_v14, %v5410_v1  ;;  %v2562_v17 = vsel %vm703_vm0, %v2528_v63, 0.0  ;;  %v5682_v1 = vadd.f32 %v2421_v51, %v5542_v12  ;;  %v5696_v51 = vpop.eup %4075 }
 0x5f2   : > { %v2546_v40 = vpop.xlane.xlu1 %2545  ;;  %2563 = vadd.xlane.f32.xlu1 %v2562_v17  ;;  %v739_v32 = vpop.xlane.xlu2 %738  ;;  %v2628_v34 = vmul.f32 0.5, %v2627_v10  ;;  %v916_v48 = vsel %vm5703_vm1, %v5622_v33, %v912_v2  ;;  %v938_v15 = vmul.f32 %v5696_v51, %v5649_v18  ;;  %vm944_vm15 = vweird.f32 %v5696_v51 }
 0x5f3   : > { %v2586_v45 = vmul.f32 %v2546_v40, %v5225_v24  ;;  %v2543_v62 = vpop.xlane.xlu0 %2542  ;;  %v2792_v28 = vmul.f32 %v5672_v54, %v2775_v56  ;;  %v770_v12 = vmul.f32 %v5225_v24, %v739_v32  ;;  %v929_v56 = vmul.f32 %v5666_v53, %v928_v49 }
 0x5f4   : > { %v2585_v26 = vmul.f32 %v2543_v62, %v5225_v24  ;;  %v2629_v13 = vsub.f32 1.5, %v2628_v34  ;;  %v2481_v9 = vsel %vm703_vm0, %v5682_v1, 0.0  ;;  %v1049_v62 = vmul.f32 %v916_v48, %v5308_v50 }
 0x5f5   : > { %v5693_v63 = vadd.f32 1e-12, %v2586_v45  ;;  %v2809_v40 = vadd.f32 %v5690_v58, %v2792_v28  ;;  %v5722_v49 = vsub.f32 %v5457_v11, %v770_v12  ;;  %v930_v2 = vmul.f32 0.5, %v929_v56 }
 0x5f6   : > { %v5701_v14 = vadd.f32 1e-12, %v2585_v26  ;;  %v2630_v17 = vmul.f32 %v4072_v39, %v2629_v13  ;;  %v2825_v28 = vmul.f32 0.7, %v1081_v44  ;;  %v2826_v13 = vmul.f32 0.7, %v1082_v60 }
 0x5f7   : > { %4077 = vrsqrt.f32 %v5693_v63  ;;  %6562 = vst [vmem:[#allocation12_spill] sm:$0xff] %v5722_v49  ;;  %vm2651_vm9 = vweird.f32 %v5693_v63  ;;  %vm943_vm1 = vweird.f32 %v5649_v18 }
 0x5f8   : > { %4079 = vrsqrt.f32 %v5701_v14  ;;  %v2634_v32 = vsel %vm2633_vm4, %v4072_v39, %v2630_v17  ;;  %v926_v39 = vsel %vm5726_vm5, %v5625_v47, %v922_v43  ;;  %v2841_v17 = vmul.f32 0.3, %v2809_v40  ;;  %vm5825_vm2 = vmor %vm943_vm1, %vm944_vm15 }
 0x5f9   : > { %v2776_v33 = vmul.f32 %v2634_v32, %v5425_v8  ;;  %v802_v47 = vmul.f32 %v5722_v49, %v5722_v49  ;;  %v1050_v56 = vmul.f32 %v926_v39, %v5305_v61  ;;  %v1066_v40 = vmul.f32 %v5642_v23, %v1049_v62 }
 0x5fa   : > { %v736_v34 = vpop.xlane.xlu1 %735  ;;  %2482 = vadd.xlane.f32.xlu1 %v2481_v9  ;;  %v827_v45 = vpop.xlane.xlu2 %826  ;;  %v939_v9 = vmul.f32 %v5696_v51, %v938_v15  ;;  %v931_v32 = vsub.f32 1.5, %v930_v2  ;;  %v5757_v39 = vadd.f32 %v2841_v17, %v2825_v28  ;;  %vm2641_vm11 = vweird.f32 %v5701_v14 }
 0x5fb   : > { %v769_v11 = vmul.f32 %v5225_v24, %v736_v34  ;;  %v2471_v26 = vpop.xlane.xlu0 %2470  ;;  %v2793_v12 = vmul.f32 %v5672_v54, %v2776_v33 }
 0x5fc   : > { %v2497_v10 = vmul.f32 %v2471_v26, %v5225_v24  ;;  %v840_v26 = vsel %vm703_vm0, %v802_v47, 0.0 }
 0x5fd   : > { %v4078_v8 = vpop.eup %4077  ;;  %v5740_v50 = vsub.f32 %v5479_v16, %v769_v11  ;;  %v2810_v44 = vadd.f32 %v5690_v58, %v2793_v12  ;;  %v861_v16 = vmul.f32 %v827_v45, %v5225_v24  ;;  %v940_v11 = vmul.f32 0.5, %v939_v9 }
 0x5fe   : > { %v4080_v43 = vpop.eup %4079  ;;  %v2646_v60 = vmul.f32 %v4078_v8, %v5693_v63  ;;  %v5748_v48 = vsub.f32 %v5484_v38, %v2497_v10  ;;  %vm2652_vm6 = vweird.f32 %v4078_v8 }
 0x5ff   : > { %v2636_v15 = vmul.f32 %v4080_v43, %v5701_v14  ;;  %v2842_v19 = vmul.f32 0.3, %v2810_v44  ;;  %v801_v34 = vmul.f32 %v5740_v50, %v5740_v50  ;;  %v5764_v49 = vadd.f32 1e-12, %v861_v16  ;;  %vm2653_vm10 = vmor %vm2651_vm9, %vm2652_vm6 }
 0x600   : > { %v2647_v33 = vmul.f32 %v4078_v8, %v2646_v60  ;;  %v2529_v61 = vmul.f32 %v5748_v48, %v5748_v48  ;;  %vm2642_vm7 = vweird.f32 %v4080_v43 }
 0x601   : > { %v2637_v38 = vmul.f32 %v4080_v43, %v2636_v15  ;;  %v5760_v62 = vadd.f32 %v2842_v19, %v2826_v13  ;;  %v837_v45 = vsel %vm703_vm0, %v801_v34, 0.0  ;;  %v1067_v34 = vmul.f32 %v5642_v23, %v1050_v56  ;;  %vm2643_vm12 = vmor %vm2641_vm11, %vm2642_vm7 }
 0x602   : > { %v2648_v2 = vmul.f32 0.5, %v2647_v33  ;;  %v2474_v12 = vpop.xlane.xlu1 %2473  ;;  %v2565_v10 = vsel %vm703_vm0, %v2529_v61, 0.0  ;;  %841 = vadd.xlane.f32.xlu1 %v840_v26  ;;  %v2549_v44 = vpop.xlane.xlu2 %2548  ;;  %838 = vadd.xlane.f32.xlu0 %v837_v45  ;;  %v932_v26 = vmul.f32 %v5666_v53, %v931_v32  ;;  %vm953_vm8 = vweird.f32 %v5764_v49 }
 0x603   : > { %v2638_v60 = vmul.f32 0.5, %v2637_v38  ;;  %v2498_v28 = vmul.f32 %v2474_v12, %v5225_v24  ;;  %2566 = vadd.xlane.f32.xlu2 %v2565_v10  ;;  %v830_v17 = vpop.xlane.xlu0 %829  ;;  %v2587_v9 = vmul.f32 %v2549_v44, %v5225_v24  ;;  %v2873_v15 = vpack.c.bf16 %v5760_v62, %v5757_v39 }
 0x604   : > { %v2649_v13 = vsub.f32 1.5, %v2648_v2  ;;  %v862_v47 = vmul.f32 %v830_v17, %v5225_v24  ;;  %v941_v2 = vsub.f32 1.5, %v940_v11  ;;  %v1084_v32 = vadd.f32 %v5658_v42, %v1067_v34 }
 0x605   : > { %v2639_v19 = vsub.f32 1.5, %v2638_v60  ;;  %v5772_v33 = vsub.f32 %v5505_v37, %v2498_v28  ;;  %v5774_v16 = vadd.f32 1e-12, %v2587_v9  ;;  %3794 = vmatmul.msk.bf16.vlgmr.msra.gmra.mxu3 %vm703_vm0, %v2873_v15  ;;  %v1083_v28 = vadd.f32 %v5658_v42, %v1066_v40 }
 0x606   : > { %v2650_v61 = vmul.f32 %v4078_v8, %v2649_v13  ;;  %v5786_v12 = vadd.f32 1e-12, %v862_v47  ;;  %v942_v40 = vmul.f32 %v5696_v51, %v941_v2  ;;  %v936_v9 = vsel %vm5800_vm14, %v5666_v53, %v932_v26 }
 0x607   : > { %v2640_v38 = vmul.f32 %v4080_v43, %v2639_v19  ;;  %4081 = vrsqrt.f32 %v5774_v16  ;;  %v2530_v37 = vmul.f32 %v5772_v33, %v5772_v33  ;;  %v2827_v26 = vmul.f32 0.7, %v1083_v28 }
 0x608   : > { %v2654_v56 = vsel %vm2653_vm10, %v4078_v8, %v2650_v61  ;;  %4083 = vrsqrt.f32 %v5764_v49  ;;  %v946_v18 = vsel %vm5825_vm2, %v5696_v51, %v942_v40  ;;  %v1051_v2 = vmul.f32 %v936_v9, %v5378_v52 }
 0x609   : > { %v2778_v63 = vmul.f32 %v2654_v56, %v5451_v0  ;;  %v2644_v45 = vsel %vm2643_vm12, %v4080_v43, %v2640_v38  ;;  %v2568_v14 = vsel %vm703_vm0, %v2530_v37, 0.0  ;;  %4085 = vrsqrt.f32 %v5786_v12 }
 0x60a   : > { %v2777_v10 = vmul.f32 %v2644_v45, %v5454_v5  ;;  %v745_v44 = vpop.xlane.xlu1 %744  ;;  %v2477_v60 = vpop.xlane.xlu2 %2476  ;;  %2569 = vadd.xlane.f32.xlu0 %v2568_v14  ;;  %v2828_v45 = vmul.f32 0.7, %v1084_v32  ;;  %v1052_v28 = vmul.f32 %v946_v18, %v5417_v27  ;;  %vm2661_vm3 = vweird.f32 %v5774_v16 }
 0x60b   : > { %v2795_v8 = vmul.f32 %v5672_v54, %v2778_v63  ;;  %v772_v11 = vmul.f32 %v5225_v24, %v745_v44  ;;  %v2552_v0 = vpop.xlane.xlu0 %2551  ;;  %v2499_v43 = vmul.f32 %v2477_v60, %v5225_v24  ;;  %vm963_vm10 = vweird.f32 %v5786_v12 }
 0x60c   : > { %v2588_v4 = vmul.f32 %v2552_v0, %v5225_v24  ;;  %v2794_v15 = vmul.f32 %v5672_v54, %v2777_v10 }
 0x60d   : > { %v4082_v17 = vpop.eup %4081  ;;  %v5813_v13 = vsub.f32 %v5524_v35, %v772_v11  ;;  %v5816_v47 = vsub.f32 %v5526_v22, %v2499_v43  ;;  %v2812_v61 = vadd.f32 %v5690_v58, %v2795_v8 }
 0x60e   : > { %v2656_v19 = vmul.f32 %v4082_v17, %v5774_v16  ;;  %v5820_v34 = vadd.f32 1e-12, %v2588_v4  ;;  %v5823_v38 = vpop.eup %4083  ;;  %v2811_v8 = vadd.f32 %v5690_v58, %v2794_v15  ;;  %vm2662_vm4 = vweird.f32 %v4082_v17 }
 0x60f   : > { %v804_v35 = vmul.f32 %v5813_v13, %v5813_v13  ;;  %v2531_v22 = vmul.f32 %v5816_v47, %v5816_v47  ;;  %v5840_v14 = vpop.eup %4085  ;;  %v948_v10 = vmul.f32 %v5823_v38, %v5764_v49  ;;  %v2844_v11 = vmul.f32 0.3, %v2812_v61  ;;  %vm2663_vm5 = vmor %vm2661_vm3, %vm2662_vm4 }
 0x610   : > { %v2657_v37 = vmul.f32 %v4082_v17, %v2656_v19  ;;  %4087 = vrsqrt.f32 %v5820_v34  ;;  %v2843_v40 = vmul.f32 0.3, %v2811_v8  ;;  %v958_v4 = vmul.f32 %v5840_v14, %v5786_v12 }
 0x611   : > { %v846_v56 = vsel %vm703_vm0, %v804_v35, 0.0  ;;  %v2571_v63 = vsel %vm703_vm0, %v2531_v22, 0.0  ;;  %v5856_v27 = vadd.f32 %v2844_v11, %v2828_v45  ;;  %v949_v61 = vmul.f32 %v5823_v38, %v948_v10 }
 0x612   : > { %v2658_v44 = vmul.f32 0.5, %v2657_v37  ;;  %847 = vadd.xlane.f32.xlu2 %v846_v56  ;;  %v2555_v60 = vpop.xlane.xlu1 %2554  ;;  %v2558_v51 = vpop.xlane.xlu2 %2557  ;;  %2572 = vadd.xlane.f32.xlu0 %v2571_v63  ;;  %v5862_v22 = vadd.f32 %v2843_v40, %v2827_v26  ;;  %v1068_v56 = vmul.f32 %v5642_v23, %v1051_v2  ;;  %v959_v63 = vmul.f32 %v5840_v14, %v958_v4 }
 0x613   : > { %v742_v52 = vpop.xlane.xlu0 %741  ;;  %v2589_v0 = vmul.f32 %v2555_v60, %v5225_v24  ;;  %v2590_v32 = vmul.f32 %v2558_v51, %v5225_v24  ;;  %v1069_v26 = vmul.f32 %v5642_v23, %v1052_v28  ;;  %v950_v10 = vmul.f32 0.5, %v949_v61 }
 0x614   : > { %v2659_v43 = vsub.f32 1.5, %v2658_v44  ;;  %v771_v5 = vmul.f32 %v5225_v24, %v742_v52  ;;  %v960_v52 = vmul.f32 0.5, %v959_v63  ;;  %vm2671_vm7 = vweird.f32 %v5820_v34 }
 0x615   : > { %v5852_v9 = vadd.f32 1e-12, %v2589_v0  ;;  %v5854_v15 = vadd.f32 1e-12, %v2590_v32  ;;  %v1085_v0 = vadd.f32 %v5658_v42, %v1068_v56  ;;  %v1086_v40 = vadd.f32 %v5658_v42, %v1069_v26 }
 0x616   : > { %v4088_v19 = vpop.eup %4087  ;;  %v2660_v53 = vmul.f32 %v4082_v17, %v2659_v43  ;;  %v5860_v35 = vsub.f32 %v5553_v21, %v771_v5  ;;  %v2874_v21 = vpack.c.bf16 %v5856_v27, %v5862_v22  ;;  %v951_v43 = vsub.f32 1.5, %v950_v10 }
 0x617   : > { %v2666_v18 = vmul.f32 %v4088_v19, %v5820_v34  ;;  %4089 = vrsqrt.f32 %v5852_v9  ;;  %vm2672_vm6 = vweird.f32 %v4088_v19  ;;  %vm954_vm9 = vweird.f32 %v5823_v38 }
 0x618   : > { %v2664_v37 = vsel %vm2663_vm5, %v4082_v17, %v2660_v53  ;;  %4091 = vrsqrt.f32 %v5854_v15  ;;  %v803_v16 = vmul.f32 %v5860_v35, %v5860_v35  ;;  %3795 = vmatmul.msk.bf16.gmra.mxu3 %vm703_vm0, %v2874_v21  ;;  %vm2673_vm11 = vmor %vm2671_vm7, %vm2672_vm6  ;;  %v952_v34 = vmul.f32 %v5823_v38, %v951_v43 }
 0x619   : > { %v2667_v45 = vmul.f32 %v4088_v19, %v2666_v18  ;;  %v2779_v17 = vmul.f32 %v2664_v37, %v5502_v31  ;;  %v961_v18 = vsub.f32 1.5, %v960_v52  ;;  %vm964_vm12 = vweird.f32 %v5840_v14  ;;  %vm5914_vm14 = vmor %vm953_vm8, %vm954_vm9 }
 0x61a   : > { %v5876_v44 = vpop.xlane.xlu2 %835  ;;  %v843_v8 = vsel %vm703_vm0, %v803_v16, 0.0  ;;  %vm5926_vm1 = vmor %vm963_vm10, %vm964_vm12  ;;  %vm2681_vm2 = vweird.f32 %v5852_v9  ;;  %vm2691_vm4 = vweird.f32 %v5854_v15  ;;  %v2830_v12 = vmul.f32 0.7, %v1086_v40 }
 0x61b   : > { %v2668_v60 = vmul.f32 0.5, %v2667_v45  ;;  %v2480_v2 = vpop.xlane.xlu0 %2479  ;;  %844 = vadd.xlane.f32.xlu1 %v843_v8  ;;  %v2796_v4 = vmul.f32 %v5672_v54, %v2779_v17  ;;  %v962_v52 = vmul.f32 %v5840_v14, %v961_v18 }
 0x61c   : > { %v2500_v51 = vmul.f32 %v2480_v2, %v5225_v24 }
 0x61d   : > { %v5882_v11 = vpop.eup %4089  ;;  %v2669_v28 = vsub.f32 1.5, %v2668_v60 }
 0x61e   : > { %v4092_v32 = vpop.eup %4091  ;;  %v2676_v31 = vmul.f32 %v5882_v11, %v5852_v9  ;;  %v5888_v5 = vsub.f32 %v5578_v20, %v2500_v51  ;;  %vm2682_vm13 = vweird.f32 %v5882_v11 }
 0x61f   : > { %v2670_v61 = vmul.f32 %v4088_v19, %v2669_v28  ;;  %v2686_v53 = vmul.f32 %v4092_v32, %v5854_v15  ;;  %vm2692_vm15 = vweird.f32 %v4092_v32  ;;  %vm2683_vm3 = vmor %vm2681_vm2, %vm2682_vm13  ;;  %v966_v15 = vsel %vm5926_vm1, %v5840_v14, %v962_v52 }
 0x620   : > { %v2677_v20 = vmul.f32 %v5882_v11, %v2676_v31  ;;  %v2532_v63 = vmul.f32 %v5888_v5, %v5888_v5  ;;  %vm2693_vm5 = vmor %vm2691_vm4, %vm2692_vm15 }
 0x621   : > { %v2674_v37 = vsel %vm2673_vm11, %v4088_v19, %v2670_v61  ;;  %v2687_v56 = vmul.f32 %v4092_v32, %v2686_v53  ;;  %v2813_v19 = vadd.f32 %v5690_v58, %v2796_v4  ;;  %v2829_v61 = vmul.f32 0.7, %v1085_v0 }
 0x622   : > { %v2780_v45 = vmul.f32 %v2674_v37, %v5519_v59  ;;  %v2678_v21 = vmul.f32 0.5, %v2677_v20  ;;  %v748_v26 = vpop.xlane.xlu2 %747  ;;  %v2574_v17 = vsel %vm703_vm0, %v2532_v63, 0.0 }
 0x623   : > { %v2688_v10 = vmul.f32 0.5, %v2687_v56  ;;  %v751_v16 = vpop.xlane.xlu0 %750  ;;  %v773_v60 = vmul.f32 %v5225_v24, %v748_v26  ;;  %2575 = vadd.xlane.f32.xlu1 %v2574_v17  ;;  %v2845_v37 = vmul.f32 0.3, %v2813_v19 }
 0x624   : > { %v2797_v2 = vmul.f32 %v5672_v54, %v2780_v45  ;;  %v2679_v51 = vsub.f32 1.5, %v2678_v21  ;;  %v774_v8 = vmul.f32 %v5225_v24, %v751_v16 }
 0x625   : > { %v2689_v28 = vsub.f32 1.5, %v2688_v10  ;;  %v5920_v43 = vsub.f32 %v5587_v6, %v773_v60  ;;  %v5955_v14 = vadd.f32 %v2845_v37, %v2829_v61 }
 0x626   : > { %v2680_v49 = vmul.f32 %v5882_v11, %v2679_v51  ;;  %v5933_v4 = vsub.f32 %v5590_v3, %v774_v8  ;;  %v2814_v9 = vadd.f32 %v5690_v58, %v2797_v2  ;;  %v956_v3 = vsel %vm5914_vm14, %v5823_v38, %v952_v34 }
 0x627   : > { %v2690_v53 = vmul.f32 %v4092_v32, %v2689_v28  ;;  %v805_v6 = vmul.f32 %v5920_v43, %v5920_v43  ;;  %v1053_v38 = vmul.f32 %v956_v3, %v5465_v46  ;;  %v1054_v34 = vmul.f32 %v966_v15, %v5493_v55 }
 0x628   : > { %v2684_v20 = vsel %vm2683_vm3, %v5882_v11, %v2680_v49  ;;  %v806_v18 = vmul.f32 %v5933_v4, %v5933_v4  ;;  %v2846_v21 = vmul.f32 0.3, %v2814_v9 }
 0x629   : > { %v2694_v0 = vsel %vm2693_vm5, %v4092_v32, %v2690_v53  ;;  %v849_v40 = vsel %vm703_vm0, %v805_v6, 0.0  ;;  %v2781_v11 = vmul.f32 %v2684_v20, %v5533_v7  ;;  %v1070_v46 = vmul.f32 %v5642_v23, %v1053_v38  ;;  %v833_v6 = vpop.xlane.xlu1 %832 }
 0x62a   : > { %v2782_v56 = vmul.f32 %v2694_v0, %v5547_v36  ;;  %v852_v63 = vsel %vm703_vm0, %v806_v18, 0.0  ;;  %850 = vadd.xlane.f32.xlu2 %v849_v40  ;;  %v2486_v45 = vpop.xlane.xlu2 %2485  ;;  %v5957_v32 = vadd.f32 %v2846_v21, %v2830_v12  ;;  %v1071_v55 = vmul.f32 %v5642_v23, %v1054_v34 }
 0x62b   : > { %853 = vadd.xlane.f32.xlu0 %v852_v63  ;;  %v2502_v26 = vmul.f32 %v2486_v45, %v5225_v24  ;;  %v2798_v36 = vmul.f32 %v5672_v54, %v2781_v11  ;;  %v1087_v2 = vadd.f32 %v5658_v42, %v1070_v46  ;;  %v2561_v53 = vpop.xlane.xlu0 %2560  ;;  %v863_v20 = vmul.f32 %v833_v6, %v5225_v24 }
 0x62c   : > { %v2799_v10 = vmul.f32 %v5672_v54, %v2782_v56  ;;  %v2875_v16 = vpack.c.bf16 %v5957_v32, %v5955_v14  ;;  %v1088_v51 = vadd.f32 %v5658_v42, %v1071_v55  ;;  %v2591_v12 = vmul.f32 %v2561_v53, %v5225_v24 }
 0x62d   : > { %v5960_v7 = vsub.f32 %v5600_v29, %v2502_v26  ;;  %v2815_v29 = vadd.f32 %v5690_v58, %v2798_v36  ;;  %v2831_v52 = vmul.f32 0.7, %v1087_v2  ;;  %v864_v18 = vmul.f32 %v5876_v44, %v5225_v24 }
 0x62e   : > { %3796 = vmatmul.msk.bf16.gmra.mxu3 %vm703_vm0, %v2875_v16  ;;  %v2816_v19 = vadd.f32 %v5690_v58, %v2799_v10  ;;  %v2832_v28 = vmul.f32 0.7, %v1088_v51  ;;  %v2607_v9 = vadd.f32 1e-12, %v2591_v12  ;;  %v879_v37 = vadd.f32 1e-12, %v863_v20 }
 0x62f   : > { %v2534_v17 = vmul.f32 %v5960_v7, %v5960_v7  ;;  %v2847_v8 = vmul.f32 0.3, %v2815_v29  ;;  %v880_v3 = vadd.f32 1e-12, %v864_v18 }
 0x630   : > { %v2848_v59 = vmul.f32 0.3, %v2816_v19  ;;  %4093 = vrsqrt.f32 %v2607_v9  ;;  %vm2701_vm9 = vweird.f32 %v2607_v9  ;;  %vm973_vm10 = vweird.f32 %v879_v37 }
 0x631   : > { %v2580_v60 = vsel %vm703_vm0, %v2534_v17, 0.0  ;;  %v5976_v31 = vadd.f32 %v2847_v8, %v2831_v52  ;;  %4095 = vrsqrt.f32 %v879_v37  ;;  %vm983_vm13 = vweird.f32 %v880_v3 }
 0x632   : > { %2581 = vadd.xlane.f32.xlu2 %v2580_v60  ;;  %v5978_v49 = vadd.f32 %v2848_v59, %v2832_v28  ;;  %4097 = vrsqrt.f32 %v880_v3  ;;  %v3857_v60 = vld [vmem:[%s6554_s9 + $0x18] sm:$0xff]  ;;  %v3856_v28 = vld [vmem:[%s6554_s9 + $0x10] sm:$0xff] }
 0x633   : > { %3057 = vmatpush.bf16.msra.mxu0 %v3857_v60 }
 0x634   : > { %v2876_v61 = vpack.c.bf16 %v5978_v49, %v5976_v31 }
 0x636   : > { %v4094_v15 = vpop.eup %4093 }
 0x637   : > { %v4096_v0 = vpop.eup %4095  ;;  %v2696_v11 = vmul.f32 %v4094_v15, %v2607_v9  ;;  %vm2702_vm6 = vweird.f32 %v4094_v15  ;;  %3058 = vmatpush.bf16.msra.mxu0 %v3856_v28 }
 0x638   : > { %v4098_v40 = vpop.eup %4097  ;;  %v968_v56 = vmul.f32 %v4096_v0, %v879_v37  ;;  %vm974_vm7 = vweird.f32 %v4096_v0  ;;  %vm2703_vm11 = vmor %vm2701_vm9, %vm2702_vm6 }
 0x639   : > { %v978_v63 = vmul.f32 %v4098_v40, %v880_v3  ;;  %v2697_v45 = vmul.f32 %v4094_v15, %v2696_v11  ;;  %vm984_vm8 = vweird.f32 %v4098_v40  ;;  %vm5998_vm12 = vmor %vm973_vm10, %vm974_vm7  ;;  %v3855_v3 = vld [vmem:[%s6554_s9 + $0x8] sm:$0xff] }
 0x63a   : > { %v969_v21 = vmul.f32 %v4096_v0, %v968_v56  ;;  %vm985_vm14 = vmor %vm983_vm13, %vm984_vm8 }
 0x63b   : > { %v979_v26 = vmul.f32 %v4098_v40, %v978_v63  ;;  %v2698_v38 = vmul.f32 0.5, %v2697_v45  ;;  %3059 = vmatpush.bf16.msra.mxu0 %v3855_v3 }
 0x63c   : > { %v970_v44 = vmul.f32 0.5, %v969_v21 }
 0x63d   : > { %v980_v10 = vmul.f32 0.5, %v979_v26  ;;  %v2699_v17 = vsub.f32 1.5, %v2698_v38 }
 0x63e   : > { %3797 = vmatmul.msk.bf16.gmra.mxu3 %vm703_vm0, %v2876_v61  ;;  %v971_v46 = vsub.f32 1.5, %v970_v44 }
 0x63f   : > { %v981_v55 = vsub.f32 1.5, %v980_v10  ;;  %v2700_v29 = vmul.f32 %v4094_v15, %v2699_v17 }
 0x640   : > { %v972_v51 = vmul.f32 %v4096_v0, %v971_v46 }
 0x641   : > { %v982_v8 = vmul.f32 %v4098_v40, %v981_v55  ;;  %v2704_v53 = vsel %vm2703_vm11, %v4094_v15, %v2700_v29 }
 0x642   : > { %v2783_v9 = vmul.f32 %v2704_v53, %v5596_v57 }
 0x643   : > { %v986_v20 = vsel %vm985_vm14, %v4098_v40, %v982_v8 }
 0x644   : > { %v1056_v63 = vmul.f32 %v986_v20, %v5560_v41  ;;  %v2800_v38 = vmul.f32 %v5672_v54, %v2783_v9 }
 0x646   : > { %v1073_v17 = vmul.f32 %v5642_v23, %v1056_v63  ;;  %v2817_v60 = vadd.f32 %v5690_v58, %v2800_v38 }
 0x665   : > { %v2564_v34 = vpop.xlane.xlu1 %2563 }
 0x666   : > { %v2592_v36 = vmul.f32 %v2564_v34, %v5225_v24 }
 0x668   : > { %v2608_v16 = vadd.f32 1e-12, %v2592_v36 }
 0x66a   : > { %4099 = vrsqrt.f32 %v2608_v16  ;;  %vm2711_vm1 = vweird.f32 %v2608_v16 }
 0x66d   : > { %v2483_v19 = vpop.xlane.xlu1 %2482 }
 0x66e   : > { %v2501_v2 = vmul.f32 %v2483_v19, %v5225_v24 }
 0x670   : > { %v4100_v59 = vpop.eup %4099  ;;  %v5993_v52 = vsub.f32 %v5682_v1, %v2501_v2  ;;  %v976_v1 = vsel %vm5998_vm12, %v4096_v0, %v972_v51  ;;  %v1090_v2 = vadd.f32 %v5658_v42, %v1073_v17 }
 0x671   : > { %v2706_v6 = vmul.f32 %v4100_v59, %v2608_v16  ;;  %v1055_v56 = vmul.f32 %v976_v1, %v5563_v30  ;;  %vm2712_vm15 = vweird.f32 %v4100_v59  ;;  %v3854_v30 = vld [vmem:[%s6554_s9] sm:$0xff] }
 0x672   : > { %v2533_v12 = vmul.f32 %v5993_v52, %v5993_v52  ;;  %vm2713_vm2 = vmor %vm2711_vm1, %vm2712_vm15  ;;  %3060 = vmatpush.bf16.msra.mxu0 %v3854_v30  ;;  %v2834_v20 = vmul.f32 0.7, %v1090_v2  ;;  %vm3028_vm15 = vcmask 523264  }
 0x673   : > { %v2707_v18 = vmul.f32 %v4100_v59, %v2706_v6  ;;  %v1072_v10 = vmul.f32 %v5642_v23, %v1055_v56 }
 0x674   : > { %v2577_v37 = vsel %vm703_vm0, %v2533_v12, 0.0 }
 0x675   : > { %v2708_v15 = vmul.f32 0.5, %v2707_v18  ;;  %2578 = vadd.xlane.f32.xlu1 %v2577_v37  ;;  %v842_v11 = vpop.xlane.xlu1 %841  ;;  %v839_v45 = vpop.xlane.xlu0 %838  ;;  %v1089_v19 = vadd.f32 %v5658_v42, %v1072_v10 }
 0x676   : > { %v866_v0 = vmul.f32 %v842_v11, %v5225_v24  ;;  %v2567_v40 = vpop.xlane.xlu2 %2566  ;;  %v865_v57 = vmul.f32 %v839_v45, %v5225_v24 }
 0x677   : > { %v2709_v21 = vsub.f32 1.5, %v2708_v15  ;;  %v2593_v26 = vmul.f32 %v2567_v40, %v5225_v24  ;;  %v2833_v1 = vmul.f32 0.7, %v1089_v19 }
 0x678   : > { %v882_v34 = vadd.f32 1e-12, %v866_v0  ;;  %v881_v41 = vadd.f32 1e-12, %v865_v57 }
 0x679   : > { %v2710_v36 = vmul.f32 %v4100_v59, %v2709_v21  ;;  %v6020_v44 = vadd.f32 1e-12, %v2593_v26 }
 0x67a   : > { %4101 = vrsqrt.f32 %v882_v34  ;;  %vm1003_vm5 = vweird.f32 %v882_v34  ;;  %vm993_vm7 = vweird.f32 %v881_v41 }
 0x67b   : > { %v2714_v46 = vsel %vm2713_vm2, %v4100_v59, %v2710_v36  ;;  %4103 = vrsqrt.f32 %v881_v41  ;;  %v2849_v59 = vmul.f32 0.3, %v2817_v60  ;;  %vm2721_vm10 = vweird.f32 %v6020_v44 }
 0x67c   : > { %v2784_v55 = vmul.f32 %v2714_v46, %v5653_v25  ;;  %4105 = vrsqrt.f32 %v6020_v44 }
 0x67d   : > { %v2570_v29 = vpop.xlane.xlu0 %2569  ;;  %v6036_v15 = vadd.f32 %v2849_v59, %v2833_v1  ;;  %v6064_v59 = vld [vmem:[%s6548_s3 + $0x9] ss:$0 sm:$0xff] }
 0x67e   : > { %v2801_v16 = vmul.f32 %v5672_v54, %v2784_v55  ;;  %v2594_v51 = vmul.f32 %v2570_v29, %v5225_v24 }
 0x680   : > { %v4102_v8 = vpop.eup %4101  ;;  %v2818_v28 = vadd.f32 %v5690_v58, %v2801_v16  ;;  %v6032_v25 = vadd.f32 1e-12, %v2594_v51 }
 0x681   : > { %v4104_v61 = vpop.eup %4103  ;;  %v998_v53 = vmul.f32 %v4102_v8, %v882_v34  ;;  %vm1004_vm3 = vweird.f32 %v4102_v8 }
 0x682   : > { %v4106_v6 = vpop.eup %4105  ;;  %v988_v12 = vmul.f32 %v4104_v61, %v881_v41  ;;  %v2850_v18 = vmul.f32 0.3, %v2818_v28  ;;  %4107 = vrsqrt.f32 %v6032_v25  ;;  %vm994_vm4 = vweird.f32 %v4104_v61  ;;  %vm6050_vm8 = vmor %vm1003_vm5, %vm1004_vm3 }
 0x683   : > { %v999_v9 = vmul.f32 %v4102_v8, %v998_v53  ;;  %v2716_v37 = vmul.f32 %v4106_v6, %v6020_v44  ;;  %vm2722_vm6 = vweird.f32 %v4106_v6  ;;  %vm995_vm9 = vmor %vm993_vm7, %vm994_vm4  ;;  %v6577_v44 = vld [vmem:[#allocation12_spill] sm:$0xff]  ;;  %vm2731_vm13 = vweird.f32 %v6032_v25 }
 0x684   : > { %v989_v3 = vmul.f32 %v4104_v61, %v988_v12  ;;  %v6038_v11 = vadd.f32 %v2850_v18, %v2834_v20  ;;  %vm2723_vm11 = vmor %vm2721_vm10, %vm2722_vm6 }
 0x685   : > { %v1000_v56 = vmul.f32 0.5, %v999_v9  ;;  %v2717_v63 = vmul.f32 %v4106_v6, %v2716_v37  ;;  %v848_v45 = vpop.xlane.xlu2 %847  ;;  %v2573_v40 = vpop.xlane.xlu0 %2572 }
 0x686   : > { %v990_v0 = vmul.f32 0.5, %v989_v3  ;;  %v868_v21 = vmul.f32 %v848_v45, %v5225_v24  ;;  %v2877_v57 = vpack.c.bf16 %v6038_v11, %v6036_v15  ;;  %v2595_v30 = vmul.f32 %v2573_v40, %v5225_v24 }
 0x687   : > { %v1001_v26 = vsub.f32 1.5, %v1000_v56  ;;  %v2718_v38 = vmul.f32 0.5, %v2717_v63 }
 0x688   : > { %v991_v36 = vsub.f32 1.5, %v990_v0  ;;  %v6044_v10 = vadd.f32 1e-12, %v868_v21  ;;  %3798 = vmatmul.msk.bf16.gmra.mxu3 %vm703_vm0, %v2877_v57  ;;  %v4108_v17 = vpop.eup %4107  ;;  %v6047_v60 = vadd.f32 1e-12, %v2595_v30  ;;  %v2931_v16 = vpop.f32.mrf.mxu3 }
 0x689   : > { %v1002_v46 = vmul.f32 %v4102_v8, %v1001_v26  ;;  %v2719_v55 = vsub.f32 1.5, %v2718_v38  ;;  %v2726_v34 = vmul.f32 %v4108_v17, %v6032_v25  ;;  %vm2732_vm12 = vweird.f32 %v4108_v17 }
 0x68a   : > { %v992_v29 = vmul.f32 %v4104_v61, %v991_v36  ;;  %4109 = vrsqrt.f32 %v6044_v10  ;;  %vm2733_vm14 = vmor %vm2731_vm13, %vm2732_vm12  ;;  %vm1023_vm3 = vweird.f32 %v6044_v10  ;;  %vm2741_vm5 = vweird.f32 %v6047_v60 }
 0x68b   : > { %v2720_v2 = vmul.f32 %v4106_v6, %v2719_v55  ;;  %4111 = vrsqrt.f32 %v6047_v60  ;;  %v1006_v41 = vsel %vm6050_vm8, %v4102_v8, %v1002_v46  ;;  %v2727_v28 = vmul.f32 %v4108_v17, %v2726_v34 }
 0x68c   : > { %v996_v51 = vsel %vm995_vm9, %v4104_v61, %v992_v29  ;;  %v1058_v18 = vmul.f32 %v1006_v41, %v6577_v44  ;;  %v2932_v8 = vadd.f32 %v6064_v59, %v2931_v16 }
 0x68d   : > { %v1057_v53 = vmul.f32 %v996_v51, %v5740_v50  ;;  %v2724_v12 = vsel %vm2723_vm11, %v4106_v6, %v2720_v2  ;;  %v2728_v20 = vmul.f32 0.5, %v2727_v28 }
 0x68e   : > { %v2785_v1 = vmul.f32 %v2724_v12, %v5748_v48  ;;  %v845_v37 = vpop.xlane.xlu1 %844  ;;  %v1075_v21 = vmul.f32 %v5642_v23, %v1058_v18  ;;  %v2971_v38 = vmax.f32 %v2932_v8, 0.0 }
 0x68f   : > { %v2729_v61 = vsub.f32 1.5, %v2728_v20  ;;  %v1074_v56 = vmul.f32 %v5642_v23, %v1057_v53  ;;  %v867_v50 = vmul.f32 %v845_v37, %v5225_v24 }
 0x690   : > { %v6069_v9 = vpop.eup %4109  ;;  %v2802_v63 = vmul.f32 %v5672_v54, %v2785_v1  ;;  %v2933_v48 = vpop.f32.mrf.mxu3  ;;  %v1092_v19 = vadd.f32 %v5658_v42, %v1075_v21 }
 0x691   : > { %v6072_v3 = vpop.eup %4111  ;;  %v2730_v6 = vmul.f32 %v4108_v17, %v2729_v61  ;;  %v1018_v0 = vmul.f32 %v6069_v9, %v6044_v10  ;;  %v2934_v40 = vadd.f32 %v6064_v59, %v2933_v48  ;;  %v883_v57 = vadd.f32 1e-12, %v867_v50 }
 0x692   : > { %v2736_v45 = vmul.f32 %v6072_v3, %v6047_v60  ;;  %v1091_v36 = vadd.f32 %v5658_v42, %v1074_v56  ;;  %v2819_v46 = vadd.f32 %v5690_v58, %v2802_v63  ;;  %v2836_v1 = vmul.f32 0.7, %v1092_v19 }
 0x693   : > { %v2734_v26 = vsel %vm2733_vm14, %v4108_v17, %v2730_v6  ;;  %v2972_v30 = vmax.f32 %v2934_v40, 0.0  ;;  %4113 = vrsqrt.f32 %v883_v57  ;;  %v1019_v16 = vmul.f32 %v6069_v9, %v1018_v0 }
 0x694   : > { %v2786_v25 = vmul.f32 %v2734_v26, %v5772_v33  ;;  %v2737_v55 = vmul.f32 %v6072_v3, %v2736_v45  ;;  %v2835_v2 = vmul.f32 0.7, %v1091_v36  ;;  %v2851_v51 = vmul.f32 0.3, %v2819_v46 }
 0x695   : > { %v2987_v29 = vpack.c.bf16 %v2972_v30, %v2971_v38  ;;  %v1020_v28 = vmul.f32 0.5, %v1019_v16  ;;  %vm1024_vm1 = vweird.f32 %v6069_v9  ;;  %vm2742_vm2 = vweird.f32 %v6072_v3 }
 0x696   : > { %v2803_v23 = vmul.f32 %v5672_v54, %v2786_v25  ;;  %v2576_v17 = vpop.xlane.xlu1 %2575  ;;  %v2738_v41 = vmul.f32 0.5, %v2737_v55  ;;  %v6094_v54 = vadd.f32 %v2851_v51, %v2835_v2  ;;  %vm6107_vm6 = vmor %vm1023_vm3, %vm1024_vm1  ;;  %vm1013_vm8 = vweird.f32 %v883_v57  ;;  %v6138_v2 = vld [vmem:[%s6548_s3 + $0x2] ss:$0 sm:$0xff] }
 0x697   : > { %3818 = vmatmul.msk.bf16.vlgmr.msra.gmra.mxu0 %vm3028_vm15, %v2987_v29  ;;  %v2596_v34 = vmul.f32 %v2576_v17, %v5225_v24  ;;  %v1021_v61 = vsub.f32 1.5, %v1020_v28  ;;  %vm2743_vm7 = vmor %vm2741_vm5, %vm2742_vm2 }
 0x698   : > { %v2820_v33 = vadd.f32 %v5690_v58, %v2803_v23  ;;  %v2739_v18 = vsub.f32 1.5, %v2738_v41 }
 0x699   : > { %v4114_v53 = vpop.eup %4113  ;;  %v2612_v12 = vadd.f32 1e-12, %v2596_v34  ;;  %v1022_v50 = vmul.f32 %v6069_v9, %v1021_v61 }
 0x69a   : > { %v2852_v20 = vmul.f32 0.3, %v2820_v33  ;;  %v1008_v44 = vmul.f32 %v4114_v53, %v883_v57  ;;  %v2740_v63 = vmul.f32 %v6072_v3, %v2739_v18  ;;  %vm1014_vm4 = vweird.f32 %v4114_v53 }
 0x69b   : > { %4115 = vrsqrt.f32 %v2612_v12  ;;  %v2936_v37 = vpop.f32.mrf.mxu3  ;;  %vm1015_vm9 = vmor %vm1013_vm8, %vm1014_vm4  ;;  %v1026_v26 = vsel %vm6107_vm6, %v6069_v9, %v1022_v50  ;;  %v6123_v9 = vld [vmem:[%s6548_s3 + $0x1] ss:$0 sm:$0xff]  ;;  %vm2751_vm11 = vweird.f32 %v2612_v12 }
 0x69c   : > { %v6096_v42 = vadd.f32 %v2852_v20, %v2836_v1  ;;  %v1009_v8 = vmul.f32 %v4114_v53, %v1008_v44  ;;  %v2937_v10 = vadd.f32 %v6064_v59, %v2936_v37  ;;  %v2744_v21 = vsel %vm2743_vm7, %v6072_v3, %v2740_v63 }
 0x69d   : > { %v2787_v57 = vmul.f32 %v2744_v21, %v5816_v47  ;;  %v1060_v55 = vmul.f32 %v1026_v26, %v5813_v13  ;;  %v6129_v47 = vld [vmem:[%s6548_s3 + $0x7] ss:$0 sm:$0xff] }
 0x69e   : > { %v2878_v58 = vpack.c.bf16 %v6096_v42, %v6094_v54  ;;  %v1010_v56 = vmul.f32 0.5, %v1009_v8  ;;  %v2973_v16 = vmax.f32 %v2937_v10, 0.0 }
 0x69f   : > { %v2804_v13 = vmul.f32 %v6129_v47, %v2787_v57  ;;  %v1077_v17 = vmul.f32 %v6123_v9, %v1060_v55 }
 0x6a0   : > { %3799 = vmatmul.msk.bf16.gmra.mxu3 %vm703_vm0, %v2878_v58  ;;  %v1011_v48 = vsub.f32 1.5, %v1010_v56 }
 0x6a1   : > { %v4116_v6 = vpop.eup %4115  ;;  %v1094_v28 = vadd.f32 %v6138_v2, %v1077_v17 }
 0x6a2   : > { %v1012_v0 = vmul.f32 %v4114_v53, %v1011_v48  ;;  %v2746_v40 = vmul.f32 %v4116_v6, %v2612_v12  ;;  %vm2752_vm10 = vweird.f32 %v4116_v6 }
 0x6a3   : > { %v2938_v60 = vpop.f32.mrf.mxu3  ;;  %vm2753_vm12 = vmor %vm2751_vm11, %vm2752_vm10  ;;  %v2838_v44 = vmul.f32 0.7, %v1094_v28 }
 0x6a4   : > { %v1016_v38 = vsel %vm1015_vm9, %v4114_v53, %v1012_v0  ;;  %v2747_v30 = vmul.f32 %v4116_v6, %v2746_v40  ;;  %v2939_v36 = vadd.f32 %v6064_v59, %v2938_v60  ;;  %v6146_v53 = vld [vmem:[%s6548_s3 + $0x8] ss:$0 sm:$0xff]  ;;  %v851_v0 = vpop.xlane.xlu2 %850 }
 0x6a5   : > { %v1059_v25 = vmul.f32 %v1016_v38, %v5860_v35  ;;  %v2821_v12 = vadd.f32 %v6146_v53, %v2804_v13 }
 0x6a6   : > { %v2748_v46 = vmul.f32 0.5, %v2747_v30  ;;  %v2974_v29 = vmax.f32 %v2939_v36, 0.0  ;;  %v854_v30 = vpop.xlane.xlu0 %853 }
 0x6a7   : > { %v1076_v3 = vmul.f32 %v6123_v9, %v1059_v25  ;;  %v2853_v18 = vmul.f32 0.3, %v2821_v12  ;;  %v870_v55 = vmul.f32 %v854_v30, %v5225_v24 }
 0x6a8   : > { %v2749_v23 = vsub.f32 1.5, %v2748_v46  ;;  %v2988_v19 = vpack.c.bf16 %v2974_v29, %v2973_v16  ;;  %v869_v46 = vmul.f32 %v851_v0, %v5225_v24 }
 0x6a9   : > { %v1093_v51 = vadd.f32 %v6138_v2, %v1076_v3 }
 0x6aa   : > { %v2750_v35 = vmul.f32 %v4116_v6, %v2749_v23  ;;  %3819 = vmatmul.msk.bf16.gmra.mxu0 %vm3028_vm15, %v2988_v19  ;;  %v885_v29 = vadd.f32 1e-12, %v869_v46  ;;  %v886_v23 = vadd.f32 1e-12, %v870_v55 }
 0x6ab   : > { %v2837_v20 = vmul.f32 0.7, %v1093_v51 }
 0x6ac   : > { %v2754_v34 = vsel %vm2753_vm12, %v4116_v6, %v2750_v35  ;;  %v2582_v26 = vpop.xlane.xlu2 %2581  ;;  %vm1033_vm3 = vweird.f32 %v885_v29  ;;  %vm1043_vm5 = vweird.f32 %v886_v23 }
 0x6ad   : > { %v2788_v33 = vmul.f32 %v2754_v34, %v5888_v5  ;;  %v6150_v8 = vadd.f32 %v2853_v18, %v2837_v20  ;;  %v2598_v36 = vmul.f32 %v2582_v26, %v5225_v24 }
 0x6af   : > { %v2805_v41 = vmul.f32 %v6129_v47, %v2788_v33  ;;  %v2614_v16 = vadd.f32 1e-12, %v2598_v36 }
 0x6b1   : > { %v2941_v1 = vpop.f32.mrf.mxu3  ;;  %v2822_v5 = vadd.f32 %v6146_v53, %v2805_v41  ;;  %4117 = vrsqrt.f32 %v2614_v16  ;;  %vm2771_vm2 = vweird.f32 %v2614_v16 }
 0x6b2   : > { %v2942_v56 = vadd.f32 %v6064_v59, %v2941_v1  ;;  %4119 = vrsqrt.f32 %v885_v29 }
 0x6b3   : > { %v2854_v61 = vmul.f32 0.3, %v2822_v5  ;;  %4121 = vrsqrt.f32 %v886_v23 }
 0x6b4   : > { %v2975_v48 = vmax.f32 %v2942_v56, 0.0 }
 0x6b5   : > { %v6152_v37 = vadd.f32 %v2854_v61, %v2838_v44 }
 0x6b7   : > { %v2879_v58 = vpack.c.bf16 %v6152_v37, %v6150_v8  ;;  %v4118_v3 = vpop.eup %4117 }
 0x6b8   : > { %v4120_v19 = vpop.eup %4119  ;;  %v2766_v13 = vmul.f32 %v4118_v3, %v2614_v16  ;;  %vm2772_vm13 = vweird.f32 %v4118_v3 }
 0x6b9   : > { %v2943_v63 = vpop.f32.mrf.mxu3  ;;  %3800 = vmatmul.msk.bf16.gmra.mxu3 %vm703_vm0, %v2879_v58  ;;  %v4122_v35 = vpop.eup %4121  ;;  %v1028_v34 = vmul.f32 %v4120_v19, %v885_v29  ;;  %vm1034_vm14 = vweird.f32 %v4120_v19  ;;  %vm2773_vm4 = vmor %vm2771_vm2, %vm2772_vm13 }
 0x6ba   : > { %v2944_v50 = vadd.f32 %v6064_v59, %v2943_v63  ;;  %v1038_v17 = vmul.f32 %v4122_v35, %v886_v23  ;;  %v2767_v33 = vmul.f32 %v4118_v3, %v2766_v13  ;;  %vm1044_vm1 = vweird.f32 %v4122_v35  ;;  %vm1035_vm6 = vmor %vm1033_vm3, %vm1034_vm14 }
 0x6bb   : > { %v1029_v41 = vmul.f32 %v4120_v19, %v1028_v34  ;;  %vm1045_vm7 = vmor %vm1043_vm5, %vm1044_vm1 }
 0x6bc   : > { %v2976_v6 = vmax.f32 %v2944_v50, 0.0  ;;  %v1039_v51 = vmul.f32 %v4122_v35, %v1038_v17  ;;  %v2768_v28 = vmul.f32 0.5, %v2767_v33 }
 0x6bd   : > { %v1030_v20 = vmul.f32 0.5, %v1029_v41 }
 0x6be   : > { %v2989_v45 = vpack.c.bf16 %v2976_v6, %v2975_v48  ;;  %v1040_v5 = vmul.f32 0.5, %v1039_v51  ;;  %v2769_v18 = vsub.f32 1.5, %v2768_v28 }
 0x6bf   : > { %v1031_v58 = vsub.f32 1.5, %v1030_v20 }
 0x6c0   : > { %3820 = vmatmul.msk.bf16.gmra.mxu0 %vm3028_vm15, %v2989_v45  ;;  %v1041_v61 = vsub.f32 1.5, %v1040_v5  ;;  %v2770_v56 = vmul.f32 %v4118_v3, %v2769_v18 }
 0x6c1   : > { %v2946_v40 = vpop.f32.mrf.mxu3  ;;  %v1032_v50 = vmul.f32 %v4120_v19, %v1031_v58 }
 0x6c2   : > { %v2947_v10 = vadd.f32 %v6064_v59, %v2946_v40  ;;  %v1042_v63 = vmul.f32 %v4122_v35, %v1041_v61  ;;  %v2774_v6 = vsel %vm2773_vm4, %v4118_v3, %v2770_v56 }
 0x6c3   : > { %v1036_v40 = vsel %vm1035_vm6, %v4120_v19, %v1032_v50 }
 0x6c4   : > { %v2977_v60 = vmax.f32 %v2947_v10, 0.0  ;;  %v1046_v0 = vsel %vm1045_vm7, %v4122_v35, %v1042_v63  ;;  %v1061_v30 = vmul.f32 %v1036_v40, %v5920_v43 }
 0x6c9   : > { %v2948_v21 = vpop.f32.mrf.mxu3 }
 0x6ca   : > { %v2949_v38 = vadd.f32 %v6064_v59, %v2948_v21  ;;  %v2790_v21 = vmul.f32 %v2774_v6, %v5960_v7 }
 0x6cc   : > { %v2978_v25 = vmax.f32 %v2949_v38, 0.0  ;;  %v1062_v38 = vmul.f32 %v1046_v0, %v5933_v4 }
 0x6ce   : > { %v2990_v57 = vpack.c.bf16 %v2978_v25, %v2977_v60  ;;  %v2807_v25 = vmul.f32 %v6129_v47, %v2790_v21  ;;  %v1079_v46 = vmul.f32 %v6123_v9, %v1062_v38 }
 0x6d0   : > { %3821 = vmatmul.msk.bf16.gmra.mxu0 %vm3028_vm15, %v2990_v57  ;;  %v1078_v57 = vmul.f32 %v6123_v9, %v1061_v30  ;;  %v2824_v7 = vadd.f32 %v6146_v53, %v2807_v25  ;;  %v1096_v29 = vadd.f32 %v6138_v2, %v1079_v46 }
 0x6d2   : > { %v1095_v43 = vadd.f32 %v6138_v2, %v1078_v57  ;;  %v2856_v3 = vmul.f32 0.3, %v2824_v7  ;;  %v2840_v35 = vmul.f32 0.7, %v1096_v29  ;;  %v6190_v2 = vld [vmem:[%s6548_s3 + $0xa] ss:$0 sm:$0xff] }
 0x6d4   : > { %v2839_v19 = vmul.f32 0.7, %v1095_v43  ;;  %v6181_v9 = vadd.f32 %v2856_v3, %v2840_v35 }
 0x6e8   : > { %v2579_v12 = vpop.xlane.xlu1 %2578 }
 0x6e9   : > { %v2597_v1 = vmul.f32 %v2579_v12, %v5225_v24 }
 0x6eb   : > { %v2613_v44 = vadd.f32 1e-12, %v2597_v1 }
 0x6ed   : > { %4123 = vrsqrt.f32 %v2613_v44  ;;  %vm2761_vm9 = vweird.f32 %v2613_v44 }
 0x6f3   : > { %v4124_v48 = vpop.eup %4123 }
 0x6f4   : > { %v2756_v45 = vmul.f32 %v4124_v48, %v2613_v44  ;;  %vm2762_vm8 = vweird.f32 %v4124_v48 }
 0x6f5   : > { %vm2763_vm10 = vmor %vm2761_vm9, %vm2762_vm8 }
 0x6f6   : > { %v2757_v10 = vmul.f32 %v4124_v48, %v2756_v45 }
 0x6f8   : > { %v2758_v26 = vmul.f32 0.5, %v2757_v10 }
 0x6fa   : > { %v2759_v60 = vsub.f32 1.5, %v2758_v26 }
 0x6fc   : > { %v2760_v36 = vmul.f32 %v4124_v48, %v2759_v60 }
 0x6fe   : > { %v2764_v55 = vsel %vm2763_vm10, %v4124_v48, %v2760_v36 }
 0x6ff   : > { %v2789_v16 = vmul.f32 %v2764_v55, %v5993_v52 }
 0x701   : > { %v2806_v4 = vmul.f32 %v6129_v47, %v2789_v16 }
 0x703   : > { %v2823_v23 = vadd.f32 %v6146_v53, %v2806_v4 }
 0x705   : > { %v2855_v13 = vmul.f32 0.3, %v2823_v23 }
 0x707   : > { %v6179_v17 = vadd.f32 %v2855_v13, %v2839_v19 }
 0x709   : > { %v2880_v52 = vpack.c.bf16 %v6181_v9, %v6179_v17 }
 0x70b   : > { %v2951_v34 = vpop.f32.mrf.mxu3  ;;  %3801 = vmatmul.msk.bf16.gmra.mxu3 %vm703_vm0, %v2880_v52 }
 0x70c   : > { %v2952_v47 = vadd.f32 %v6064_v59, %v2951_v34 }
 0x70e   : > { %v2979_v41 = vmax.f32 %v2952_v47, 0.0 }
 0x713   : > { %v2953_v53 = vpop.f32.mrf.mxu3 }
 0x714   : > { %v2954_v33 = vadd.f32 %v6064_v59, %v2953_v53  ;;  %v3062_v51 = vpop.f32.mrf.mxu0 }
 0x715   : > { %v3063_v12 = vadd.f32 %v6190_v2, %v3062_v51 }
 0x716   : > { %v2980_v28 = vmax.f32 %v2954_v33, 0.0 }
 0x717   : > { %v6195_v5 = vadd.f32 %v3063_v12, %v5757_v39 }
 0x718   : > { %v2991_v1 = vpack.c.bf16 %v2980_v28, %v2979_v41 }
 0x719   : > { %v3118_v20 = vsel %vm703_vm0, %v6195_v5, 0.0 }
 0x71a   : > { %3822 = vmatmul.msk.bf16.gmra.mxu0 %vm3028_vm15, %v2991_v1  ;;  %3119 = vadd.xlane.f32.xlu0 %v3118_v20 }
 0x71c   : > { %v3064_v44 = vpop.f32.mrf.mxu0 }
 0x71d   : > { %v3065_v18 = vadd.f32 %v6190_v2, %v3064_v44 }
 0x71f   : > { %v6202_v61 = vadd.f32 %v3065_v18, %v5760_v62 }
 0x721   : > { %v3121_v58 = vsel %vm703_vm0, %v6202_v61, 0.0 }
 0x722   : > { %3122 = vadd.xlane.f32.xlu1 %v3121_v58 }
 0x723   : > { %v2956_v56 = vpop.f32.mrf.mxu3 }
 0x724   : > { %v2957_v39 = vadd.f32 %v6064_v59, %v2956_v56 }
 0x726   : > { %v2981_v0 = vmax.f32 %v2957_v39, 0.0 }
 0x727   : > { %v3067_v63 = vpop.f32.mrf.mxu0 }
 0x728   : > { %v3068_v50 = vadd.f32 %v6190_v2, %v3067_v63 }
 0x72a   : > { %v6209_v6 = vadd.f32 %v3068_v50, %v5862_v22 }
 0x72b   : > { %v2958_v48 = vpop.f32.mrf.mxu3 }
 0x72c   : > { %v2959_v45 = vadd.f32 %v6064_v59, %v2958_v48  ;;  %v3124_v62 = vsel %vm703_vm0, %v6209_v6, 0.0 }
 0x72d   : > { %3125 = vadd.xlane.f32.xlu2 %v3124_v62 }
 0x72e   : > { %v2982_v40 = vmax.f32 %v2959_v45, 0.0 }
 0x72f   : > { %v3069_v21 = vpop.f32.mrf.mxu0 }
 0x730   : > { %v2992_v10 = vpack.c.bf16 %v2982_v40, %v2981_v0  ;;  %v3070_v26 = vadd.f32 %v6190_v2, %v3069_v21 }
 0x732   : > { %3823 = vmatmul.msk.bf16.gmra.mxu0 %vm3028_vm15, %v2992_v10  ;;  %v6217_v38 = vadd.f32 %v3070_v26, %v5856_v27 }
 0x734   : > { %v3127_v22 = vsel %vm703_vm0, %v6217_v38, 0.0 }
 0x735   : > { %3128 = vadd.xlane.f32.xlu0 %v3127_v22 }
 0x73c   : > { %v2961_v30 = vpop.f32.mrf.mxu3 }
 0x73d   : > { %v3072_v60 = vpop.f32.mrf.mxu0  ;;  %v2962_v57 = vadd.f32 %v6064_v59, %v2961_v30 }
 0x73e   : > { %v3073_v25 = vadd.f32 %v6190_v2, %v3072_v60 }
 0x73f   : > { %v2983_v4 = vmax.f32 %v2962_v57, 0.0 }
 0x740   : > { %v6223_v36 = vadd.f32 %v3073_v25, %v5955_v14 }
 0x742   : > { %v3130_v46 = vsel %vm703_vm0, %v6223_v36, 0.0 }
 0x743   : > { %3131 = vadd.xlane.f32.xlu1 %v3130_v46 }
 0x744   : > { %v2963_v55 = vpop.f32.mrf.mxu3 }
 0x745   : > { %v2964_v27 = vadd.f32 %v6064_v59, %v2963_v55  ;;  %v3074_v16 = vpop.f32.mrf.mxu0 }
 0x746   : > { %v3075_v7 = vadd.f32 %v6190_v2, %v3074_v16 }
 0x747   : > { %v2984_v43 = vmax.f32 %v2964_v27, 0.0 }
 0x748   : > { %v6231_v29 = vadd.f32 %v3075_v7, %v5957_v32 }
 0x749   : > { %v2993_v23 = vpack.c.bf16 %v2984_v43, %v2983_v4 }
 0x74a   : > { %v3133_v14 = vsel %vm703_vm0, %v6231_v29, 0.0 }
 0x74b   : > { %3134 = vadd.xlane.f32.xlu2 %v3133_v14  ;;  %3824 = vmatmul.msk.bf16.gmra.mxu0 %vm3028_vm15, %v2993_v23 }
 0x74d   : > { %v3077_v3 = vpop.f32.mrf.mxu0 }
 0x74e   : > { %v3078_v19 = vadd.f32 %v6190_v2, %v3077_v3 }
 0x750   : > { %v3108_v35 = vadd.f32 %v3078_v19, %v5976_v31 }
 0x752   : > { %v3136_v13 = vsel %vm703_vm0, %v3108_v35, 0.0 }
 0x753   : > { %3137 = vadd.xlane.f32.xlu0 %v3136_v13 }
 0x755   : > { %v3079_v52 = vpop.f32.mrf.mxu0 }
 0x756   : > { %v3080_v34 = vadd.f32 %v6190_v2, %v3079_v52 }
 0x758   : > { %v6241_v32 = vadd.f32 %v3080_v34, %v5978_v49 }
 0x75a   : > { %v3139_v47 = vsel %vm703_vm0, %v6241_v32, 0.0 }
 0x75b   : > { %3140 = vadd.xlane.f32.xlu1 %v3139_v47 }
 0x78d   : > { %v3120_v21 = vpop.xlane.xlu0 %3119 }
 0x78e   : > { %v2966_v53 = vpop.f32.mrf.mxu3  ;;  %v3166_v22 = vmul.f32 %v3120_v21, %v5225_v24 }
 0x78f   : > { %v2967_v33 = vadd.f32 %v6064_v59, %v2966_v53 }
 0x790   : > { %v6281_v60 = vsub.f32 %v6195_v5, %v3166_v22 }
 0x791   : > { %v2985_v12 = vmax.f32 %v2967_v33, 0.0 }
 0x792   : > { %v3198_v57 = vmul.f32 %v6281_v60, %v6281_v60 }
 0x794   : > { %v3214_v27 = vsel %vm703_vm0, %v3198_v57, 0.0 }
 0x795   : > { %v3123_v23 = vpop.xlane.xlu1 %3122 }
 0x796   : > { %v2968_v51 = vpop.f32.mrf.mxu3  ;;  %v3167_v13 = vmul.f32 %v3123_v23, %v5225_v24 }
 0x797   : > { %v2969_v41 = vadd.f32 %v6064_v59, %v2968_v51  ;;  %v3082_v31 = vpop.f32.mrf.mxu0 }
 0x798   : > { %v3083_v28 = vadd.f32 %v6190_v2, %v3082_v31  ;;  %v6312_v53 = vsub.f32 %v6202_v61, %v3167_v13 }
 0x799   : > { %v2986_v1 = vmax.f32 %v2969_v41, 0.0 }
 0x79a   : > { %v6249_v20 = vadd.f32 %v3083_v28, %v6036_v15  ;;  %v3199_v61 = vmul.f32 %v6312_v53, %v6312_v53 }
 0x79b   : > { %v2994_v49 = vpack.c.bf16 %v2986_v1, %v2985_v12 }
 0x79c   : > { %v3142_v44 = vsel %vm703_vm0, %v6249_v20, 0.0 }
 0x79d   : > { %3143 = vadd.xlane.f32.xlu2 %v3142_v44  ;;  %3825 = vmatmul.msk.bf16.gmra.mxu0 %vm3028_vm15, %v2994_v49 }
 0x79f   : > { %v3084_v18 = vpop.f32.mrf.mxu0 }
 0x7a0   : > { %v3085_v58 = vadd.f32 %v6190_v2, %v3084_v18  ;;  %v3126_v41 = vpop.xlane.xlu2 %3125 }
 0x7a1   : > { %v3168_v12 = vmul.f32 %v3126_v41, %v5225_v24 }
 0x7a2   : > { %v3111_v59 = vadd.f32 %v3085_v58, %v6038_v11 }
 0x7a3   : > { %v6326_v44 = vsub.f32 %v6209_v6, %v3168_v12 }
 0x7a4   : > { %v3145_v56 = vsel %vm703_vm0, %v3111_v59, 0.0 }
 0x7a5   : > { %3146 = vadd.xlane.f32.xlu0 %v3145_v56 }
 0x7a8   : > { %v3129_v25 = vpop.xlane.xlu0 %3128 }
 0x7a9   : > { %v3169_v46 = vmul.f32 %v3129_v25, %v5225_v24 }
 0x7ab   : > { %v6289_v55 = vsub.f32 %v6217_v38, %v3169_v46 }
 0x7ad   : > { %v3201_v16 = vmul.f32 %v6289_v55, %v6289_v55 }
 0x7af   : > { %v3087_v63 = vpop.f32.mrf.mxu0  ;;  %v3223_v4 = vsel %vm703_vm0, %v3201_v16, 0.0 }
 0x7b0   : > { %v3088_v39 = vadd.f32 %v6190_v2, %v3087_v63 }
 0x7b2   : > { %v6259_v15 = vadd.f32 %v3088_v39, %v6094_v54 }
 0x7b4   : > { %v3148_v50 = vsel %vm703_vm0, %v6259_v15, 0.0 }
 0x7b5   : > { %3149 = vadd.xlane.f32.xlu1 %v3148_v50 }
 0x7b6   : > { %v3132_v31 = vpop.xlane.xlu1 %3131 }
 0x7b7   : > { %v3089_v48 = vpop.f32.mrf.mxu0 }
 0x7b8   : > { %v3090_v45 = vadd.f32 %v6190_v2, %v3089_v48 }
 0x7ba   : > { %v6265_v0 = vadd.f32 %v3090_v45, %v6096_v42 }
 0x7bc   : > { %v3151_v11 = vsel %vm703_vm0, %v6265_v0, 0.0 }
 0x7bd   : > { %3152 = vadd.xlane.f32.xlu2 %v3151_v11 }
 0x7be   : > { %v3135_v56 = vpop.xlane.xlu2 %3134 }
 0x7c8   : > { %v3092_v62 = vpop.f32.mrf.mxu0 }
 0x7c9   : > { %v3093_v40 = vadd.f32 %v6190_v2, %v3092_v62 }
 0x7cb   : > { %v6271_v54 = vadd.f32 %v3093_v40, %v6150_v8 }
 0x7cd   : > { %v3154_v10 = vsel %vm703_vm0, %v6271_v54, 0.0 }
 0x7ce   : > { %3155 = vadd.xlane.f32.xlu0 %v3154_v10  ;;  %v3141_v63 = vpop.xlane.xlu1 %3140 }
 0x7d0   : > { %v3094_v26 = vpop.f32.mrf.mxu0 }
 0x7d1   : > { %v3095_v42 = vadd.f32 %v6190_v2, %v3094_v26 }
 0x7d3   : > { %v6278_v30 = vadd.f32 %v3095_v42, %v6152_v37  ;;  %v3138_v37 = vpop.xlane.xlu0 %3137 }
 0x7d4   : > { %v3172_v5 = vmul.f32 %v3138_v37, %v5225_v24 }
 0x7d5   : > { %v3157_v8 = vsel %vm703_vm0, %v6278_v30, 0.0 }
 0x7d6   : > { %3158 = vadd.xlane.f32.xlu1 %v3157_v8  ;;  %v6295_v7 = vsub.f32 %v3108_v35, %v3172_v5 }
 0x7d8   : > { %v3204_v43 = vmul.f32 %v6295_v7, %v6295_v7 }
 0x7da   : > { %v3232_v38 = vsel %vm703_vm0, %v3204_v43, 0.0 }
 0x7de   : > { %3215 = vadd.xlane.f32.xlu1 %v3214_v27 }
 0x7e6   : > { %3224 = vadd.xlane.f32.xlu1 %v3223_v4 }
 0x7ee   : > { %3233 = vadd.xlane.f32.xlu1 %v3232_v38 }
 0x810   : > { %v3144_v11 = vpop.xlane.xlu2 %3143 }
 0x811   : > { %v3174_v40 = vmul.f32 %v3144_v11, %v5225_v24 }
 0x818   : > { %v3147_v14 = vpop.xlane.xlu0 %3146 }
 0x819   : > { %v3175_v3 = vmul.f32 %v3147_v14, %v5225_v24 }
 0x81a   : > { %v3097_v19 = vpop.f32.mrf.mxu0 }
 0x81b   : > { %v6303_v52 = vsub.f32 %v3111_v59, %v3175_v3  ;;  %v3098_v35 = vadd.f32 %v6190_v2, %v3097_v19  ;;  %v3217_v59 = vsel %vm703_vm0, %v3199_v61, 0.0 }
 0x81d   : > { %v6307_v34 = vadd.f32 %v3098_v35, %v6179_v17  ;;  %v3207_v47 = vmul.f32 %v6303_v52, %v6303_v52  ;;  %v3170_v17 = vmul.f32 %v3132_v31, %v5225_v24 }
 0x81f   : > { %v3241_v33 = vsel %vm703_vm0, %v3207_v47, 0.0  ;;  %v3160_v51 = vsel %vm703_vm0, %v6307_v34, 0.0  ;;  %v6329_v18 = vsub.f32 %v6223_v36, %v3170_v17  ;;  %v3200_v36 = vmul.f32 %v6326_v44, %v6326_v44 }
 0x820   : > { %3242 = vadd.xlane.f32.xlu1 %v3241_v33  ;;  %3161 = vadd.xlane.f32.xlu2 %v3160_v51 }
 0x821   : > { %v3202_v6 = vmul.f32 %v6329_v18, %v6329_v18  ;;  %v3220_v45 = vsel %vm703_vm0, %v3200_v36, 0.0  ;;  %v6401_v36 = vld [vmem:[%s6548_s3 + $0xc] ss:$0 sm:$0xff] }
 0x822   : > { %v3099_v28 = vpop.f32.mrf.mxu0 }
 0x823   : > { %v3100_v1 = vadd.f32 %v6190_v2, %v3099_v28  ;;  %v3171_v2 = vmul.f32 %v3135_v56, %v5225_v24  ;;  %v3226_v48 = vsel %vm703_vm0, %v3202_v6, 0.0 }
 0x825   : > { %v6323_v49 = vadd.f32 %v3100_v1, %v6181_v9  ;;  %v3173_v9 = vmul.f32 %v3141_v63, %v5225_v24  ;;  %v6341_v39 = vsub.f32 %v6231_v29, %v3171_v2  ;;  %v6395_v2 = vld [vmem:[%s6548_s3 + $0xb] ss:$0 sm:$0xff] }
 0x827   : > { %v3163_v58 = vsel %vm703_vm0, %v6323_v49, 0.0  ;;  %v6344_v50 = vsub.f32 %v6241_v32, %v3173_v9  ;;  %v3203_v29 = vmul.f32 %v6341_v39, %v6341_v39  ;;  %v6355_v32 = vsub.f32 %v6249_v20, %v3174_v40 }
 0x828   : > { %3164 = vadd.xlane.f32.xlu0 %v3163_v58  ;;  %3218 = vadd.xlane.f32.xlu2 %v3217_v59  ;;  %v3150_v62 = vpop.xlane.xlu1 %3149 }
 0x829   : > { %v3176_v10 = vmul.f32 %v3150_v62, %v5225_v24  ;;  %v3205_v21 = vmul.f32 %v6344_v50, %v6344_v50  ;;  %v3229_v42 = vsel %vm703_vm0, %v3203_v29, 0.0  ;;  %v3206_v57 = vmul.f32 %v6355_v32, %v6355_v32 }
 0x82b   : > { %v6358_v26 = vsub.f32 %v6259_v15, %v3176_v10  ;;  %v3235_v22 = vsel %vm703_vm0, %v3205_v21, 0.0  ;;  %v3238_v27 = vsel %vm703_vm0, %v3206_v57, 0.0 }
 0x82d   : > { %v3208_v46 = vmul.f32 %v6358_v26, %v6358_v26 }
 0x82f   : > { %v3244_v15 = vsel %vm703_vm0, %v3208_v46, 0.0 }
 0x830   : > { %3227 = vadd.xlane.f32.xlu2 %v3226_v48  ;;  %3221 = vadd.xlane.f32.xlu0 %v3220_v45  ;;  %v3153_v8 = vpop.xlane.xlu2 %3152 }
 0x831   : > { %v3177_v25 = vmul.f32 %v3153_v8, %v5225_v24 }
 0x833   : > { %v6368_v20 = vsub.f32 %v6265_v0, %v3177_v25 }
 0x835   : > { %v3209_v5 = vmul.f32 %v6368_v20, %v6368_v20 }
 0x837   : > { %v3247_v43 = vsel %vm703_vm0, %v3209_v5, 0.0 }
 0x838   : > { %3236 = vadd.xlane.f32.xlu2 %v3235_v22  ;;  %3230 = vadd.xlane.f32.xlu0 %v3229_v42 }
 0x840   : > { %3245 = vadd.xlane.f32.xlu2 %v3244_v15  ;;  %3239 = vadd.xlane.f32.xlu0 %v3238_v27 }
 0x841   : > { %v3156_v37 = vpop.xlane.xlu0 %3155 }
 0x842   : > { %v3178_v16 = vmul.f32 %v3156_v37, %v5225_v24 }
 0x844   : > { %v6376_v4 = vsub.f32 %v6271_v54, %v3178_v16 }
 0x846   : > { %v3210_v0 = vmul.f32 %v6376_v4, %v6376_v4 }
 0x848   : > { %3248 = vadd.xlane.f32.xlu0 %v3247_v43  ;;  %v3250_v38 = vsel %vm703_vm0, %v3210_v0, 0.0 }
 0x849   : > { %v3159_v23 = vpop.xlane.xlu1 %3158  ;;  %3251 = vadd.xlane.f32.xlu1 %v3250_v38 }
 0x84a   : > { %v3179_v14 = vmul.f32 %v3159_v23, %v5225_v24 }
 0x84c   : > { %v6384_v3 = vsub.f32 %v6278_v30, %v3179_v14 }
 0x84e   : > { %v3211_v19 = vmul.f32 %v6384_v3, %v6384_v3 }
 0x850   : > { %v3253_v54 = vsel %vm703_vm0, %v3211_v19, 0.0 }
 0x851   : > { %v3216_v13 = vpop.xlane.xlu1 %3215  ;;  %3254 = vadd.xlane.f32.xlu2 %v3253_v54 }
 0x852   : > { %v3262_v35 = vmul.f32 %v3216_v13, %v5225_v24 }
 0x854   : > { %v3278_v47 = vadd.f32 1e-12, %v3262_v35 }
 0x856   : > { %4125 = vrsqrt.f32 %v3278_v47  ;;  %vm3300_vm11 = vweird.f32 %v3278_v47 }
 0x859   : > { %v3225_v33 = vpop.xlane.xlu1 %3224 }
 0x85a   : > { %v3265_v51 = vmul.f32 %v3225_v33, %v5225_v24 }
 0x85c   : > { %v4126_v41 = vpop.eup %4125  ;;  %v3281_v31 = vadd.f32 1e-12, %v3265_v51 }
 0x85d   : > { %v3295_v28 = vmul.f32 %v4126_v41, %v3278_v47  ;;  %vm3301_vm15 = vweird.f32 %v4126_v41 }
 0x85e   : > { %4127 = vrsqrt.f32 %v3281_v31  ;;  %vm3302_vm12 = vmor %vm3300_vm11, %vm3301_vm15  ;;  %vm3330_vm14 = vweird.f32 %v3281_v31 }
 0x85f   : > { %v3296_v30 = vmul.f32 %v4126_v41, %v3295_v28 }
 0x861   : > { %v3297_v12 = vmul.f32 0.5, %v3296_v30  ;;  %v3234_v17 = vpop.xlane.xlu1 %3233 }
 0x862   : > { %v3268_v1 = vmul.f32 %v3234_v17, %v5225_v24 }
 0x863   : > { %v3298_v61 = vsub.f32 1.5, %v3297_v12 }
 0x864   : > { %v4128_v58 = vpop.eup %4127  ;;  %v3284_v59 = vadd.f32 1e-12, %v3268_v1 }
 0x865   : > { %v3299_v56 = vmul.f32 %v4126_v41, %v3298_v61  ;;  %v3325_v63 = vmul.f32 %v4128_v58, %v3281_v31  ;;  %vm3331_vm13 = vweird.f32 %v4128_v58 }
 0x866   : > { %4129 = vrsqrt.f32 %v3284_v59  ;;  %vm3332_vm1 = vmor %vm3330_vm14, %vm3331_vm13  ;;  %vm3360_vm3 = vweird.f32 %v3284_v59 }
 0x867   : > { %v3303_v9 = vsel %vm3302_vm12, %v4126_v41, %v3299_v56  ;;  %v3326_v6 = vmul.f32 %v4128_v58, %v3325_v63 }
 0x868   : > { %v3454_v48 = vmul.f32 %v3303_v9, %v6281_v60 }
 0x869   : > { %v3327_v45 = vmul.f32 0.5, %v3326_v6 }
 0x86a   : > { %v3471_v11 = vmul.f32 %v6395_v2, %v3454_v48 }
 0x86b   : > { %v3328_v62 = vsub.f32 1.5, %v3327_v45 }
 0x86c   : > { %v4130_v40 = vpop.eup %4129  ;;  %v3488_v10 = vadd.f32 %v6401_v36, %v3471_v11 }
 0x86d   : > { %v3329_v21 = vmul.f32 %v4128_v58, %v3328_v62  ;;  %v3355_v29 = vmul.f32 %v4130_v40, %v3284_v59  ;;  %vm3361_vm2 = vweird.f32 %v4130_v40 }
 0x86e   : > { %3504 = vst.msk [vmem:[%s6408_s25] sm:$0xff] %vm703_vm0, %v3488_v10  ;;  %vm3362_vm4 = vmor %vm3360_vm3, %vm3361_vm2 }
 0x86f   : > { %v3333_v60 = vsel %vm3332_vm1, %v4128_v58, %v3329_v21  ;;  %v3356_v22 = vmul.f32 %v4130_v40, %v3355_v29 }
 0x870   : > { %v3457_v42 = vmul.f32 %v3333_v60, %v6289_v55 }
 0x871   : > { %v3357_v8 = vmul.f32 0.5, %v3356_v22 }
 0x872   : > { %v3474_v25 = vmul.f32 %v6395_v2, %v3457_v42 }
 0x873   : > { %v3358_v46 = vsub.f32 1.5, %v3357_v8 }
 0x874   : > { %v3491_v57 = vadd.f32 %v6401_v36, %v3474_v25 }
 0x875   : > { %v3359_v15 = vmul.f32 %v4130_v40, %v3358_v46 }
 0x876   : > { %3507 = vst.msk [vmem:[%s6408_s25 + $0x18] sm:$0xff] %vm703_vm0, %v3491_v57 }
 0x877   : > { %v3363_v27 = vsel %vm3362_vm4, %v4130_v40, %v3359_v15 }
 0x878   : > { %v3460_v37 = vmul.f32 %v3363_v27, %v6295_v7 }
 0x87a   : > { %v3477_v5 = vmul.f32 %v6395_v2, %v3460_v37 }
 0x87c   : > { %v3494_v16 = vadd.f32 %v6401_v36, %v3477_v5 }
 0x87e   : > { %3510 = vst.msk [vmem:[%s6408_s25 + $0x30] sm:$0xff] %vm703_vm0, %v3494_v16 }
 0x893   : > { %v3243_v55 = vpop.xlane.xlu1 %3242  ;;  %v3162_v43 = vpop.xlane.xlu2 %3161 }
 0x894   : > { %v3271_v0 = vmul.f32 %v3243_v55, %v5225_v24  ;;  %v3180_v38 = vmul.f32 %v3162_v43, %v5225_v24 }
 0x896   : > { %v3287_v23 = vadd.f32 1e-12, %v3271_v0  ;;  %v6426_v14 = vsub.f32 %v6307_v34, %v3180_v38 }
 0x898   : > { %4131 = vrsqrt.f32 %v3287_v23  ;;  %v3212_v7 = vmul.f32 %v6426_v14, %v6426_v14  ;;  %vm3390_vm6 = vweird.f32 %v3287_v23 }
 0x89a   : > { %v3256_v19 = vsel %vm703_vm0, %v3212_v7, 0.0 }
 0x89b   : > { %v3165_v54 = vpop.xlane.xlu0 %3164  ;;  %3257 = vadd.xlane.f32.xlu0 %v3256_v19  ;;  %v3219_v13 = vpop.xlane.xlu2 %3218 }
 0x89c   : > { %v3181_v35 = vmul.f32 %v3165_v54, %v5225_v24  ;;  %v3263_v47 = vmul.f32 %v3219_v13, %v5225_v24 }
 0x89e   : > { %v4132_v33 = vpop.eup %4131  ;;  %v6434_v51 = vsub.f32 %v6323_v49, %v3181_v35  ;;  %v3279_v41 = vadd.f32 1e-12, %v3263_v47 }
 0x89f   : > { %v3385_v34 = vmul.f32 %v4132_v33, %v3287_v23  ;;  %vm3391_vm5 = vweird.f32 %v4132_v33 }
 0x8a0   : > { %4133 = vrsqrt.f32 %v3279_v41  ;;  %v3213_v31 = vmul.f32 %v6434_v51, %v6434_v51  ;;  %vm3392_vm7 = vmor %vm3390_vm6, %vm3391_vm5  ;;  %vm3310_vm9 = vweird.f32 %v3279_v41 }
 0x8a1   : > { %v3386_v28 = vmul.f32 %v4132_v33, %v3385_v34 }
 0x8a2   : > { %v3259_v30 = vsel %vm703_vm0, %v3213_v31, 0.0 }
 0x8a3   : > { %v3387_v12 = vmul.f32 0.5, %v3386_v28  ;;  %3260 = vadd.xlane.f32.xlu1 %v3259_v30  ;;  %v3222_v17 = vpop.xlane.xlu0 %3221  ;;  %v3228_v1 = vpop.xlane.xlu2 %3227 }
 0x8a4   : > { %v3264_v61 = vmul.f32 %v3222_v17, %v5225_v24  ;;  %v3266_v58 = vmul.f32 %v3228_v1, %v5225_v24 }
 0x8a5   : > { %v3388_v59 = vsub.f32 1.5, %v3387_v12 }
 0x8a6   : > { %v4134_v49 = vpop.eup %4133  ;;  %v3280_v56 = vadd.f32 1e-12, %v3264_v61  ;;  %v3282_v63 = vadd.f32 1e-12, %v3266_v58 }
 0x8a7   : > { %v3389_v9 = vmul.f32 %v4132_v33, %v3388_v59  ;;  %v3305_v6 = vmul.f32 %v4134_v49, %v3279_v41  ;;  %vm3311_vm8 = vweird.f32 %v4134_v49 }
 0x8a8   : > { %4135 = vrsqrt.f32 %v3280_v56  ;;  %vm3312_vm10 = vmor %vm3310_vm9, %vm3311_vm8  ;;  %vm3320_vm12 = vweird.f32 %v3280_v56  ;;  %vm3340_vm14 = vweird.f32 %v3282_v63 }
 0x8a9   : > { %v3393_v48 = vsel %vm3392_vm7, %v4132_v33, %v3389_v9  ;;  %v3306_v45 = vmul.f32 %v4134_v49, %v3305_v6  ;;  %4137 = vrsqrt.f32 %v3282_v63 }
 0x8aa   : > { %v3463_v11 = vmul.f32 %v3393_v48, %v6303_v52 }
 0x8ab   : > { %v3307_v62 = vmul.f32 0.5, %v3306_v45  ;;  %v3231_v40 = vpop.xlane.xlu0 %3230  ;;  %v3237_v10 = vpop.xlane.xlu2 %3236 }
 0x8ac   : > { %v3480_v21 = vmul.f32 %v6395_v2, %v3463_v11  ;;  %v3267_v29 = vmul.f32 %v3231_v40, %v5225_v24  ;;  %v3269_v60 = vmul.f32 %v3237_v10, %v5225_v24 }
 0x8ad   : > { %v3308_v22 = vsub.f32 1.5, %v3307_v62 }
 0x8ae   : > { %v4136_v42 = vpop.eup %4135  ;;  %v3497_v8 = vadd.f32 %v6401_v36, %v3480_v21  ;;  %v6446_v25 = vadd.f32 1e-12, %v3267_v29  ;;  %v6448_v46 = vadd.f32 1e-12, %v3269_v60 }
 0x8af   : > { %v4138_v52 = vpop.eup %4137  ;;  %v3309_v57 = vmul.f32 %v4134_v49, %v3308_v22  ;;  %v3315_v15 = vmul.f32 %v4136_v42, %v3280_v56  ;;  %vm3321_vm15 = vweird.f32 %v4136_v42 }
 0x8b0   : > { %3513 = vst.msk [vmem:[%s6408_s25 + $0x48] sm:$0xff] %vm703_vm0, %v3497_v8  ;;  %v3335_v27 = vmul.f32 %v4138_v52, %v3282_v63  ;;  %4139 = vrsqrt.f32 %v6446_v25  ;;  %vm3341_vm11 = vweird.f32 %v4138_v52  ;;  %vm3322_vm13 = vmor %vm3320_vm12, %vm3321_vm15  ;;  %vm3350_vm4 = vweird.f32 %v6446_v25 }
 0x8b1   : > { %v3313_v37 = vsel %vm3312_vm10, %v4134_v49, %v3309_v57  ;;  %v3316_v5 = vmul.f32 %v4136_v42, %v3315_v15  ;;  %4141 = vrsqrt.f32 %v6448_v46  ;;  %vm3342_vm1 = vmor %vm3340_vm14, %vm3341_vm11  ;;  %vm3370_vm6 = vweird.f32 %v6448_v46 }
 0x8b2   : > { %v3455_v16 = vmul.f32 %v3313_v37, %v6312_v53  ;;  %v3336_v55 = vmul.f32 %v4138_v52, %v3335_v27 }
 0x8b3   : > { %v3317_v43 = vmul.f32 0.5, %v3316_v5  ;;  %v3240_v0 = vpop.xlane.xlu0 %3239  ;;  %v3246_v38 = vpop.xlane.xlu2 %3245 }
 0x8b4   : > { %v3472_v23 = vmul.f32 %v6395_v2, %v3455_v16  ;;  %v3337_v7 = vmul.f32 0.5, %v3336_v55  ;;  %v3270_v19 = vmul.f32 %v3240_v0, %v5225_v24  ;;  %v3272_v54 = vmul.f32 %v3246_v38, %v5225_v24 }
 0x8b5   : > { %v3318_v13 = vsub.f32 1.5, %v3317_v43 }
 0x8b6   : > { %v4140_v35 = vpop.eup %4139  ;;  %v3489_v47 = vadd.f32 %v6401_v36, %v3472_v23  ;;  %v3338_v33 = vsub.f32 1.5, %v3337_v7  ;;  %v6459_v53 = vadd.f32 1e-12, %v3270_v19  ;;  %v6461_v41 = vadd.f32 1e-12, %v3272_v54 }
 0x8b7   : > { %v4142_v34 = vpop.eup %4141  ;;  %v3319_v31 = vmul.f32 %v4136_v42, %v3318_v13  ;;  %v3345_v28 = vmul.f32 %v4140_v35, %v6446_v25  ;;  %vm3351_vm2 = vweird.f32 %v4140_v35 }
 0x8b8   : > { %3505 = vst.msk [vmem:[%s6408_s25 + $0x8] sm:$0xff] %vm703_vm0, %v3489_v47  ;;  %v3339_v30 = vmul.f32 %v4138_v52, %v3338_v33  ;;  %v3365_v12 = vmul.f32 %v4142_v34, %v6448_v46  ;;  %4143 = vrsqrt.f32 %v6459_v53  ;;  %vm3371_vm3 = vweird.f32 %v4142_v34  ;;  %vm3352_vm5 = vmor %vm3350_vm4, %vm3351_vm2 }
 0x8b9   : > { %v3323_v17 = vsel %vm3322_vm13, %v4136_v42, %v3319_v31  ;;  %v3346_v1 = vmul.f32 %v4140_v35, %v3345_v28  ;;  %4145 = vrsqrt.f32 %v6461_v41  ;;  %vm3372_vm7 = vmor %vm3370_vm6, %vm3371_vm3  ;;  %vm3380_vm10 = vweird.f32 %v6459_v53 }
 0x8ba   : > { %v3456_v61 = vmul.f32 %v3323_v17, %v6326_v44  ;;  %v3343_v58 = vsel %vm3342_vm1, %v4138_v52, %v3339_v30  ;;  %v3366_v59 = vmul.f32 %v4142_v34, %v3365_v12  ;;  %vm3400_vm11 = vweird.f32 %v6461_v41 }
 0x8bb   : > { %v3458_v49 = vmul.f32 %v3343_v58, %v6329_v18  ;;  %v3347_v56 = vmul.f32 0.5, %v3346_v1  ;;  %v3249_v9 = vpop.xlane.xlu0 %3248 }
 0x8bc   : > { %v3473_v63 = vmul.f32 %v6395_v2, %v3456_v61  ;;  %v3367_v6 = vmul.f32 0.5, %v3366_v59  ;;  %v3273_v48 = vmul.f32 %v3249_v9, %v5225_v24  ;;  %v3252_v10 = vpop.xlane.xlu1 %3251 }
 0x8bd   : > { %v3475_v45 = vmul.f32 %v6395_v2, %v3458_v49  ;;  %v3348_v11 = vsub.f32 1.5, %v3347_v56  ;;  %v3274_v52 = vmul.f32 %v3252_v10, %v5225_v24 }
 0x8be   : > { %v4144_v62 = vpop.eup %4143  ;;  %v3490_v40 = vadd.f32 %v6401_v36, %v3473_v63  ;;  %v3368_v44 = vsub.f32 1.5, %v3367_v6  ;;  %v6476_v18 = vadd.f32 1e-12, %v3273_v48 }
 0x8bf   : > { %v4146_v21 = vpop.eup %4145  ;;  %v3492_v29 = vadd.f32 %v6401_v36, %v3475_v45  ;;  %v3349_v60 = vmul.f32 %v4140_v35, %v3348_v11  ;;  %v3375_v22 = vmul.f32 %v4144_v62, %v6459_v53  ;;  %v3290_v5 = vadd.f32 1e-12, %v3274_v52 }
 0x8c0   : > { %3506 = vst.msk [vmem:[%s6408_s25 + $0x10] sm:$0xff] %vm703_vm0, %v3490_v40  ;;  %v3369_v42 = vmul.f32 %v4142_v34, %v3368_v44  ;;  %v3395_v8 = vmul.f32 %v4146_v21, %v6461_v41  ;;  %4147 = vrsqrt.f32 %v6476_v18  ;;  %vm3381_vm8 = vweird.f32 %v4144_v62 }
 0x8c1   : > { %3508 = vst.msk [vmem:[%s6408_s25 + $0x20] sm:$0xff] %vm703_vm0, %v3492_v29  ;;  %v3353_v57 = vsel %vm3352_vm5, %v4140_v35, %v3349_v60  ;;  %v3376_v15 = vmul.f32 %v4144_v62, %v3375_v22  ;;  %4149 = vrsqrt.f32 %v3290_v5  ;;  %vm3401_vm9 = vweird.f32 %v4146_v21  ;;  %vm3382_vm15 = vmor %vm3380_vm10, %vm3381_vm8 }
 0x8c2   : > { %v3459_v25 = vmul.f32 %v3353_v57, %v6341_v39  ;;  %v3373_v27 = vsel %vm3372_vm7, %v4142_v34, %v3369_v42  ;;  %v3396_v37 = vmul.f32 %v4146_v21, %v3395_v8  ;;  %vm3402_vm12 = vmor %vm3400_vm11, %vm3401_vm9  ;;  %vm3410_vm14 = vweird.f32 %v6476_v18 }
 0x8c3   : > { %v3461_v16 = vmul.f32 %v3373_v27, %v6344_v50  ;;  %v3377_v46 = vmul.f32 0.5, %v3376_v15  ;;  %vm3420_vm3 = vweird.f32 %v3290_v5 }
 0x8c4   : > { %v3476_v55 = vmul.f32 %v6395_v2, %v3459_v25  ;;  %v3397_v43 = vmul.f32 0.5, %v3396_v37  ;;  %v3255_v39 = vpop.xlane.xlu2 %3254 }
 0x8c5   : > { %v3478_v0 = vmul.f32 %v6395_v2, %v3461_v16  ;;  %v3378_v38 = vsub.f32 1.5, %v3377_v46  ;;  %v3275_v13 = vmul.f32 %v3255_v39, %v5225_v24 }
 0x8c6   : > { %v3493_v23 = vadd.f32 %v6401_v36, %v3476_v55  ;;  %v3398_v7 = vsub.f32 1.5, %v3397_v43  ;;  %v4148_v19 = vpop.eup %4147 }
 0x8c7   : > { %v3495_v54 = vadd.f32 %v6401_v36, %v3478_v0  ;;  %v3379_v50 = vmul.f32 %v4144_v62, %v3378_v38  ;;  %v3405_v47 = vmul.f32 %v4148_v19, %v6476_v18  ;;  %v3291_v34 = vadd.f32 1e-12, %v3275_v13  ;;  %v4150_v31 = vpop.eup %4149 }
 0x8c8   : > { %3509 = vst.msk [vmem:[%s6408_s25 + $0x28] sm:$0xff] %vm703_vm0, %v3493_v23  ;;  %v3399_v35 = vmul.f32 %v4146_v21, %v3398_v7  ;;  %v3415_v17 = vmul.f32 %v4150_v31, %v3290_v5  ;;  %vm3411_vm13 = vweird.f32 %v4148_v19  ;;  %vm3421_vm1 = vweird.f32 %v4150_v31 }
 0x8c9   : > { %3511 = vst.msk [vmem:[%s6408_s25 + $0x38] sm:$0xff] %vm703_vm0, %v3495_v54  ;;  %v3383_v33 = vsel %vm3382_vm15, %v4144_v62, %v3379_v50  ;;  %v3406_v30 = vmul.f32 %v4148_v19, %v3405_v47  ;;  %4151 = vrsqrt.f32 %v3291_v34  ;;  %vm3412_vm2 = vmor %vm3410_vm14, %vm3411_vm13  ;;  %vm3430_vm6 = vweird.f32 %v3291_v34 }
 0x8ca   : > { %v3462_v28 = vmul.f32 %v3383_v33, %v6355_v32  ;;  %v3403_v53 = vsel %vm3402_vm12, %v4146_v21, %v3399_v35  ;;  %v3416_v58 = vmul.f32 %v4150_v31, %v3415_v17  ;;  %vm3422_vm4 = vmor %vm3420_vm3, %vm3421_vm1 }
 0x8cb   : > { %v3464_v12 = vmul.f32 %v3403_v53, %v6358_v26  ;;  %v3407_v1 = vmul.f32 0.5, %v3406_v30 }
 0x8cc   : > { %v3479_v41 = vmul.f32 %v6395_v2, %v3462_v28  ;;  %v3417_v32 = vmul.f32 0.5, %v3416_v58 }
 0x8cd   : > { %v3481_v61 = vmul.f32 %v6395_v2, %v3464_v12  ;;  %v3408_v49 = vsub.f32 1.5, %v3407_v1 }
 0x8ce   : > { %v3496_v59 = vadd.f32 %v6401_v36, %v3479_v41  ;;  %v3418_v63 = vsub.f32 1.5, %v3417_v32 }
 0x8cf   : > { %v3498_v56 = vadd.f32 %v6401_v36, %v3481_v61  ;;  %v3409_v9 = vmul.f32 %v4148_v19, %v3408_v49  ;;  %v4152_v26 = vpop.eup %4151 }
 0x8d0   : > { %3512 = vst.msk [vmem:[%s6408_s25 + $0x40] sm:$0xff] %vm703_vm0, %v3496_v59  ;;  %v3425_v48 = vmul.f32 %v4152_v26, %v3291_v34  ;;  %v3419_v45 = vmul.f32 %v4150_v31, %v3418_v63  ;;  %vm3431_vm5 = vweird.f32 %v4152_v26 }
 0x8d1   : > { %3514 = vst.msk [vmem:[%s6408_s25 + $0x50] sm:$0xff] %vm703_vm0, %v3498_v56  ;;  %v3413_v6 = vsel %vm3412_vm2, %v4148_v19, %v3409_v9  ;;  %vm3432_vm7 = vmor %vm3430_vm6, %vm3431_vm5 }
 0x8d2   : > { %v3465_v11 = vmul.f32 %v3413_v6, %v6368_v20  ;;  %v3426_v62 = vmul.f32 %v4152_v26, %v3425_v48  ;;  %v3423_v40 = vsel %vm3422_vm4, %v4150_v31, %v3419_v45 }
 0x8d3   : > { %v3466_v10 = vmul.f32 %v3423_v40, %v6376_v4 }
 0x8d4   : > { %v3482_v44 = vmul.f32 %v6395_v2, %v3465_v11  ;;  %v3427_v18 = vmul.f32 0.5, %v3426_v62 }
 0x8d5   : > { %v3483_v29 = vmul.f32 %v6395_v2, %v3466_v10 }
 0x8d6   : > { %v3499_v21 = vadd.f32 %v6401_v36, %v3482_v44  ;;  %v3428_v60 = vsub.f32 1.5, %v3427_v18 }
 0x8d7   : > { %v3500_v20 = vadd.f32 %v6401_v36, %v3483_v29 }
 0x8d8   : > { %3515 = vst.msk [vmem:[%s6408_s25 + $0x58] sm:$0xff] %vm703_vm0, %v3499_v21  ;;  %v3429_v22 = vmul.f32 %v4152_v26, %v3428_v60 }
 0x8d9   : > { %3516 = vst.msk [vmem:[%s6408_s25 + $0x60] sm:$0xff] %vm703_vm0, %v3500_v20 }
 0x8da   : > { %v3433_v42 = vsel %vm3432_vm7, %v4152_v26, %v3429_v22 }
 0x8db   : > { %v3467_v4 = vmul.f32 %v3433_v42, %v6384_v3 }
 0x8dd   : > { %v3484_v8 = vmul.f32 %v6395_v2, %v3467_v4 }
 0x8df   : > { %v3501_v52 = vadd.f32 %v6401_v36, %v3484_v8 }
 0x8e1   : > { %3517 = vst.msk [vmem:[%s6408_s25 + $0x68] sm:$0xff] %vm703_vm0, %v3501_v52 }
 0x90e   : > { %v3258_v57 = vpop.xlane.xlu0 %3257 }
 0x90f   : > { %v3276_v15 = vmul.f32 %v3258_v57, %v5225_v24 }
 0x911   : > { %v3292_v25 = vadd.f32 1e-12, %v3276_v15 }
 0x913   : > { %4153 = vrsqrt.f32 %v3292_v25  ;;  %vm3440_vm9 = vweird.f32 %v3292_v25 }
 0x916   : > { %v3261_v27 = vpop.xlane.xlu1 %3260 }
 0x917   : > { %v3277_v37 = vmul.f32 %v3261_v27, %v5225_v24 }
 0x919   : > { %v4154_v5 = vpop.eup %4153  ;;  %v3293_v16 = vadd.f32 1e-12, %v3277_v37 }
 0x91a   : > { %v3435_v46 = vmul.f32 %v4154_v5, %v3292_v25  ;;  %vm3441_vm8 = vweird.f32 %v4154_v5 }
 0x91b   : > { %4155 = vrsqrt.f32 %v3293_v16  ;;  %vm3442_vm10 = vmor %vm3440_vm9, %vm3441_vm8  ;;  %vm3450_vm11 = vweird.f32 %v3293_v16 }
 0x91c   : > { %v3436_v55 = vmul.f32 %v4154_v5, %v3435_v46 }
 0x91e   : > { %v3437_v3 = vmul.f32 0.5, %v3436_v55 }
 0x920   : > { %v3438_v43 = vsub.f32 1.5, %v3437_v3 }
 0x921   : > { %v4156_v0 = vpop.eup %4155 }
 0x922   : > { %v3439_v38 = vmul.f32 %v4154_v5, %v3438_v43  ;;  %v3445_v23 = vmul.f32 %v4156_v0, %v3293_v16  ;;  %vm3451_vm15 = vweird.f32 %v4156_v0 }
 0x923   : > { %vm3452_vm12 = vmor %vm3450_vm11, %vm3451_vm15 }
 0x924   : > { %v3443_v7 = vsel %vm3442_vm10, %v4154_v5, %v3439_v38  ;;  %v3446_v39 = vmul.f32 %v4156_v0, %v3445_v23 }
 0x925   : > { %v3468_v19 = vmul.f32 %v3443_v7, %v6426_v14 }
 0x926   : > { %v3447_v24 = vmul.f32 0.5, %v3446_v39 }
 0x927   : > { %v3485_v54 = vmul.f32 %v6395_v2, %v3468_v19 }
 0x928   : > { %v3448_v50 = vsub.f32 1.5, %v3447_v24 }
 0x929   : > { %v3502_v13 = vadd.f32 %v6401_v36, %v3485_v54 }
 0x92a   : > { %v3449_v35 = vmul.f32 %v4156_v0, %v3448_v50 }
 0x92b   : > { %3518 = vst.msk [vmem:[%s6408_s25 + $0x70] sm:$0xff] %vm703_vm0, %v3502_v13 }
 0x92c   : > { %v3453_v47 = vsel %vm3452_vm12, %v4156_v0, %v3449_v35 }
 0x92d   : > { %v3469_v33 = vmul.f32 %v3453_v47, %v6434_v51 }
 0x92f   : > { %v3486_v34 = vmul.f32 %v6395_v2, %v3469_v33 }
 0x931   : > { %v3503_v31 = vadd.f32 %v6401_v36, %v3486_v34 }
 0x933   : > { %3519 = vst.msk [vmem:[%s6408_s25 + $0x78] sm:$0xff] %vm703_vm0, %v3503_v31 }
 0x934 PF: > { %s23_s13 = sadd.s32 1, %s4299_s13  }
 0x935   : > { %p20_p7 = scmp.ge.s32.totalorder %s23_s13, 4  }
 0x937   :  { %22 = sbr.rel (!%p20_p7) target bundleno = 3 (0x3), region = 107 }
 0x93c   :  { %3542 = vsyncpa [#allocation3], 1 }
 0x93d   :  { %3544 = vsyncpa [#allocation3 + $0x1], 1 }
 0x93e   :  { %3545 = vsyncpa [#allocation5], 1 }
 0x93f   :  { %3546 = vsyncpa [#allocation8], 1 }

</bundles_post_ra>
